<compile_context>
chip_gen: v6e
topology: v6e:2x2x1
jax: 0.10.0
libtpu: 0.0.40
codegen_flags: <defaults>
</compile_context>

<pallas_src>
import numpy as np
import jax
import jax.numpy as jnp
from jax.experimental import pallas as pl
from jax.experimental.pallas import tpu as pltpu  # noqa: F401  (kept for TPU-specific tuning hooks)

# ----------------------- model hyperparameters (small test) -----------------
BATCH = 2
SEQ = 8
INPUT_DIM = 16
HIDDEN_DIM = 32
NUM_LAYERS = 2
OUTPUT_DIM = 1


# ----------------------- fused Pallas kernel --------------------------------
def _lstm_cell(gates, c_prev, H):
    """gates: (B, 4H) pre-activation, PyTorch gate order [i, f, g, o]."""
    i = jax.nn.sigmoid(gates[:, 0 * H:1 * H])
    f = jax.nn.sigmoid(gates[:, 1 * H:2 * H])
    g = jnp.tanh(gates[:, 2 * H:3 * H])
    o = jax.nn.sigmoid(gates[:, 3 * H:4 * H])
    c_new = f * c_prev + i * g
    h_new = o * jnp.tanh(c_new)
    return h_new, c_new


def _make_bilstm_kernel(T, B, H):
    """Builds the fused kernel for static (T, B, H)."""
    G = 4 * H  # gate width per direction

    def run_bidir_layer(gx, whh_cat):
        """One bidirectional LSTM layer, both directions fused.

        gx:      (T*B, 8H) hoisted x-projection (+bias); cols [0:4H]=fwd,
                 [4H:8H]=bwd; rows are time-major (row t*B+b is time t).
        whh_cat: (2H, 8H) block-diagonal [W_hh_fwd^T | 0 ; 0 | W_hh_bwd^T].
        Returns python lists hs_f, hs_b of per-time (B, H) hidden states.
        """
        zeros = jnp.zeros((B, H), jnp.float32)
        h_f, c_f, h_b, c_b = zeros, zeros, zeros, zeros
        hs_f = [None] * T
        hs_b = [None] * T
        # Fully unrolled static loop over time (== fori_loop(..., unroll=True)).
        for s in range(T):
            r = T - 1 - s                                  # backward time index
            h_cat = jnp.concatenate([h_f, h_b], axis=-1)   # (B, 2H)
            gh = jnp.dot(h_cat, whh_cat,
                         preferred_element_type=jnp.float32)  # (B, 8H): 1 MXU op
            gates_f = gh[:, :G] + gx[s * B:(s + 1) * B, :G]
            gates_b = gh[:, G:] + gx[r * B:(r + 1) * B, G:]
            h_f, c_f = _lstm_cell(gates_f, c_f, H)
            h_b, c_b = _lstm_cell(gates_b, c_b, H)
            hs_f[s] = h_f
            hs_b[r] = h_b
        return hs_f, hs_b

    def kernel(x_ref, wih0_ref, whh0_ref, b0_ref,
               wih1_ref, whh1_ref, b1_ref,
               fcw_ref, fcb_ref, out_ref):
        # ---- layer 0: hoisted input projection (whole sequence, both dirs) --
        gx0 = jnp.dot(x_ref[...], wih0_ref[...],
                      preferred_element_type=jnp.float32) + b0_ref[...]
        hs0_f, hs0_b = run_bidir_layer(gx0, whh0_ref[...])

        # time-ordered layer-0 output (T*B, 2H); stays in VMEM/vregs, no HBM.
        out0 = jnp.concatenate(
            [jnp.concatenate([hs0_f[t], hs0_b[t]], axis=-1) for t in range(T)],
            axis=0)

        # ---- layer 1 --------------------------------------------------------
        gx1 = jnp.dot(out0, wih1_ref[...],
                      preferred_element_type=jnp.float32) + b1_ref[...]
        hs1_f, hs1_b = run_bidir_layer(gx1, whh1_ref[...])

        # ---- fused classifier head on out[:, -1, :] --------------------------
        feat = jnp.concatenate([hs1_f[T - 1], hs1_b[T - 1]], axis=-1)  # (B, 2H)
        out_ref[...] = (
            jnp.dot(feat, fcw_ref[...], preferred_element_type=jnp.float32)
            + fcb_ref[...]
        )

    return kernel


def bilstm_classifier_forward(x, packed):
    """x: (B, T, D) -> logits (B, OUTPUT_DIM). Matches PyTorch BiLSTMClassifier."""
    B, T, D = x.shape
    H = HIDDEN_DIM
    O = OUTPUT_DIM
    G8 = 8 * H

    # time-major & flattened: row t*B + b == x[b, t, :]
    x2d = jnp.transpose(x, (1, 0, 2)).reshape(T * B, D)

    def full(shape):
        return pl.BlockSpec(shape, lambda: (0,) * len(shape))

    kernel = _make_bilstm_kernel(T, B, H)
    return pl.pallas_call(
        kernel,
        out_shape=jax.ShapeDtypeStruct((B, O), jnp.float32),
        in_specs=[
            full((T * B, D)),
            full((D, G8)), full((2 * H, G8)), full((1, G8)),
            full((2 * H, G8)), full((2 * H, G8)), full((1, G8)),
            full((2 * H, O)), full((1, O)),
        ],
        out_specs=full((B, O)),
    )(x2d,
      packed["wih0"], packed["whh0"], packed["b0"],
      packed["wih1"], packed["whh1"], packed["b1"],
      packed["fc_w"], packed["fc_b"])


# ----------------------- parameter packing for the fused kernel --------------
def pack_params(params):
    """Raw per-direction params -> stacked / block-diagonal kernel layout."""
    H = HIDDEN_DIM
    G = 4 * H
    packed = {}
    for layer in range(NUM_LAYERS):
        wih_f, whh_f, b_f = params[f"l{layer}_fwd"]   # (in,4H), (H,4H), (1,4H)
        wih_b, whh_b, b_b = params[f"l{layer}_bwd"]
        packed[f"wih{layer}"] = jnp.concatenate([wih_f, wih_b], axis=1)  # (in, 8H)
        whh_cat = jnp.zeros((2 * H, 2 * G), jnp.float32)
        whh_cat = whh_cat.at[:H, :G].set(whh_f)
        whh_cat = whh_cat.at[H:, G:].set(whh_b)
        packed[f"whh{layer}"] = whh_cat                                  # (2H, 8H)
        packed[f"b{layer}"] = jnp.concatenate([b_f, b_b], axis=1)        # (1, 8H)
    packed["fc_w"] = params["fc_w"]                                      # (2H, O)
    packed["fc_b"] = params["fc_b"]                                      # (1, O)
    return packed


# ----------------------- pure-JAX reference (for self-check) ----------------
def _lstm_direction_ref(x_tbd, wih_t, whh_t, b):
    T, B, _ = x_tbd.shape
    H = whh_t.shape[0]

    def step(carry, x_tk):
        h, c = carry
        gates = x_tk @ wih_t + h @ whh_t + b[0]
        i = jax.nn.sigmoid(gates[:, 0 * H:1 * H])
        f = jax.nn.sigmoid(gates[:, 1 * H:2 * H])
        g = jnp.tanh(gates[:, 2 * H:3 * H])
        o = jax.nn.sigmoid(gates[:, 3 * H:4 * H])
        c = f * c + i * g
        h = o * jnp.tanh(c)
        return (h, c), h

    init = (jnp.zeros((B, H), jnp.float32), jnp.zeros((B, H), jnp.float32))
    _, hs = jax.lax.scan(step, init, x_tbd)
    return hs


def _forward_ref(x, params):
    x_t = jnp.transpose(x, (1, 0, 2))
    layer_in = x_t
    for layer in range(NUM_LAYERS):
        wih_f, whh_f, b_f = params[f"l{layer}_fwd"]
        wih_b, whh_b, b_b = params[f"l{layer}_bwd"]
        out_f = _lstm_direction_ref(layer_in, wih_f, whh_f, b_f)
        out_b = _lstm_direction_ref(layer_in[::-1], wih_b, whh_b, b_b)[::-1]
        layer_in = jnp.concatenate([out_f, out_b], axis=-1)
    return layer_in[-1] @ params["fc_w"] + params["fc_b"]


# ----------------------- deterministic parameter init -----------------------
def init_params(key):
    params = {}
    bound = 1.0 / np.sqrt(HIDDEN_DIM)
    for layer in range(NUM_LAYERS):
        in_dim = INPUT_DIM if layer == 0 else 2 * HIDDEN_DIM
        for direction in ("fwd", "bwd"):
            key, k0, k1, k2, k3 = jax.random.split(key, 5)
            wih = jax.random.uniform(k0, (4 * HIDDEN_DIM, in_dim),
                                     jnp.float32, -bound, bound)
            whh = jax.random.uniform(k1, (4 * HIDDEN_DIM, HIDDEN_DIM),
                                     jnp.float32, -bound, bound)
            bih = jax.random.uniform(k2, (4 * HIDDEN_DIM,), jnp.float32, -bound, bound)
            bhh = jax.random.uniform(k3, (4 * HIDDEN_DIM,), jnp.float32, -bound, bound)
            # transposed for x @ W^T layout, biases combined (b_ih + b_hh)
            params[f"l{layer}_{direction}"] = (wih.T, whh.T, (bih + bhh)[None, :])
    key, kw, kb = jax.random.split(key, 3)
    fc_bound = 1.0 / np.sqrt(2 * HIDDEN_DIM)
    fc_w = jax.random.uniform(kw, (OUTPUT_DIM, 2 * HIDDEN_DIM),
                              jnp.float32, -fc_bound, fc_bound)
    fc_b = jax.random.uniform(kb, (OUTPUT_DIM,), jnp.float32, -fc_bound, fc_bound)
    params["fc_w"] = fc_w.T                 # (2H, O)
    params["fc_b"] = fc_b[None, :]          # (1, O)
    return params


# ----------------------- main ------------------------------------------------
if __name__ == "__main__":
    key = jax.random.PRNGKey(0)
    key, kx = jax.random.split(key)
    x = jax.random.normal(kx, (BATCH, SEQ, INPUT_DIM), jnp.float32)

    params = init_params(key)
    packed = pack_params(params)

    fwd = jax.jit(bilstm_classifier_forward)
    out = jax.block_until_ready(fwd(x, packed))
    assert out.shape == (BATCH, OUTPUT_DIM), out.shape

    ref = jax.block_until_ready(_forward_ref(x, params))
    np.testing.assert_allclose(np.asarray(out), np.asarray(ref), atol=1e-4, rtol=1e-4)

    print("KERNEL_OK")
</pallas_src>

<mosaic_0001>
module attributes {stable_mosaic.version = 11 : i64} {
  func.func @kernel(%arg0: memref<16x16xf32, #tpu.memory_space<vmem>>, %arg1: memref<16x256xf32, #tpu.memory_space<vmem>>, %arg2: memref<64x256xf32, #tpu.memory_space<vmem>>, %arg3: memref<1x256xf32, #tpu.memory_space<vmem>>, %arg4: memref<64x256xf32, #tpu.memory_space<vmem>>, %arg5: memref<64x256xf32, #tpu.memory_space<vmem>>, %arg6: memref<1x256xf32, #tpu.memory_space<vmem>>, %arg7: memref<64x1xf32, #tpu.memory_space<vmem>>, %arg8: memref<1x1xf32, #tpu.memory_space<vmem>>, %arg9: memref<2x1xf32, #tpu.memory_space<vmem>>) attributes {dimension_semantics = [], scalar_prefetch = 0 : i64, scratch_operands = 0 : i64, tpu.core_type = #tpu.core_type<tc>} {
    %c0 = arith.constant 0 : index
    %c0_0 = arith.constant 0 : index
    %0 = vector.load %arg0[%c0, %c0_0] : memref<16x16xf32, #tpu.memory_space<vmem>>, vector<16x16xf32>
    %c0_1 = arith.constant 0 : index
    %c0_2 = arith.constant 0 : index
    %1 = vector.load %arg1[%c0_1, %c0_2] : memref<16x256xf32, #tpu.memory_space<vmem>>, vector<16x256xf32>
    %cst = arith.constant dense<0.000000e+00> : vector<16x256xf32>
    %2 = tpu.matmul %0, %1, %cst {dimension_numbers = #tpu.dot_dimension_numbers<[1], [0], [0], [1], [0, 0, 1, 1], [], []>} : vector<16x16xf32>, vector<16x256xf32>, vector<16x256xf32> -> vector<16x256xf32>
    %c0_3 = arith.constant 0 : index
    %c0_4 = arith.constant 0 : index
    %3 = vector.load %arg3[%c0_3, %c0_4] : memref<1x256xf32, #tpu.memory_space<vmem>>, vector<1x256xf32>
    %4 = vector.broadcast %3 : vector<1x256xf32> to vector<16x256xf32>
    %5 = arith.addf %2, %4 : vector<16x256xf32>
    %c0_5 = arith.constant 0 : index
    %c0_6 = arith.constant 0 : index
    %6 = vector.load %arg2[%c0_5, %c0_6] : memref<64x256xf32, #tpu.memory_space<vmem>>, vector<64x256xf32>
    %cst_7 = arith.constant 0.000000e+00 : f32
    %7 = vector.broadcast %cst_7 : f32 to vector<2x32xf32>
    %8 = tpu.concatenate %7, %7 in 1 : vector<2x32xf32>, vector<2x32xf32> -> vector<2x64xf32>
    %cst_8 = arith.constant dense<0.000000e+00> : vector<2x256xf32>
    %9 = tpu.matmul %8, %6, %cst_8 {dimension_numbers = #tpu.dot_dimension_numbers<[1], [0], [0], [1], [0, 0, 1, 1], [], []>} : vector<2x64xf32>, vector<64x256xf32>, vector<2x256xf32> -> vector<2x256xf32>
    %10 = vector.extract_strided_slice %9 {offsets = [0, 0], sizes = [2, 128], strides = [1, 1]} : vector<2x256xf32> to vector<2x128xf32>
    %11 = vector.extract_strided_slice %5 {offsets = [0, 0], sizes = [2, 128], strides = [1, 1]} : vector<16x256xf32> to vector<2x128xf32>
    %12 = arith.addf %10, %11 : vector<2x128xf32>
    %13 = vector.extract_strided_slice %9 {offsets = [0, 128], sizes = [2, 128], strides = [1, 1]} : vector<2x256xf32> to vector<2x128xf32>
    %14 = vector.extract_strided_slice %5 {offsets = [14, 128], sizes = [2, 128], strides = [1, 1]} : vector<16x256xf32> to vector<2x128xf32>
    %15 = arith.addf %13, %14 : vector<2x128xf32>
    %16 = vector.extract_strided_slice %12 {offsets = [0, 0], sizes = [2, 32], strides = [1, 1]} : vector<2x128xf32> to vector<2x32xf32>
    %17 = arith.negf %16 : vector<2x32xf32>
    %18 = math.exp %17 : vector<2x32xf32>
    %cst_9 = arith.constant 1.000000e+00 : f32
    %19 = vector.broadcast %cst_9 : f32 to vector<2x32xf32>
    %20 = arith.addf %19, %18 : vector<2x32xf32>
    %21 = arith.divf %19, %20 : vector<2x32xf32>
    %22 = vector.extract_strided_slice %12 {offsets = [0, 32], sizes = [2, 32], strides = [1, 1]} : vector<2x128xf32> to vector<2x32xf32>
    %23 = arith.negf %22 : vector<2x32xf32>
    %24 = math.exp %23 : vector<2x32xf32>
    %cst_10 = arith.constant 1.000000e+00 : f32
    %25 = vector.broadcast %cst_10 : f32 to vector<2x32xf32>
    %26 = arith.addf %25, %24 : vector<2x32xf32>
    %27 = arith.divf %25, %26 : vector<2x32xf32>
    %28 = vector.extract_strided_slice %12 {offsets = [0, 64], sizes = [2, 32], strides = [1, 1]} : vector<2x128xf32> to vector<2x32xf32>
    %29 = math.tanh %28 : vector<2x32xf32>
    %30 = vector.extract_strided_slice %12 {offsets = [0, 96], sizes = [2, 32], strides = [1, 1]} : vector<2x128xf32> to vector<2x32xf32>
    %31 = arith.negf %30 : vector<2x32xf32>
    %32 = math.exp %31 : vector<2x32xf32>
    %cst_11 = arith.constant 1.000000e+00 : f32
    %33 = vector.broadcast %cst_11 : f32 to vector<2x32xf32>
    %34 = arith.addf %33, %32 : vector<2x32xf32>
    %35 = arith.divf %33, %34 : vector<2x32xf32>
    %36 = arith.mulf %27, %7 : vector<2x32xf32>
    %37 = arith.mulf %21, %29 : vector<2x32xf32>
    %38 = arith.addf %36, %37 : vector<2x32xf32>
    %39 = math.tanh %38 : vector<2x32xf32>
    %40 = arith.mulf %35, %39 : vector<2x32xf32>
    %41 = vector.extract_strided_slice %15 {offsets = [0, 0], sizes = [2, 32], strides = [1, 1]} : vector<2x128xf32> to vector<2x32xf32>
    %42 = arith.negf %41 : vector<2x32xf32>
    %43 = math.exp %42 : vector<2x32xf32>
    %cst_12 = arith.constant 1.000000e+00 : f32
    %44 = vector.broadcast %cst_12 : f32 to vector<2x32xf32>
    %45 = arith.addf %44, %43 : vector<2x32xf32>
    %46 = arith.divf %44, %45 : vector<2x32xf32>
    %47 = vector.extract_strided_slice %15 {offsets = [0, 32], sizes = [2, 32], strides = [1, 1]} : vector<2x128xf32> to vector<2x32xf32>
    %48 = arith.negf %47 : vector<2x32xf32>
    %49 = math.exp %48 : vector<2x32xf32>
    %cst_13 = arith.constant 1.000000e+00 : f32
    %50 = vector.broadcast %cst_13 : f32 to vector<2x32xf32>
    %51 = arith.addf %50, %49 : vector<2x32xf32>
    %52 = arith.divf %50, %51 : vector<2x32xf32>
    %53 = vector.extract_strided_slice %15 {offsets = [0, 64], sizes = [2, 32], strides = [1, 1]} : vector<2x128xf32> to vector<2x32xf32>
    %54 = math.tanh %53 : vector<2x32xf32>
    %55 = vector.extract_strided_slice %15 {offsets = [0, 96], sizes = [2, 32], strides = [1, 1]} : vector<2x128xf32> to vector<2x32xf32>
    %56 = arith.negf %55 : vector<2x32xf32>
    %57 = math.exp %56 : vector<2x32xf32>
    %cst_14 = arith.constant 1.000000e+00 : f32
    %58 = vector.broadcast %cst_14 : f32 to vector<2x32xf32>
    %59 = arith.addf %58, %57 : vector<2x32xf32>
    %60 = arith.divf %58, %59 : vector<2x32xf32>
    %61 = arith.mulf %52, %7 : vector<2x32xf32>
    %62 = arith.mulf %46, %54 : vector<2x32xf32>
    %63 = arith.addf %61, %62 : vector<2x32xf32>
    %64 = math.tanh %63 : vector<2x32xf32>
    %65 = arith.mulf %60, %64 : vector<2x32xf32>
    %66 = tpu.concatenate %40, %65 in 1 : vector<2x32xf32>, vector<2x32xf32> -> vector<2x64xf32>
    %cst_15 = arith.constant dense<0.000000e+00> : vector<2x256xf32>
    %67 = tpu.matmul %66, %6, %cst_15 {dimension_numbers = #tpu.dot_dimension_numbers<[1], [0], [0], [1], [0, 0, 1, 1], [], []>} : vector<2x64xf32>, vector<64x256xf32>, vector<2x256xf32> -> vector<2x256xf32>
    %68 = vector.extract_strided_slice %67 {offsets = [0, 0], sizes = [2, 128], strides = [1, 1]} : vector<2x256xf32> to vector<2x128xf32>
    %69 = vector.extract_strided_slice %5 {offsets = [2, 0], sizes = [2, 128], strides = [1, 1]} : vector<16x256xf32> to vector<2x128xf32>
    %70 = arith.addf %68, %69 : vector<2x128xf32>
    %71 = vector.extract_strided_slice %67 {offsets = [0, 128], sizes = [2, 128], strides = [1, 1]} : vector<2x256xf32> to vector<2x128xf32>
    %72 = vector.extract_strided_slice %5 {offsets = [12, 128], sizes = [2, 128], strides = [1, 1]} : vector<16x256xf32> to vector<2x128xf32>
    %73 = arith.addf %71, %72 : vector<2x128xf32>
    %74 = vector.extract_strided_slice %70 {offsets = [0, 0], sizes = [2, 32], strides = [1, 1]} : vector<2x128xf32> to vector<2x32xf32>
    %75 = arith.negf %74 : vector<2x32xf32>
    %76 = math.exp %75 : vector<2x32xf32>
    %cst_16 = arith.constant 1.000000e+00 : f32
    %77 = vector.broadcast %cst_16 : f32 to vector<2x32xf32>
    %78 = arith.addf %77, %76 : vector<2x32xf32>
    %79 = arith.divf %77, %78 : vector<2x32xf32>
    %80 = vector.extract_strided_slice %70 {offsets = [0, 32], sizes = [2, 32], strides = [1, 1]} : vector<2x128xf32> to vector<2x32xf32>
    %81 = arith.negf %80 : vector<2x32xf32>
    %82 = math.exp %81 : vector<2x32xf32>
    %cst_17 = arith.constant 1.000000e+00 : f32
    %83 = vector.broadcast %cst_17 : f32 to vector<2x32xf32>
    %84 = arith.addf %83, %82 : vector<2x32xf32>
    %85 = arith.divf %83, %84 : vector<2x32xf32>
    %86 = vector.extract_strided_slice %70 {offsets = [0, 64], sizes = [2, 32], strides = [1, 1]} : vector<2x128xf32> to vector<2x32xf32>
    %87 = math.tanh %86 : vector<2x32xf32>
    %88 = vector.extract_strided_slice %70 {offsets = [0, 96], sizes = [2, 32], strides = [1, 1]} : vector<2x128xf32> to vector<2x32xf32>
    %89 = arith.negf %88 : vector<2x32xf32>
    %90 = math.exp %89 : vector<2x32xf32>
    %cst_18 = arith.constant 1.000000e+00 : f32
    %91 = vector.broadcast %cst_18 : f32 to vector<2x32xf32>
    %92 = arith.addf %91, %90 : vector<2x32xf32>
    %93 = arith.divf %91, %92 : vector<2x32xf32>
    %94 = arith.mulf %85, %38 : vector<2x32xf32>
    %95 = arith.mulf %79, %87 : vector<2x32xf32>
    %96 = arith.addf %94, %95 : vector<2x32xf32>
    %97 = math.tanh %96 : vector<2x32xf32>
    %98 = arith.mulf %93, %97 : vector<2x32xf32>
    %99 = vector.extract_strided_slice %73 {offsets = [0, 0], sizes = [2, 32], strides = [1, 1]} : vector<2x128xf32> to vector<2x32xf32>
    %100 = arith.negf %99 : vector<2x32xf32>
    %101 = math.exp %100 : vector<2x32xf32>
    %cst_19 = arith.constant 1.000000e+00 : f32
    %102 = vector.broadcast %cst_19 : f32 to vector<2x32xf32>
    %103 = arith.addf %102, %101 : vector<2x32xf32>
    %104 = arith.divf %102, %103 : vector<2x32xf32>
    %105 = vector.extract_strided_slice %73 {offsets = [0, 32], sizes = [2, 32], strides = [1, 1]} : vector<2x128xf32> to vector<2x32xf32>
    %106 = arith.negf %105 : vector<2x32xf32>
    %107 = math.exp %106 : vector<2x32xf32>
    %cst_20 = arith.constant 1.000000e+00 : f32
    %108 = vector.broadcast %cst_20 : f32 to vector<2x32xf32>
    %109 = arith.addf %108, %107 : vector<2x32xf32>
    %110 = arith.divf %108, %109 : vector<2x32xf32>
    %111 = vector.extract_strided_slice %73 {offsets = [0, 64], sizes = [2, 32], strides = [1, 1]} : vector<2x128xf32> to vector<2x32xf32>
    %112 = math.tanh %111 : vector<2x32xf32>
    %113 = vector.extract_strided_slice %73 {offsets = [0, 96], sizes = [2, 32], strides = [1, 1]} : vector<2x128xf32> to vector<2x32xf32>
    %114 = arith.negf %113 : vector<2x32xf32>
    %115 = math.exp %114 : vector<2x32xf32>
    %cst_21 = arith.constant 1.000000e+00 : f32
    %116 = vector.broadcast %cst_21 : f32 to vector<2x32xf32>
    %117 = arith.addf %116, %115 : vector<2x32xf32>
    %118 = arith.divf %116, %117 : vector<2x32xf32>
    %119 = arith.mulf %110, %63 : vector<2x32xf32>
    %120 = arith.mulf %104, %112 : vector<2x32xf32>
    %121 = arith.addf %119, %120 : vector<2x32xf32>
    %122 = math.tanh %121 : vector<2x32xf32>
    %123 = arith.mulf %118, %122 : vector<2x32xf32>
    %124 = tpu.concatenate %98, %123 in 1 : vector<2x32xf32>, vector<2x32xf32> -> vector<2x64xf32>
    %cst_22 = arith.constant dense<0.000000e+00> : vector<2x256xf32>
    %125 = tpu.matmul %124, %6, %cst_22 {dimension_numbers = #tpu.dot_dimension_numbers<[1], [0], [0], [1], [0, 0, 1, 1], [], []>} : vector<2x64xf32>, vector<64x256xf32>, vector<2x256xf32> -> vector<2x256xf32>
    %126 = vector.extract_strided_slice %125 {offsets = [0, 0], sizes = [2, 128], strides = [1, 1]} : vector<2x256xf32> to vector<2x128xf32>
    %127 = vector.extract_strided_slice %5 {offsets = [4, 0], sizes = [2, 128], strides = [1, 1]} : vector<16x256xf32> to vector<2x128xf32>
    %128 = arith.addf %126, %127 : vector<2x128xf32>
    %129 = vector.extract_strided_slice %125 {offsets = [0, 128], sizes = [2, 128], strides = [1, 1]} : vector<2x256xf32> to vector<2x128xf32>
    %130 = vector.extract_strided_slice %5 {offsets = [10, 128], sizes = [2, 128], strides = [1, 1]} : vector<16x256xf32> to vector<2x128xf32>
    %131 = arith.addf %129, %130 : vector<2x128xf32>
    %132 = vector.extract_strided_slice %128 {offsets = [0, 0], sizes = [2, 32], strides = [1, 1]} : vector<2x128xf32> to vector<2x32xf32>
    %133 = arith.negf %132 : vector<2x32xf32>
    %134 = math.exp %133 : vector<2x32xf32>
    %cst_23 = arith.constant 1.000000e+00 : f32
    %135 = vector.broadcast %cst_23 : f32 to vector<2x32xf32>
    %136 = arith.addf %135, %134 : vector<2x32xf32>
    %137 = arith.divf %135, %136 : vector<2x32xf32>
    %138 = vector.extract_strided_slice %128 {offsets = [0, 32], sizes = [2, 32], strides = [1, 1]} : vector<2x128xf32> to vector<2x32xf32>
    %139 = arith.negf %138 : vector<2x32xf32>
    %140 = math.exp %139 : vector<2x32xf32>
    %cst_24 = arith.constant 1.000000e+00 : f32
    %141 = vector.broadcast %cst_24 : f32 to vector<2x32xf32>
    %142 = arith.addf %141, %140 : vector<2x32xf32>
    %143 = arith.divf %141, %142 : vector<2x32xf32>
    %144 = vector.extract_strided_slice %128 {offsets = [0, 64], sizes = [2, 32], strides = [1, 1]} : vector<2x128xf32> to vector<2x32xf32>
    %145 = math.tanh %144 : vector<2x32xf32>
    %146 = vector.extract_strided_slice %128 {offsets = [0, 96], sizes = [2, 32], strides = [1, 1]} : vector<2x128xf32> to vector<2x32xf32>
    %147 = arith.negf %146 : vector<2x32xf32>
    %148 = math.exp %147 : vector<2x32xf32>
    %cst_25 = arith.constant 1.000000e+00 : f32
    %149 = vector.broadcast %cst_25 : f32 to vector<2x32xf32>
    %150 = arith.addf %149, %148 : vector<2x32xf32>
    %151 = arith.divf %149, %150 : vector<2x32xf32>
    %152 = arith.mulf %143, %96 : vector<2x32xf32>
    %153 = arith.mulf %137, %145 : vector<2x32xf32>
    %154 = arith.addf %152, %153 : vector<2x32xf32>
    %155 = math.tanh %154 : vector<2x32xf32>
    %156 = arith.mulf %151, %155 : vector<2x32xf32>
    %157 = vector.extract_strided_slice %131 {offsets = [0, 0], sizes = [2, 32], strides = [1, 1]} : vector<2x128xf32> to vector<2x32xf32>
    %158 = arith.negf %157 : vector<2x32xf32>
    %159 = math.exp %158 : vector<2x32xf32>
    %cst_26 = arith.constant 1.000000e+00 : f32
    %160 = vector.broadcast %cst_26 : f32 to vector<2x32xf32>
    %161 = arith.addf %160, %159 : vector<2x32xf32>
    %162 = arith.divf %160, %161 : vector<2x32xf32>
    %163 = vector.extract_strided_slice %131 {offsets = [0, 32], sizes = [2, 32], strides = [1, 1]} : vector<2x128xf32> to vector<2x32xf32>
    %164 = arith.negf %163 : vector<2x32xf32>
    %165 = math.exp %164 : vector<2x32xf32>
    %cst_27 = arith.constant 1.000000e+00 : f32
    %166 = vector.broadcast %cst_27 : f32 to vector<2x32xf32>
    %167 = arith.addf %166, %165 : vector<2x32xf32>
    %168 = arith.divf %166, %167 : vector<2x32xf32>
    %169 = vector.extract_strided_slice %131 {offsets = [0, 64], sizes = [2, 32], strides = [1, 1]} : vector<2x128xf32> to vector<2x32xf32>
    %170 = math.tanh %169 : vector<2x32xf32>
    %171 = vector.extract_strided_slice %131 {offsets = [0, 96], sizes = [2, 32], strides = [1, 1]} : vector<2x128xf32> to vector<2x32xf32>
    %172 = arith.negf %171 : vector<2x32xf32>
    %173 = math.exp %172 : vector<2x32xf32>
    %cst_28 = arith.constant 1.000000e+00 : f32
    %174 = vector.broadcast %cst_28 : f32 to vector<2x32xf32>
    %175 = arith.addf %174, %173 : vector<2x32xf32>
    %176 = arith.divf %174, %175 : vector<2x32xf32>
    %177 = arith.mulf %168, %121 : vector<2x32xf32>
    %178 = arith.mulf %162, %170 : vector<2x32xf32>
    %179 = arith.addf %177, %178 : vector<2x32xf32>
    %180 = math.tanh %179 : vector<2x32xf32>
    %181 = arith.mulf %176, %180 : vector<2x32xf32>
    %182 = tpu.concatenate %156, %181 in 1 : vector<2x32xf32>, vector<2x32xf32> -> vector<2x64xf32>
    %cst_29 = arith.constant dense<0.000000e+00> : vector<2x256xf32>
    %183 = tpu.matmul %182, %6, %cst_29 {dimension_numbers = #tpu.dot_dimension_numbers<[1], [0], [0], [1], [0, 0, 1, 1], [], []>} : vector<2x64xf32>, vector<64x256xf32>, vector<2x256xf32> -> vector<2x256xf32>
    %184 = vector.extract_strided_slice %183 {offsets = [0, 0], sizes = [2, 128], strides = [1, 1]} : vector<2x256xf32> to vector<2x128xf32>
    %185 = vector.extract_strided_slice %5 {offsets = [6, 0], sizes = [2, 128], strides = [1, 1]} : vector<16x256xf32> to vector<2x128xf32>
    %186 = arith.addf %184, %185 : vector<2x128xf32>
    %187 = vector.extract_strided_slice %183 {offsets = [0, 128], sizes = [2, 128], strides = [1, 1]} : vector<2x256xf32> to vector<2x128xf32>
    %188 = vector.extract_strided_slice %5 {offsets = [8, 128], sizes = [2, 128], strides = [1, 1]} : vector<16x256xf32> to vector<2x128xf32>
    %189 = arith.addf %187, %188 : vector<2x128xf32>
    %190 = vector.extract_strided_slice %186 {offsets = [0, 0], sizes = [2, 32], strides = [1, 1]} : vector<2x128xf32> to vector<2x32xf32>
    %191 = arith.negf %190 : vector<2x32xf32>
    %192 = math.exp %191 : vector<2x32xf32>
    %cst_30 = arith.constant 1.000000e+00 : f32
    %193 = vector.broadcast %cst_30 : f32 to vector<2x32xf32>
    %194 = arith.addf %193, %192 : vector<2x32xf32>
    %195 = arith.divf %193, %194 : vector<2x32xf32>
    %196 = vector.extract_strided_slice %186 {offsets = [0, 32], sizes = [2, 32], strides = [1, 1]} : vector<2x128xf32> to vector<2x32xf32>
    %197 = arith.negf %196 : vector<2x32xf32>
    %198 = math.exp %197 : vector<2x32xf32>
    %cst_31 = arith.constant 1.000000e+00 : f32
    %199 = vector.broadcast %cst_31 : f32 to vector<2x32xf32>
    %200 = arith.addf %199, %198 : vector<2x32xf32>
    %201 = arith.divf %199, %200 : vector<2x32xf32>
    %202 = vector.extract_strided_slice %186 {offsets = [0, 64], sizes = [2, 32], strides = [1, 1]} : vector<2x128xf32> to vector<2x32xf32>
    %203 = math.tanh %202 : vector<2x32xf32>
    %204 = vector.extract_strided_slice %186 {offsets = [0, 96], sizes = [2, 32], strides = [1, 1]} : vector<2x128xf32> to vector<2x32xf32>
    %205 = arith.negf %204 : vector<2x32xf32>
    %206 = math.exp %205 : vector<2x32xf32>
    %cst_32 = arith.constant 1.000000e+00 : f32
    %207 = vector.broadcast %cst_32 : f32 to vector<2x32xf32>
    %208 = arith.addf %207, %206 : vector<2x32xf32>
    %209 = arith.divf %207, %208 : vector<2x32xf32>
    %210 = arith.mulf %201, %154 : vector<2x32xf32>
    %211 = arith.mulf %195, %203 : vector<2x32xf32>
    %212 = arith.addf %210, %211 : vector<2x32xf32>
    %213 = math.tanh %212 : vector<2x32xf32>
    %214 = arith.mulf %209, %213 : vector<2x32xf32>
    %215 = vector.extract_strided_slice %189 {offsets = [0, 0], sizes = [2, 32], strides = [1, 1]} : vector<2x128xf32> to vector<2x32xf32>
    %216 = arith.negf %215 : vector<2x32xf32>
    %217 = math.exp %216 : vector<2x32xf32>
    %cst_33 = arith.constant 1.000000e+00 : f32
    %218 = vector.broadcast %cst_33 : f32 to vector<2x32xf32>
    %219 = arith.addf %218, %217 : vector<2x32xf32>
    %220 = arith.divf %218, %219 : vector<2x32xf32>
    %221 = vector.extract_strided_slice %189 {offsets = [0, 32], sizes = [2, 32], strides = [1, 1]} : vector<2x128xf32> to vector<2x32xf32>
    %222 = arith.negf %221 : vector<2x32xf32>
    %223 = math.exp %222 : vector<2x32xf32>
    %cst_34 = arith.constant 1.000000e+00 : f32
    %224 = vector.broadcast %cst_34 : f32 to vector<2x32xf32>
    %225 = arith.addf %224, %223 : vector<2x32xf32>
    %226 = arith.divf %224, %225 : vector<2x32xf32>
    %227 = vector.extract_strided_slice %189 {offsets = [0, 64], sizes = [2, 32], strides = [1, 1]} : vector<2x128xf32> to vector<2x32xf32>
    %228 = math.tanh %227 : vector<2x32xf32>
    %229 = vector.extract_strided_slice %189 {offsets = [0, 96], sizes = [2, 32], strides = [1, 1]} : vector<2x128xf32> to vector<2x32xf32>
    %230 = arith.negf %229 : vector<2x32xf32>
    %231 = math.exp %230 : vector<2x32xf32>
    %cst_35 = arith.constant 1.000000e+00 : f32
    %232 = vector.broadcast %cst_35 : f32 to vector<2x32xf32>
    %233 = arith.addf %232, %231 : vector<2x32xf32>
    %234 = arith.divf %232, %233 : vector<2x32xf32>
    %235 = arith.mulf %226, %179 : vector<2x32xf32>
    %236 = arith.mulf %220, %228 : vector<2x32xf32>
    %237 = arith.addf %235, %236 : vector<2x32xf32>
    %238 = math.tanh %237 : vector<2x32xf32>
    %239 = arith.mulf %234, %238 : vector<2x32xf32>
    %240 = tpu.concatenate %214, %239 in 1 : vector<2x32xf32>, vector<2x32xf32> -> vector<2x64xf32>
    %cst_36 = arith.constant dense<0.000000e+00> : vector<2x256xf32>
    %241 = tpu.matmul %240, %6, %cst_36 {dimension_numbers = #tpu.dot_dimension_numbers<[1], [0], [0], [1], [0, 0, 1, 1], [], []>} : vector<2x64xf32>, vector<64x256xf32>, vector<2x256xf32> -> vector<2x256xf32>
    %242 = vector.extract_strided_slice %241 {offsets = [0, 0], sizes = [2, 128], strides = [1, 1]} : vector<2x256xf32> to vector<2x128xf32>
    %243 = vector.extract_strided_slice %5 {offsets = [8, 0], sizes = [2, 128], strides = [1, 1]} : vector<16x256xf32> to vector<2x128xf32>
    %244 = arith.addf %242, %243 : vector<2x128xf32>
    %245 = vector.extract_strided_slice %241 {offsets = [0, 128], sizes = [2, 128], strides = [1, 1]} : vector<2x256xf32> to vector<2x128xf32>
    %246 = vector.extract_strided_slice %5 {offsets = [6, 128], sizes = [2, 128], strides = [1, 1]} : vector<16x256xf32> to vector<2x128xf32>
    %247 = arith.addf %245, %246 : vector<2x128xf32>
    %248 = vector.extract_strided_slice %244 {offsets = [0, 0], sizes = [2, 32], strides = [1, 1]} : vector<2x128xf32> to vector<2x32xf32>
    %249 = arith.negf %248 : vector<2x32xf32>
    %250 = math.exp %249 : vector<2x32xf32>
    %cst_37 = arith.constant 1.000000e+00 : f32
    %251 = vector.broadcast %cst_37 : f32 to vector<2x32xf32>
    %252 = arith.addf %251, %250 : vector<2x32xf32>
    %253 = arith.divf %251, %252 : vector<2x32xf32>
    %254 = vector.extract_strided_slice %244 {offsets = [0, 32], sizes = [2, 32], strides = [1, 1]} : vector<2x128xf32> to vector<2x32xf32>
    %255 = arith.negf %254 : vector<2x32xf32>
    %256 = math.exp %255 : vector<2x32xf32>
    %cst_38 = arith.constant 1.000000e+00 : f32
    %257 = vector.broadcast %cst_38 : f32 to vector<2x32xf32>
    %258 = arith.addf %257, %256 : vector<2x32xf32>
    %259 = arith.divf %257, %258 : vector<2x32xf32>
    %260 = vector.extract_strided_slice %244 {offsets = [0, 64], sizes = [2, 32], strides = [1, 1]} : vector<2x128xf32> to vector<2x32xf32>
    %261 = math.tanh %260 : vector<2x32xf32>
    %262 = vector.extract_strided_slice %244 {offsets = [0, 96], sizes = [2, 32], strides = [1, 1]} : vector<2x128xf32> to vector<2x32xf32>
    %263 = arith.negf %262 : vector<2x32xf32>
    %264 = math.exp %263 : vector<2x32xf32>
    %cst_39 = arith.constant 1.000000e+00 : f32
    %265 = vector.broadcast %cst_39 : f32 to vector<2x32xf32>
    %266 = arith.addf %265, %264 : vector<2x32xf32>
    %267 = arith.divf %265, %266 : vector<2x32xf32>
    %268 = arith.mulf %259, %212 : vector<2x32xf32>
    %269 = arith.mulf %253, %261 : vector<2x32xf32>
    %270 = arith.addf %268, %269 : vector<2x32xf32>
    %271 = math.tanh %270 : vector<2x32xf32>
    %272 = arith.mulf %267, %271 : vector<2x32xf32>
    %273 = vector.extract_strided_slice %247 {offsets = [0, 0], sizes = [2, 32], strides = [1, 1]} : vector<2x128xf32> to vector<2x32xf32>
    %274 = arith.negf %273 : vector<2x32xf32>
    %275 = math.exp %274 : vector<2x32xf32>
    %cst_40 = arith.constant 1.000000e+00 : f32
    %276 = vector.broadcast %cst_40 : f32 to vector<2x32xf32>
    %277 = arith.addf %276, %275 : vector<2x32xf32>
    %278 = arith.divf %276, %277 : vector<2x32xf32>
    %279 = vector.extract_strided_slice %247 {offsets = [0, 32], sizes = [2, 32], strides = [1, 1]} : vector<2x128xf32> to vector<2x32xf32>
    %280 = arith.negf %279 : vector<2x32xf32>
    %281 = math.exp %280 : vector<2x32xf32>
    %cst_41 = arith.constant 1.000000e+00 : f32
    %282 = vector.broadcast %cst_41 : f32 to vector<2x32xf32>
    %283 = arith.addf %282, %281 : vector<2x32xf32>
    %284 = arith.divf %282, %283 : vector<2x32xf32>
    %285 = vector.extract_strided_slice %247 {offsets = [0, 64], sizes = [2, 32], strides = [1, 1]} : vector<2x128xf32> to vector<2x32xf32>
    %286 = math.tanh %285 : vector<2x32xf32>
    %287 = vector.extract_strided_slice %247 {offsets = [0, 96], sizes = [2, 32], strides = [1, 1]} : vector<2x128xf32> to vector<2x32xf32>
    %288 = arith.negf %287 : vector<2x32xf32>
    %289 = math.exp %288 : vector<2x32xf32>
    %cst_42 = arith.constant 1.000000e+00 : f32
    %290 = vector.broadcast %cst_42 : f32 to vector<2x32xf32>
    %291 = arith.addf %290, %289 : vector<2x32xf32>
    %292 = arith.divf %290, %291 : vector<2x32xf32>
    %293 = arith.mulf %284, %237 : vector<2x32xf32>
    %294 = arith.mulf %278, %286 : vector<2x32xf32>
    %295 = arith.addf %293, %294 : vector<2x32xf32>
    %296 = math.tanh %295 : vector<2x32xf32>
    %297 = arith.mulf %292, %296 : vector<2x32xf32>
    %298 = tpu.concatenate %272, %297 in 1 : vector<2x32xf32>, vector<2x32xf32> -> vector<2x64xf32>
    %cst_43 = arith.constant dense<0.000000e+00> : vector<2x256xf32>
    %299 = tpu.matmul %298, %6, %cst_43 {dimension_numbers = #tpu.dot_dimension_numbers<[1], [0], [0], [1], [0, 0, 1, 1], [], []>} : vector<2x64xf32>, vector<64x256xf32>, vector<2x256xf32> -> vector<2x256xf32>
    %300 = vector.extract_strided_slice %299 {offsets = [0, 0], sizes = [2, 128], strides = [1, 1]} : vector<2x256xf32> to vector<2x128xf32>
    %301 = vector.extract_strided_slice %5 {offsets = [10, 0], sizes = [2, 128], strides = [1, 1]} : vector<16x256xf32> to vector<2x128xf32>
    %302 = arith.addf %300, %301 : vector<2x128xf32>
    %303 = vector.extract_strided_slice %299 {offsets = [0, 128], sizes = [2, 128], strides = [1, 1]} : vector<2x256xf32> to vector<2x128xf32>
    %304 = vector.extract_strided_slice %5 {offsets = [4, 128], sizes = [2, 128], strides = [1, 1]} : vector<16x256xf32> to vector<2x128xf32>
    %305 = arith.addf %303, %304 : vector<2x128xf32>
    %306 = vector.extract_strided_slice %302 {offsets = [0, 0], sizes = [2, 32], strides = [1, 1]} : vector<2x128xf32> to vector<2x32xf32>
    %307 = arith.negf %306 : vector<2x32xf32>
    %308 = math.exp %307 : vector<2x32xf32>
    %cst_44 = arith.constant 1.000000e+00 : f32
    %309 = vector.broadcast %cst_44 : f32 to vector<2x32xf32>
    %310 = arith.addf %309, %308 : vector<2x32xf32>
    %311 = arith.divf %309, %310 : vector<2x32xf32>
    %312 = vector.extract_strided_slice %302 {offsets = [0, 32], sizes = [2, 32], strides = [1, 1]} : vector<2x128xf32> to vector<2x32xf32>
    %313 = arith.negf %312 : vector<2x32xf32>
    %314 = math.exp %313 : vector<2x32xf32>
    %cst_45 = arith.constant 1.000000e+00 : f32
    %315 = vector.broadcast %cst_45 : f32 to vector<2x32xf32>
    %316 = arith.addf %315, %314 : vector<2x32xf32>
    %317 = arith.divf %315, %316 : vector<2x32xf32>
    %318 = vector.extract_strided_slice %302 {offsets = [0, 64], sizes = [2, 32], strides = [1, 1]} : vector<2x128xf32> to vector<2x32xf32>
    %319 = math.tanh %318 : vector<2x32xf32>
    %320 = vector.extract_strided_slice %302 {offsets = [0, 96], sizes = [2, 32], strides = [1, 1]} : vector<2x128xf32> to vector<2x32xf32>
    %321 = arith.negf %320 : vector<2x32xf32>
    %322 = math.exp %321 : vector<2x32xf32>
    %cst_46 = arith.constant 1.000000e+00 : f32
    %323 = vector.broadcast %cst_46 : f32 to vector<2x32xf32>
    %324 = arith.addf %323, %322 : vector<2x32xf32>
    %325 = arith.divf %323, %324 : vector<2x32xf32>
    %326 = arith.mulf %317, %270 : vector<2x32xf32>
    %327 = arith.mulf %311, %319 : vector<2x32xf32>
    %328 = arith.addf %326, %327 : vector<2x32xf32>
    %329 = math.tanh %328 : vector<2x32xf32>
    %330 = arith.mulf %325, %329 : vector<2x32xf32>
    %331 = vector.extract_strided_slice %305 {offsets = [0, 0], sizes = [2, 32], strides = [1, 1]} : vector<2x128xf32> to vector<2x32xf32>
    %332 = arith.negf %331 : vector<2x32xf32>
    %333 = math.exp %332 : vector<2x32xf32>
    %cst_47 = arith.constant 1.000000e+00 : f32
    %334 = vector.broadcast %cst_47 : f32 to vector<2x32xf32>
    %335 = arith.addf %334, %333 : vector<2x32xf32>
    %336 = arith.divf %334, %335 : vector<2x32xf32>
    %337 = vector.extract_strided_slice %305 {offsets = [0, 32], sizes = [2, 32], strides = [1, 1]} : vector<2x128xf32> to vector<2x32xf32>
    %338 = arith.negf %337 : vector<2x32xf32>
    %339 = math.exp %338 : vector<2x32xf32>
    %cst_48 = arith.constant 1.000000e+00 : f32
    %340 = vector.broadcast %cst_48 : f32 to vector<2x32xf32>
    %341 = arith.addf %340, %339 : vector<2x32xf32>
    %342 = arith.divf %340, %341 : vector<2x32xf32>
    %343 = vector.extract_strided_slice %305 {offsets = [0, 64], sizes = [2, 32], strides = [1, 1]} : vector<2x128xf32> to vector<2x32xf32>
    %344 = math.tanh %343 : vector<2x32xf32>
    %345 = vector.extract_strided_slice %305 {offsets = [0, 96], sizes = [2, 32], strides = [1, 1]} : vector<2x128xf32> to vector<2x32xf32>
    %346 = arith.negf %345 : vector<2x32xf32>
    %347 = math.exp %346 : vector<2x32xf32>
    %cst_49 = arith.constant 1.000000e+00 : f32
    %348 = vector.broadcast %cst_49 : f32 to vector<2x32xf32>
    %349 = arith.addf %348, %347 : vector<2x32xf32>
    %350 = arith.divf %348, %349 : vector<2x32xf32>
    %351 = arith.mulf %342, %295 : vector<2x32xf32>
    %352 = arith.mulf %336, %344 : vector<2x32xf32>
    %353 = arith.addf %351, %352 : vector<2x32xf32>
    %354 = math.tanh %353 : vector<2x32xf32>
    %355 = arith.mulf %350, %354 : vector<2x32xf32>
    %356 = tpu.concatenate %330, %355 in 1 : vector<2x32xf32>, vector<2x32xf32> -> vector<2x64xf32>
    %cst_50 = arith.constant dense<0.000000e+00> : vector<2x256xf32>
    %357 = tpu.matmul %356, %6, %cst_50 {dimension_numbers = #tpu.dot_dimension_numbers<[1], [0], [0], [1], [0, 0, 1, 1], [], []>} : vector<2x64xf32>, vector<64x256xf32>, vector<2x256xf32> -> vector<2x256xf32>
    %358 = vector.extract_strided_slice %357 {offsets = [0, 0], sizes = [2, 128], strides = [1, 1]} : vector<2x256xf32> to vector<2x128xf32>
    %359 = vector.extract_strided_slice %5 {offsets = [12, 0], sizes = [2, 128], strides = [1, 1]} : vector<16x256xf32> to vector<2x128xf32>
    %360 = arith.addf %358, %359 : vector<2x128xf32>
    %361 = vector.extract_strided_slice %357 {offsets = [0, 128], sizes = [2, 128], strides = [1, 1]} : vector<2x256xf32> to vector<2x128xf32>
    %362 = vector.extract_strided_slice %5 {offsets = [2, 128], sizes = [2, 128], strides = [1, 1]} : vector<16x256xf32> to vector<2x128xf32>
    %363 = arith.addf %361, %362 : vector<2x128xf32>
    %364 = vector.extract_strided_slice %360 {offsets = [0, 0], sizes = [2, 32], strides = [1, 1]} : vector<2x128xf32> to vector<2x32xf32>
    %365 = arith.negf %364 : vector<2x32xf32>
    %366 = math.exp %365 : vector<2x32xf32>
    %cst_51 = arith.constant 1.000000e+00 : f32
    %367 = vector.broadcast %cst_51 : f32 to vector<2x32xf32>
    %368 = arith.addf %367, %366 : vector<2x32xf32>
    %369 = arith.divf %367, %368 : vector<2x32xf32>
    %370 = vector.extract_strided_slice %360 {offsets = [0, 32], sizes = [2, 32], strides = [1, 1]} : vector<2x128xf32> to vector<2x32xf32>
    %371 = arith.negf %370 : vector<2x32xf32>
    %372 = math.exp %371 : vector<2x32xf32>
    %cst_52 = arith.constant 1.000000e+00 : f32
    %373 = vector.broadcast %cst_52 : f32 to vector<2x32xf32>
    %374 = arith.addf %373, %372 : vector<2x32xf32>
    %375 = arith.divf %373, %374 : vector<2x32xf32>
    %376 = vector.extract_strided_slice %360 {offsets = [0, 64], sizes = [2, 32], strides = [1, 1]} : vector<2x128xf32> to vector<2x32xf32>
    %377 = math.tanh %376 : vector<2x32xf32>
    %378 = vector.extract_strided_slice %360 {offsets = [0, 96], sizes = [2, 32], strides = [1, 1]} : vector<2x128xf32> to vector<2x32xf32>
    %379 = arith.negf %378 : vector<2x32xf32>
    %380 = math.exp %379 : vector<2x32xf32>
    %cst_53 = arith.constant 1.000000e+00 : f32
    %381 = vector.broadcast %cst_53 : f32 to vector<2x32xf32>
    %382 = arith.addf %381, %380 : vector<2x32xf32>
    %383 = arith.divf %381, %382 : vector<2x32xf32>
    %384 = arith.mulf %375, %328 : vector<2x32xf32>
    %385 = arith.mulf %369, %377 : vector<2x32xf32>
    %386 = arith.addf %384, %385 : vector<2x32xf32>
    %387 = math.tanh %386 : vector<2x32xf32>
    %388 = arith.mulf %383, %387 : vector<2x32xf32>
    %389 = vector.extract_strided_slice %363 {offsets = [0, 0], sizes = [2, 32], strides = [1, 1]} : vector<2x128xf32> to vector<2x32xf32>
    %390 = arith.negf %389 : vector<2x32xf32>
    %391 = math.exp %390 : vector<2x32xf32>
    %cst_54 = arith.constant 1.000000e+00 : f32
    %392 = vector.broadcast %cst_54 : f32 to vector<2x32xf32>
    %393 = arith.addf %392, %391 : vector<2x32xf32>
    %394 = arith.divf %392, %393 : vector<2x32xf32>
    %395 = vector.extract_strided_slice %363 {offsets = [0, 32], sizes = [2, 32], strides = [1, 1]} : vector<2x128xf32> to vector<2x32xf32>
    %396 = arith.negf %395 : vector<2x32xf32>
    %397 = math.exp %396 : vector<2x32xf32>
    %cst_55 = arith.constant 1.000000e+00 : f32
    %398 = vector.broadcast %cst_55 : f32 to vector<2x32xf32>
    %399 = arith.addf %398, %397 : vector<2x32xf32>
    %400 = arith.divf %398, %399 : vector<2x32xf32>
    %401 = vector.extract_strided_slice %363 {offsets = [0, 64], sizes = [2, 32], strides = [1, 1]} : vector<2x128xf32> to vector<2x32xf32>
    %402 = math.tanh %401 : vector<2x32xf32>
    %403 = vector.extract_strided_slice %363 {offsets = [0, 96], sizes = [2, 32], strides = [1, 1]} : vector<2x128xf32> to vector<2x32xf32>
    %404 = arith.negf %403 : vector<2x32xf32>
    %405 = math.exp %404 : vector<2x32xf32>
    %cst_56 = arith.constant 1.000000e+00 : f32
    %406 = vector.broadcast %cst_56 : f32 to vector<2x32xf32>
    %407 = arith.addf %406, %405 : vector<2x32xf32>
    %408 = arith.divf %406, %407 : vector<2x32xf32>
    %409 = arith.mulf %400, %353 : vector<2x32xf32>
    %410 = arith.mulf %394, %402 : vector<2x32xf32>
    %411 = arith.addf %409, %410 : vector<2x32xf32>
    %412 = math.tanh %411 : vector<2x32xf32>
    %413 = arith.mulf %408, %412 : vector<2x32xf32>
    %414 = tpu.concatenate %388, %413 in 1 : vector<2x32xf32>, vector<2x32xf32> -> vector<2x64xf32>
    %cst_57 = arith.constant dense<0.000000e+00> : vector<2x256xf32>
    %415 = tpu.matmul %414, %6, %cst_57 {dimension_numbers = #tpu.dot_dimension_numbers<[1], [0], [0], [1], [0, 0, 1, 1], [], []>} : vector<2x64xf32>, vector<64x256xf32>, vector<2x256xf32> -> vector<2x256xf32>
    %416 = vector.extract_strided_slice %415 {offsets = [0, 0], sizes = [2, 128], strides = [1, 1]} : vector<2x256xf32> to vector<2x128xf32>
    %417 = vector.extract_strided_slice %5 {offsets = [14, 0], sizes = [2, 128], strides = [1, 1]} : vector<16x256xf32> to vector<2x128xf32>
    %418 = arith.addf %416, %417 : vector<2x128xf32>
    %419 = vector.extract_strided_slice %415 {offsets = [0, 128], sizes = [2, 128], strides = [1, 1]} : vector<2x256xf32> to vector<2x128xf32>
    %420 = vector.extract_strided_slice %5 {offsets = [0, 128], sizes = [2, 128], strides = [1, 1]} : vector<16x256xf32> to vector<2x128xf32>
    %421 = arith.addf %419, %420 : vector<2x128xf32>
    %422 = vector.extract_strided_slice %418 {offsets = [0, 0], sizes = [2, 32], strides = [1, 1]} : vector<2x128xf32> to vector<2x32xf32>
    %423 = arith.negf %422 : vector<2x32xf32>
    %424 = math.exp %423 : vector<2x32xf32>
    %cst_58 = arith.constant 1.000000e+00 : f32
    %425 = vector.broadcast %cst_58 : f32 to vector<2x32xf32>
    %426 = arith.addf %425, %424 : vector<2x32xf32>
    %427 = arith.divf %425, %426 : vector<2x32xf32>
    %428 = vector.extract_strided_slice %418 {offsets = [0, 32], sizes = [2, 32], strides = [1, 1]} : vector<2x128xf32> to vector<2x32xf32>
    %429 = arith.negf %428 : vector<2x32xf32>
    %430 = math.exp %429 : vector<2x32xf32>
    %cst_59 = arith.constant 1.000000e+00 : f32
    %431 = vector.broadcast %cst_59 : f32 to vector<2x32xf32>
    %432 = arith.addf %431, %430 : vector<2x32xf32>
    %433 = arith.divf %431, %432 : vector<2x32xf32>
    %434 = vector.extract_strided_slice %418 {offsets = [0, 64], sizes = [2, 32], strides = [1, 1]} : vector<2x128xf32> to vector<2x32xf32>
    %435 = math.tanh %434 : vector<2x32xf32>
    %436 = vector.extract_strided_slice %418 {offsets = [0, 96], sizes = [2, 32], strides = [1, 1]} : vector<2x128xf32> to vector<2x32xf32>
    %437 = arith.negf %436 : vector<2x32xf32>
    %438 = math.exp %437 : vector<2x32xf32>
    %cst_60 = arith.constant 1.000000e+00 : f32
    %439 = vector.broadcast %cst_60 : f32 to vector<2x32xf32>
    %440 = arith.addf %439, %438 : vector<2x32xf32>
    %441 = arith.divf %439, %440 : vector<2x32xf32>
    %442 = arith.mulf %433, %386 : vector<2x32xf32>
    %443 = arith.mulf %427, %435 : vector<2x32xf32>
    %444 = arith.addf %442, %443 : vector<2x32xf32>
    %445 = math.tanh %444 : vector<2x32xf32>
    %446 = arith.mulf %441, %445 : vector<2x32xf32>
    %447 = vector.extract_strided_slice %421 {offsets = [0, 0], sizes = [2, 32], strides = [1, 1]} : vector<2x128xf32> to vector<2x32xf32>
    %448 = arith.negf %447 : vector<2x32xf32>
    %449 = math.exp %448 : vector<2x32xf32>
    %cst_61 = arith.constant 1.000000e+00 : f32
    %450 = vector.broadcast %cst_61 : f32 to vector<2x32xf32>
    %451 = arith.addf %450, %449 : vector<2x32xf32>
    %452 = arith.divf %450, %451 : vector<2x32xf32>
    %453 = vector.extract_strided_slice %421 {offsets = [0, 32], sizes = [2, 32], strides = [1, 1]} : vector<2x128xf32> to vector<2x32xf32>
    %454 = arith.negf %453 : vector<2x32xf32>
    %455 = math.exp %454 : vector<2x32xf32>
    %cst_62 = arith.constant 1.000000e+00 : f32
    %456 = vector.broadcast %cst_62 : f32 to vector<2x32xf32>
    %457 = arith.addf %456, %455 : vector<2x32xf32>
    %458 = arith.divf %456, %457 : vector<2x32xf32>
    %459 = vector.extract_strided_slice %421 {offsets = [0, 64], sizes = [2, 32], strides = [1, 1]} : vector<2x128xf32> to vector<2x32xf32>
    %460 = math.tanh %459 : vector<2x32xf32>
    %461 = vector.extract_strided_slice %421 {offsets = [0, 96], sizes = [2, 32], strides = [1, 1]} : vector<2x128xf32> to vector<2x32xf32>
    %462 = arith.negf %461 : vector<2x32xf32>
    %463 = math.exp %462 : vector<2x32xf32>
    %cst_63 = arith.constant 1.000000e+00 : f32
    %464 = vector.broadcast %cst_63 : f32 to vector<2x32xf32>
    %465 = arith.addf %464, %463 : vector<2x32xf32>
    %466 = arith.divf %464, %465 : vector<2x32xf32>
    %467 = arith.mulf %458, %411 : vector<2x32xf32>
    %468 = arith.mulf %452, %460 : vector<2x32xf32>
    %469 = arith.addf %467, %468 : vector<2x32xf32>
    %470 = math.tanh %469 : vector<2x32xf32>
    %471 = arith.mulf %466, %470 : vector<2x32xf32>
    %472 = tpu.concatenate %40, %471 in 1 : vector<2x32xf32>, vector<2x32xf32> -> vector<2x64xf32>
    %473 = tpu.concatenate %98, %413 in 1 : vector<2x32xf32>, vector<2x32xf32> -> vector<2x64xf32>
    %474 = tpu.concatenate %156, %355 in 1 : vector<2x32xf32>, vector<2x32xf32> -> vector<2x64xf32>
    %475 = tpu.concatenate %214, %297 in 1 : vector<2x32xf32>, vector<2x32xf32> -> vector<2x64xf32>
    %476 = tpu.concatenate %272, %239 in 1 : vector<2x32xf32>, vector<2x32xf32> -> vector<2x64xf32>
    %477 = tpu.concatenate %330, %181 in 1 : vector<2x32xf32>, vector<2x32xf32> -> vector<2x64xf32>
    %478 = tpu.concatenate %388, %123 in 1 : vector<2x32xf32>, vector<2x32xf32> -> vector<2x64xf32>
    %479 = tpu.concatenate %446, %65 in 1 : vector<2x32xf32>, vector<2x32xf32> -> vector<2x64xf32>
    %480 = tpu.concatenate %472, %473, %474, %475, %476, %477, %478, %479 in 0 : vector<2x64xf32>, vector<2x64xf32>, vector<2x64xf32>, vector<2x64xf32>, vector<2x64xf32>, vector<2x64xf32>, vector<2x64xf32>, vector<2x64xf32> -> vector<16x64xf32>
    %c0_64 = arith.constant 0 : index
    %c0_65 = arith.constant 0 : index
    %481 = vector.load %arg4[%c0_64, %c0_65] : memref<64x256xf32, #tpu.memory_space<vmem>>, vector<64x256xf32>
    %cst_66 = arith.constant dense<0.000000e+00> : vector<16x256xf32>
    %482 = tpu.matmul %480, %481, %cst_66 {dimension_numbers = #tpu.dot_dimension_numbers<[1], [0], [0], [1], [0, 0, 1, 1], [], []>} : vector<16x64xf32>, vector<64x256xf32>, vector<16x256xf32> -> vector<16x256xf32>
    %c0_67 = arith.constant 0 : index
    %c0_68 = arith.constant 0 : index
    %483 = vector.load %arg6[%c0_67, %c0_68] : memref<1x256xf32, #tpu.memory_space<vmem>>, vector<1x256xf32>
    %484 = vector.broadcast %483 : vector<1x256xf32> to vector<16x256xf32>
    %485 = arith.addf %482, %484 : vector<16x256xf32>
    %c0_69 = arith.constant 0 : index
    %c0_70 = arith.constant 0 : index
    %486 = vector.load %arg5[%c0_69, %c0_70] : memref<64x256xf32, #tpu.memory_space<vmem>>, vector<64x256xf32>
    %cst_71 = arith.constant 0.000000e+00 : f32
    %487 = vector.broadcast %cst_71 : f32 to vector<2x32xf32>
    %488 = tpu.concatenate %487, %487 in 1 : vector<2x32xf32>, vector<2x32xf32> -> vector<2x64xf32>
    %cst_72 = arith.constant dense<0.000000e+00> : vector<2x256xf32>
    %489 = tpu.matmul %488, %486, %cst_72 {dimension_numbers = #tpu.dot_dimension_numbers<[1], [0], [0], [1], [0, 0, 1, 1], [], []>} : vector<2x64xf32>, vector<64x256xf32>, vector<2x256xf32> -> vector<2x256xf32>
    %490 = vector.extract_strided_slice %489 {offsets = [0, 0], sizes = [2, 128], strides = [1, 1]} : vector<2x256xf32> to vector<2x128xf32>
    %491 = vector.extract_strided_slice %485 {offsets = [0, 0], sizes = [2, 128], strides = [1, 1]} : vector<16x256xf32> to vector<2x128xf32>
    %492 = arith.addf %490, %491 : vector<2x128xf32>
    %493 = vector.extract_strided_slice %489 {offsets = [0, 128], sizes = [2, 128], strides = [1, 1]} : vector<2x256xf32> to vector<2x128xf32>
    %494 = vector.extract_strided_slice %485 {offsets = [14, 128], sizes = [2, 128], strides = [1, 1]} : vector<16x256xf32> to vector<2x128xf32>
    %495 = arith.addf %493, %494 : vector<2x128xf32>
    %496 = vector.extract_strided_slice %492 {offsets = [0, 0], sizes = [2, 32], strides = [1, 1]} : vector<2x128xf32> to vector<2x32xf32>
    %497 = arith.negf %496 : vector<2x32xf32>
    %498 = math.exp %497 : vector<2x32xf32>
    %cst_73 = arith.constant 1.000000e+00 : f32
    %499 = vector.broadcast %cst_73 : f32 to vector<2x32xf32>
    %500 = arith.addf %499, %498 : vector<2x32xf32>
    %501 = arith.divf %499, %500 : vector<2x32xf32>
    %502 = vector.extract_strided_slice %492 {offsets = [0, 32], sizes = [2, 32], strides = [1, 1]} : vector<2x128xf32> to vector<2x32xf32>
    %503 = arith.negf %502 : vector<2x32xf32>
    %504 = math.exp %503 : vector<2x32xf32>
    %cst_74 = arith.constant 1.000000e+00 : f32
    %505 = vector.broadcast %cst_74 : f32 to vector<2x32xf32>
    %506 = arith.addf %505, %504 : vector<2x32xf32>
    %507 = arith.divf %505, %506 : vector<2x32xf32>
    %508 = vector.extract_strided_slice %492 {offsets = [0, 64], sizes = [2, 32], strides = [1, 1]} : vector<2x128xf32> to vector<2x32xf32>
    %509 = math.tanh %508 : vector<2x32xf32>
    %510 = vector.extract_strided_slice %492 {offsets = [0, 96], sizes = [2, 32], strides = [1, 1]} : vector<2x128xf32> to vector<2x32xf32>
    %511 = arith.negf %510 : vector<2x32xf32>
    %512 = math.exp %511 : vector<2x32xf32>
    %cst_75 = arith.constant 1.000000e+00 : f32
    %513 = vector.broadcast %cst_75 : f32 to vector<2x32xf32>
    %514 = arith.addf %513, %512 : vector<2x32xf32>
    %515 = arith.divf %513, %514 : vector<2x32xf32>
    %516 = arith.mulf %507, %487 : vector<2x32xf32>
    %517 = arith.mulf %501, %509 : vector<2x32xf32>
    %518 = arith.addf %516, %517 : vector<2x32xf32>
    %519 = math.tanh %518 : vector<2x32xf32>
    %520 = arith.mulf %515, %519 : vector<2x32xf32>
    %521 = vector.extract_strided_slice %495 {offsets = [0, 0], sizes = [2, 32], strides = [1, 1]} : vector<2x128xf32> to vector<2x32xf32>
    %522 = arith.negf %521 : vector<2x32xf32>
    %523 = math.exp %522 : vector<2x32xf32>
    %cst_76 = arith.constant 1.000000e+00 : f32
    %524 = vector.broadcast %cst_76 : f32 to vector<2x32xf32>
    %525 = arith.addf %524, %523 : vector<2x32xf32>
    %526 = arith.divf %524, %525 : vector<2x32xf32>
    %527 = vector.extract_strided_slice %495 {offsets = [0, 32], sizes = [2, 32], strides = [1, 1]} : vector<2x128xf32> to vector<2x32xf32>
    %528 = arith.negf %527 : vector<2x32xf32>
    %529 = math.exp %528 : vector<2x32xf32>
    %cst_77 = arith.constant 1.000000e+00 : f32
    %530 = vector.broadcast %cst_77 : f32 to vector<2x32xf32>
    %531 = arith.addf %530, %529 : vector<2x32xf32>
    %532 = arith.divf %530, %531 : vector<2x32xf32>
    %533 = vector.extract_strided_slice %495 {offsets = [0, 64], sizes = [2, 32], strides = [1, 1]} : vector<2x128xf32> to vector<2x32xf32>
    %534 = math.tanh %533 : vector<2x32xf32>
    %535 = vector.extract_strided_slice %495 {offsets = [0, 96], sizes = [2, 32], strides = [1, 1]} : vector<2x128xf32> to vector<2x32xf32>
    %536 = arith.negf %535 : vector<2x32xf32>
    %537 = math.exp %536 : vector<2x32xf32>
    %cst_78 = arith.constant 1.000000e+00 : f32
    %538 = vector.broadcast %cst_78 : f32 to vector<2x32xf32>
    %539 = arith.addf %538, %537 : vector<2x32xf32>
    %540 = arith.divf %538, %539 : vector<2x32xf32>
    %541 = arith.mulf %532, %487 : vector<2x32xf32>
    %542 = arith.mulf %526, %534 : vector<2x32xf32>
    %543 = arith.addf %541, %542 : vector<2x32xf32>
    %544 = math.tanh %543 : vector<2x32xf32>
    %545 = arith.mulf %540, %544 : vector<2x32xf32>
    %546 = tpu.concatenate %520, %545 in 1 : vector<2x32xf32>, vector<2x32xf32> -> vector<2x64xf32>
    %cst_79 = arith.constant dense<0.000000e+00> : vector<2x256xf32>
    %547 = tpu.matmul %546, %486, %cst_79 {dimension_numbers = #tpu.dot_dimension_numbers<[1], [0], [0], [1], [0, 0, 1, 1], [], []>} : vector<2x64xf32>, vector<64x256xf32>, vector<2x256xf32> -> vector<2x256xf32>
    %548 = vector.extract_strided_slice %547 {offsets = [0, 0], sizes = [2, 128], strides = [1, 1]} : vector<2x256xf32> to vector<2x128xf32>
    %549 = vector.extract_strided_slice %485 {offsets = [2, 0], sizes = [2, 128], strides = [1, 1]} : vector<16x256xf32> to vector<2x128xf32>
    %550 = arith.addf %548, %549 : vector<2x128xf32>
    %551 = vector.extract_strided_slice %547 {offsets = [0, 128], sizes = [2, 128], strides = [1, 1]} : vector<2x256xf32> to vector<2x128xf32>
    %552 = vector.extract_strided_slice %485 {offsets = [12, 128], sizes = [2, 128], strides = [1, 1]} : vector<16x256xf32> to vector<2x128xf32>
    %553 = arith.addf %551, %552 : vector<2x128xf32>
    %554 = vector.extract_strided_slice %550 {offsets = [0, 0], sizes = [2, 32], strides = [1, 1]} : vector<2x128xf32> to vector<2x32xf32>
    %555 = arith.negf %554 : vector<2x32xf32>
    %556 = math.exp %555 : vector<2x32xf32>
    %cst_80 = arith.constant 1.000000e+00 : f32
    %557 = vector.broadcast %cst_80 : f32 to vector<2x32xf32>
    %558 = arith.addf %557, %556 : vector<2x32xf32>
    %559 = arith.divf %557, %558 : vector<2x32xf32>
    %560 = vector.extract_strided_slice %550 {offsets = [0, 32], sizes = [2, 32], strides = [1, 1]} : vector<2x128xf32> to vector<2x32xf32>
    %561 = arith.negf %560 : vector<2x32xf32>
    %562 = math.exp %561 : vector<2x32xf32>
    %cst_81 = arith.constant 1.000000e+00 : f32
    %563 = vector.broadcast %cst_81 : f32 to vector<2x32xf32>
    %564 = arith.addf %563, %562 : vector<2x32xf32>
    %565 = arith.divf %563, %564 : vector<2x32xf32>
    %566 = vector.extract_strided_slice %550 {offsets = [0, 64], sizes = [2, 32], strides = [1, 1]} : vector<2x128xf32> to vector<2x32xf32>
    %567 = math.tanh %566 : vector<2x32xf32>
    %568 = vector.extract_strided_slice %550 {offsets = [0, 96], sizes = [2, 32], strides = [1, 1]} : vector<2x128xf32> to vector<2x32xf32>
    %569 = arith.negf %568 : vector<2x32xf32>
    %570 = math.exp %569 : vector<2x32xf32>
    %cst_82 = arith.constant 1.000000e+00 : f32
    %571 = vector.broadcast %cst_82 : f32 to vector<2x32xf32>
    %572 = arith.addf %571, %570 : vector<2x32xf32>
    %573 = arith.divf %571, %572 : vector<2x32xf32>
    %574 = arith.mulf %565, %518 : vector<2x32xf32>
    %575 = arith.mulf %559, %567 : vector<2x32xf32>
    %576 = arith.addf %574, %575 : vector<2x32xf32>
    %577 = math.tanh %576 : vector<2x32xf32>
    %578 = arith.mulf %573, %577 : vector<2x32xf32>
    %579 = vector.extract_strided_slice %553 {offsets = [0, 0], sizes = [2, 32], strides = [1, 1]} : vector<2x128xf32> to vector<2x32xf32>
    %580 = arith.negf %579 : vector<2x32xf32>
    %581 = math.exp %580 : vector<2x32xf32>
    %cst_83 = arith.constant 1.000000e+00 : f32
    %582 = vector.broadcast %cst_83 : f32 to vector<2x32xf32>
    %583 = arith.addf %582, %581 : vector<2x32xf32>
    %584 = arith.divf %582, %583 : vector<2x32xf32>
    %585 = vector.extract_strided_slice %553 {offsets = [0, 32], sizes = [2, 32], strides = [1, 1]} : vector<2x128xf32> to vector<2x32xf32>
    %586 = arith.negf %585 : vector<2x32xf32>
    %587 = math.exp %586 : vector<2x32xf32>
    %cst_84 = arith.constant 1.000000e+00 : f32
    %588 = vector.broadcast %cst_84 : f32 to vector<2x32xf32>
    %589 = arith.addf %588, %587 : vector<2x32xf32>
    %590 = arith.divf %588, %589 : vector<2x32xf32>
    %591 = vector.extract_strided_slice %553 {offsets = [0, 64], sizes = [2, 32], strides = [1, 1]} : vector<2x128xf32> to vector<2x32xf32>
    %592 = math.tanh %591 : vector<2x32xf32>
    %593 = vector.extract_strided_slice %553 {offsets = [0, 96], sizes = [2, 32], strides = [1, 1]} : vector<2x128xf32> to vector<2x32xf32>
    %594 = arith.negf %593 : vector<2x32xf32>
    %595 = math.exp %594 : vector<2x32xf32>
    %cst_85 = arith.constant 1.000000e+00 : f32
    %596 = vector.broadcast %cst_85 : f32 to vector<2x32xf32>
    %597 = arith.addf %596, %595 : vector<2x32xf32>
    %598 = arith.divf %596, %597 : vector<2x32xf32>
    %599 = arith.mulf %590, %543 : vector<2x32xf32>
    %600 = arith.mulf %584, %592 : vector<2x32xf32>
    %601 = arith.addf %599, %600 : vector<2x32xf32>
    %602 = math.tanh %601 : vector<2x32xf32>
    %603 = arith.mulf %598, %602 : vector<2x32xf32>
    %604 = tpu.concatenate %578, %603 in 1 : vector<2x32xf32>, vector<2x32xf32> -> vector<2x64xf32>
    %cst_86 = arith.constant dense<0.000000e+00> : vector<2x256xf32>
    %605 = tpu.matmul %604, %486, %cst_86 {dimension_numbers = #tpu.dot_dimension_numbers<[1], [0], [0], [1], [0, 0, 1, 1], [], []>} : vector<2x64xf32>, vector<64x256xf32>, vector<2x256xf32> -> vector<2x256xf32>
    %606 = vector.extract_strided_slice %605 {offsets = [0, 0], sizes = [2, 128], strides = [1, 1]} : vector<2x256xf32> to vector<2x128xf32>
    %607 = vector.extract_strided_slice %485 {offsets = [4, 0], sizes = [2, 128], strides = [1, 1]} : vector<16x256xf32> to vector<2x128xf32>
    %608 = arith.addf %606, %607 : vector<2x128xf32>
    %609 = vector.extract_strided_slice %605 {offsets = [0, 128], sizes = [2, 128], strides = [1, 1]} : vector<2x256xf32> to vector<2x128xf32>
    %610 = vector.extract_strided_slice %485 {offsets = [10, 128], sizes = [2, 128], strides = [1, 1]} : vector<16x256xf32> to vector<2x128xf32>
    %611 = arith.addf %609, %610 : vector<2x128xf32>
    %612 = vector.extract_strided_slice %608 {offsets = [0, 0], sizes = [2, 32], strides = [1, 1]} : vector<2x128xf32> to vector<2x32xf32>
    %613 = arith.negf %612 : vector<2x32xf32>
    %614 = math.exp %613 : vector<2x32xf32>
    %cst_87 = arith.constant 1.000000e+00 : f32
    %615 = vector.broadcast %cst_87 : f32 to vector<2x32xf32>
    %616 = arith.addf %615, %614 : vector<2x32xf32>
    %617 = arith.divf %615, %616 : vector<2x32xf32>
    %618 = vector.extract_strided_slice %608 {offsets = [0, 32], sizes = [2, 32], strides = [1, 1]} : vector<2x128xf32> to vector<2x32xf32>
    %619 = arith.negf %618 : vector<2x32xf32>
    %620 = math.exp %619 : vector<2x32xf32>
    %cst_88 = arith.constant 1.000000e+00 : f32
    %621 = vector.broadcast %cst_88 : f32 to vector<2x32xf32>
    %622 = arith.addf %621, %620 : vector<2x32xf32>
    %623 = arith.divf %621, %622 : vector<2x32xf32>
    %624 = vector.extract_strided_slice %608 {offsets = [0, 64], sizes = [2, 32], strides = [1, 1]} : vector<2x128xf32> to vector<2x32xf32>
    %625 = math.tanh %624 : vector<2x32xf32>
    %626 = vector.extract_strided_slice %608 {offsets = [0, 96], sizes = [2, 32], strides = [1, 1]} : vector<2x128xf32> to vector<2x32xf32>
    %627 = arith.negf %626 : vector<2x32xf32>
    %628 = math.exp %627 : vector<2x32xf32>
    %cst_89 = arith.constant 1.000000e+00 : f32
    %629 = vector.broadcast %cst_89 : f32 to vector<2x32xf32>
    %630 = arith.addf %629, %628 : vector<2x32xf32>
    %631 = arith.divf %629, %630 : vector<2x32xf32>
    %632 = arith.mulf %623, %576 : vector<2x32xf32>
    %633 = arith.mulf %617, %625 : vector<2x32xf32>
    %634 = arith.addf %632, %633 : vector<2x32xf32>
    %635 = math.tanh %634 : vector<2x32xf32>
    %636 = arith.mulf %631, %635 : vector<2x32xf32>
    %637 = vector.extract_strided_slice %611 {offsets = [0, 0], sizes = [2, 32], strides = [1, 1]} : vector<2x128xf32> to vector<2x32xf32>
    %638 = arith.negf %637 : vector<2x32xf32>
    %639 = math.exp %638 : vector<2x32xf32>
    %cst_90 = arith.constant 1.000000e+00 : f32
    %640 = vector.broadcast %cst_90 : f32 to vector<2x32xf32>
    %641 = arith.addf %640, %639 : vector<2x32xf32>
    %642 = arith.divf %640, %641 : vector<2x32xf32>
    %643 = vector.extract_strided_slice %611 {offsets = [0, 32], sizes = [2, 32], strides = [1, 1]} : vector<2x128xf32> to vector<2x32xf32>
    %644 = arith.negf %643 : vector<2x32xf32>
    %645 = math.exp %644 : vector<2x32xf32>
    %cst_91 = arith.constant 1.000000e+00 : f32
    %646 = vector.broadcast %cst_91 : f32 to vector<2x32xf32>
    %647 = arith.addf %646, %645 : vector<2x32xf32>
    %648 = arith.divf %646, %647 : vector<2x32xf32>
    %649 = vector.extract_strided_slice %611 {offsets = [0, 64], sizes = [2, 32], strides = [1, 1]} : vector<2x128xf32> to vector<2x32xf32>
    %650 = math.tanh %649 : vector<2x32xf32>
    %651 = vector.extract_strided_slice %611 {offsets = [0, 96], sizes = [2, 32], strides = [1, 1]} : vector<2x128xf32> to vector<2x32xf32>
    %652 = arith.negf %651 : vector<2x32xf32>
    %653 = math.exp %652 : vector<2x32xf32>
    %cst_92 = arith.constant 1.000000e+00 : f32
    %654 = vector.broadcast %cst_92 : f32 to vector<2x32xf32>
    %655 = arith.addf %654, %653 : vector<2x32xf32>
    %656 = arith.divf %654, %655 : vector<2x32xf32>
    %657 = arith.mulf %648, %601 : vector<2x32xf32>
    %658 = arith.mulf %642, %650 : vector<2x32xf32>
    %659 = arith.addf %657, %658 : vector<2x32xf32>
    %660 = math.tanh %659 : vector<2x32xf32>
    %661 = arith.mulf %656, %660 : vector<2x32xf32>
    %662 = tpu.concatenate %636, %661 in 1 : vector<2x32xf32>, vector<2x32xf32> -> vector<2x64xf32>
    %cst_93 = arith.constant dense<0.000000e+00> : vector<2x256xf32>
    %663 = tpu.matmul %662, %486, %cst_93 {dimension_numbers = #tpu.dot_dimension_numbers<[1], [0], [0], [1], [0, 0, 1, 1], [], []>} : vector<2x64xf32>, vector<64x256xf32>, vector<2x256xf32> -> vector<2x256xf32>
    %664 = vector.extract_strided_slice %663 {offsets = [0, 0], sizes = [2, 128], strides = [1, 1]} : vector<2x256xf32> to vector<2x128xf32>
    %665 = vector.extract_strided_slice %485 {offsets = [6, 0], sizes = [2, 128], strides = [1, 1]} : vector<16x256xf32> to vector<2x128xf32>
    %666 = arith.addf %664, %665 : vector<2x128xf32>
    %667 = vector.extract_strided_slice %663 {offsets = [0, 128], sizes = [2, 128], strides = [1, 1]} : vector<2x256xf32> to vector<2x128xf32>
    %668 = vector.extract_strided_slice %485 {offsets = [8, 128], sizes = [2, 128], strides = [1, 1]} : vector<16x256xf32> to vector<2x128xf32>
    %669 = arith.addf %667, %668 : vector<2x128xf32>
    %670 = vector.extract_strided_slice %666 {offsets = [0, 0], sizes = [2, 32], strides = [1, 1]} : vector<2x128xf32> to vector<2x32xf32>
    %671 = arith.negf %670 : vector<2x32xf32>
    %672 = math.exp %671 : vector<2x32xf32>
    %cst_94 = arith.constant 1.000000e+00 : f32
    %673 = vector.broadcast %cst_94 : f32 to vector<2x32xf32>
    %674 = arith.addf %673, %672 : vector<2x32xf32>
    %675 = arith.divf %673, %674 : vector<2x32xf32>
    %676 = vector.extract_strided_slice %666 {offsets = [0, 32], sizes = [2, 32], strides = [1, 1]} : vector<2x128xf32> to vector<2x32xf32>
    %677 = arith.negf %676 : vector<2x32xf32>
    %678 = math.exp %677 : vector<2x32xf32>
    %cst_95 = arith.constant 1.000000e+00 : f32
    %679 = vector.broadcast %cst_95 : f32 to vector<2x32xf32>
    %680 = arith.addf %679, %678 : vector<2x32xf32>
    %681 = arith.divf %679, %680 : vector<2x32xf32>
    %682 = vector.extract_strided_slice %666 {offsets = [0, 64], sizes = [2, 32], strides = [1, 1]} : vector<2x128xf32> to vector<2x32xf32>
    %683 = math.tanh %682 : vector<2x32xf32>
    %684 = vector.extract_strided_slice %666 {offsets = [0, 96], sizes = [2, 32], strides = [1, 1]} : vector<2x128xf32> to vector<2x32xf32>
    %685 = arith.negf %684 : vector<2x32xf32>
    %686 = math.exp %685 : vector<2x32xf32>
    %cst_96 = arith.constant 1.000000e+00 : f32
    %687 = vector.broadcast %cst_96 : f32 to vector<2x32xf32>
    %688 = arith.addf %687, %686 : vector<2x32xf32>
    %689 = arith.divf %687, %688 : vector<2x32xf32>
    %690 = arith.mulf %681, %634 : vector<2x32xf32>
    %691 = arith.mulf %675, %683 : vector<2x32xf32>
    %692 = arith.addf %690, %691 : vector<2x32xf32>
    %693 = math.tanh %692 : vector<2x32xf32>
    %694 = arith.mulf %689, %693 : vector<2x32xf32>
    %695 = vector.extract_strided_slice %669 {offsets = [0, 0], sizes = [2, 32], strides = [1, 1]} : vector<2x128xf32> to vector<2x32xf32>
    %696 = arith.negf %695 : vector<2x32xf32>
    %697 = math.exp %696 : vector<2x32xf32>
    %cst_97 = arith.constant 1.000000e+00 : f32
    %698 = vector.broadcast %cst_97 : f32 to vector<2x32xf32>
    %699 = arith.addf %698, %697 : vector<2x32xf32>
    %700 = arith.divf %698, %699 : vector<2x32xf32>
    %701 = vector.extract_strided_slice %669 {offsets = [0, 32], sizes = [2, 32], strides = [1, 1]} : vector<2x128xf32> to vector<2x32xf32>
    %702 = arith.negf %701 : vector<2x32xf32>
    %703 = math.exp %702 : vector<2x32xf32>
    %cst_98 = arith.constant 1.000000e+00 : f32
    %704 = vector.broadcast %cst_98 : f32 to vector<2x32xf32>
    %705 = arith.addf %704, %703 : vector<2x32xf32>
    %706 = arith.divf %704, %705 : vector<2x32xf32>
    %707 = vector.extract_strided_slice %669 {offsets = [0, 64], sizes = [2, 32], strides = [1, 1]} : vector<2x128xf32> to vector<2x32xf32>
    %708 = math.tanh %707 : vector<2x32xf32>
    %709 = vector.extract_strided_slice %669 {offsets = [0, 96], sizes = [2, 32], strides = [1, 1]} : vector<2x128xf32> to vector<2x32xf32>
    %710 = arith.negf %709 : vector<2x32xf32>
    %711 = math.exp %710 : vector<2x32xf32>
    %cst_99 = arith.constant 1.000000e+00 : f32
    %712 = vector.broadcast %cst_99 : f32 to vector<2x32xf32>
    %713 = arith.addf %712, %711 : vector<2x32xf32>
    %714 = arith.divf %712, %713 : vector<2x32xf32>
    %715 = arith.mulf %706, %659 : vector<2x32xf32>
    %716 = arith.mulf %700, %708 : vector<2x32xf32>
    %717 = arith.addf %715, %716 : vector<2x32xf32>
    %718 = math.tanh %717 : vector<2x32xf32>
    %719 = arith.mulf %714, %718 : vector<2x32xf32>
    %720 = tpu.concatenate %694, %719 in 1 : vector<2x32xf32>, vector<2x32xf32> -> vector<2x64xf32>
    %cst_100 = arith.constant dense<0.000000e+00> : vector<2x256xf32>
    %721 = tpu.matmul %720, %486, %cst_100 {dimension_numbers = #tpu.dot_dimension_numbers<[1], [0], [0], [1], [0, 0, 1, 1], [], []>} : vector<2x64xf32>, vector<64x256xf32>, vector<2x256xf32> -> vector<2x256xf32>
    %722 = vector.extract_strided_slice %721 {offsets = [0, 0], sizes = [2, 128], strides = [1, 1]} : vector<2x256xf32> to vector<2x128xf32>
    %723 = vector.extract_strided_slice %485 {offsets = [8, 0], sizes = [2, 128], strides = [1, 1]} : vector<16x256xf32> to vector<2x128xf32>
    %724 = arith.addf %722, %723 : vector<2x128xf32>
    %725 = vector.extract_strided_slice %721 {offsets = [0, 128], sizes = [2, 128], strides = [1, 1]} : vector<2x256xf32> to vector<2x128xf32>
    %726 = vector.extract_strided_slice %485 {offsets = [6, 128], sizes = [2, 128], strides = [1, 1]} : vector<16x256xf32> to vector<2x128xf32>
    %727 = arith.addf %725, %726 : vector<2x128xf32>
    %728 = vector.extract_strided_slice %724 {offsets = [0, 0], sizes = [2, 32], strides = [1, 1]} : vector<2x128xf32> to vector<2x32xf32>
    %729 = arith.negf %728 : vector<2x32xf32>
    %730 = math.exp %729 : vector<2x32xf32>
    %cst_101 = arith.constant 1.000000e+00 : f32
    %731 = vector.broadcast %cst_101 : f32 to vector<2x32xf32>
    %732 = arith.addf %731, %730 : vector<2x32xf32>
    %733 = arith.divf %731, %732 : vector<2x32xf32>
    %734 = vector.extract_strided_slice %724 {offsets = [0, 32], sizes = [2, 32], strides = [1, 1]} : vector<2x128xf32> to vector<2x32xf32>
    %735 = arith.negf %734 : vector<2x32xf32>
    %736 = math.exp %735 : vector<2x32xf32>
    %cst_102 = arith.constant 1.000000e+00 : f32
    %737 = vector.broadcast %cst_102 : f32 to vector<2x32xf32>
    %738 = arith.addf %737, %736 : vector<2x32xf32>
    %739 = arith.divf %737, %738 : vector<2x32xf32>
    %740 = vector.extract_strided_slice %724 {offsets = [0, 64], sizes = [2, 32], strides = [1, 1]} : vector<2x128xf32> to vector<2x32xf32>
    %741 = math.tanh %740 : vector<2x32xf32>
    %742 = vector.extract_strided_slice %724 {offsets = [0, 96], sizes = [2, 32], strides = [1, 1]} : vector<2x128xf32> to vector<2x32xf32>
    %743 = arith.negf %742 : vector<2x32xf32>
    %744 = math.exp %743 : vector<2x32xf32>
    %cst_103 = arith.constant 1.000000e+00 : f32
    %745 = vector.broadcast %cst_103 : f32 to vector<2x32xf32>
    %746 = arith.addf %745, %744 : vector<2x32xf32>
    %747 = arith.divf %745, %746 : vector<2x32xf32>
    %748 = arith.mulf %739, %692 : vector<2x32xf32>
    %749 = arith.mulf %733, %741 : vector<2x32xf32>
    %750 = arith.addf %748, %749 : vector<2x32xf32>
    %751 = math.tanh %750 : vector<2x32xf32>
    %752 = arith.mulf %747, %751 : vector<2x32xf32>
    %753 = vector.extract_strided_slice %727 {offsets = [0, 0], sizes = [2, 32], strides = [1, 1]} : vector<2x128xf32> to vector<2x32xf32>
    %754 = arith.negf %753 : vector<2x32xf32>
    %755 = math.exp %754 : vector<2x32xf32>
    %cst_104 = arith.constant 1.000000e+00 : f32
    %756 = vector.broadcast %cst_104 : f32 to vector<2x32xf32>
    %757 = arith.addf %756, %755 : vector<2x32xf32>
    %758 = arith.divf %756, %757 : vector<2x32xf32>
    %759 = vector.extract_strided_slice %727 {offsets = [0, 32], sizes = [2, 32], strides = [1, 1]} : vector<2x128xf32> to vector<2x32xf32>
    %760 = arith.negf %759 : vector<2x32xf32>
    %761 = math.exp %760 : vector<2x32xf32>
    %cst_105 = arith.constant 1.000000e+00 : f32
    %762 = vector.broadcast %cst_105 : f32 to vector<2x32xf32>
    %763 = arith.addf %762, %761 : vector<2x32xf32>
    %764 = arith.divf %762, %763 : vector<2x32xf32>
    %765 = vector.extract_strided_slice %727 {offsets = [0, 64], sizes = [2, 32], strides = [1, 1]} : vector<2x128xf32> to vector<2x32xf32>
    %766 = math.tanh %765 : vector<2x32xf32>
    %767 = vector.extract_strided_slice %727 {offsets = [0, 96], sizes = [2, 32], strides = [1, 1]} : vector<2x128xf32> to vector<2x32xf32>
    %768 = arith.negf %767 : vector<2x32xf32>
    %769 = math.exp %768 : vector<2x32xf32>
    %cst_106 = arith.constant 1.000000e+00 : f32
    %770 = vector.broadcast %cst_106 : f32 to vector<2x32xf32>
    %771 = arith.addf %770, %769 : vector<2x32xf32>
    %772 = arith.divf %770, %771 : vector<2x32xf32>
    %773 = arith.mulf %764, %717 : vector<2x32xf32>
    %774 = arith.mulf %758, %766 : vector<2x32xf32>
    %775 = arith.addf %773, %774 : vector<2x32xf32>
    %776 = math.tanh %775 : vector<2x32xf32>
    %777 = arith.mulf %772, %776 : vector<2x32xf32>
    %778 = tpu.concatenate %752, %777 in 1 : vector<2x32xf32>, vector<2x32xf32> -> vector<2x64xf32>
    %cst_107 = arith.constant dense<0.000000e+00> : vector<2x256xf32>
    %779 = tpu.matmul %778, %486, %cst_107 {dimension_numbers = #tpu.dot_dimension_numbers<[1], [0], [0], [1], [0, 0, 1, 1], [], []>} : vector<2x64xf32>, vector<64x256xf32>, vector<2x256xf32> -> vector<2x256xf32>
    %780 = vector.extract_strided_slice %779 {offsets = [0, 0], sizes = [2, 128], strides = [1, 1]} : vector<2x256xf32> to vector<2x128xf32>
    %781 = vector.extract_strided_slice %485 {offsets = [10, 0], sizes = [2, 128], strides = [1, 1]} : vector<16x256xf32> to vector<2x128xf32>
    %782 = arith.addf %780, %781 : vector<2x128xf32>
    %783 = vector.extract_strided_slice %779 {offsets = [0, 128], sizes = [2, 128], strides = [1, 1]} : vector<2x256xf32> to vector<2x128xf32>
    %784 = vector.extract_strided_slice %485 {offsets = [4, 128], sizes = [2, 128], strides = [1, 1]} : vector<16x256xf32> to vector<2x128xf32>
    %785 = arith.addf %783, %784 : vector<2x128xf32>
    %786 = vector.extract_strided_slice %782 {offsets = [0, 0], sizes = [2, 32], strides = [1, 1]} : vector<2x128xf32> to vector<2x32xf32>
    %787 = arith.negf %786 : vector<2x32xf32>
    %788 = math.exp %787 : vector<2x32xf32>
    %cst_108 = arith.constant 1.000000e+00 : f32
    %789 = vector.broadcast %cst_108 : f32 to vector<2x32xf32>
    %790 = arith.addf %789, %788 : vector<2x32xf32>
    %791 = arith.divf %789, %790 : vector<2x32xf32>
    %792 = vector.extract_strided_slice %782 {offsets = [0, 32], sizes = [2, 32], strides = [1, 1]} : vector<2x128xf32> to vector<2x32xf32>
    %793 = arith.negf %792 : vector<2x32xf32>
    %794 = math.exp %793 : vector<2x32xf32>
    %cst_109 = arith.constant 1.000000e+00 : f32
    %795 = vector.broadcast %cst_109 : f32 to vector<2x32xf32>
    %796 = arith.addf %795, %794 : vector<2x32xf32>
    %797 = arith.divf %795, %796 : vector<2x32xf32>
    %798 = vector.extract_strided_slice %782 {offsets = [0, 64], sizes = [2, 32], strides = [1, 1]} : vector<2x128xf32> to vector<2x32xf32>
    %799 = math.tanh %798 : vector<2x32xf32>
    %800 = vector.extract_strided_slice %782 {offsets = [0, 96], sizes = [2, 32], strides = [1, 1]} : vector<2x128xf32> to vector<2x32xf32>
    %801 = arith.negf %800 : vector<2x32xf32>
    %802 = math.exp %801 : vector<2x32xf32>
    %cst_110 = arith.constant 1.000000e+00 : f32
    %803 = vector.broadcast %cst_110 : f32 to vector<2x32xf32>
    %804 = arith.addf %803, %802 : vector<2x32xf32>
    %805 = arith.divf %803, %804 : vector<2x32xf32>
    %806 = arith.mulf %797, %750 : vector<2x32xf32>
    %807 = arith.mulf %791, %799 : vector<2x32xf32>
    %808 = arith.addf %806, %807 : vector<2x32xf32>
    %809 = math.tanh %808 : vector<2x32xf32>
    %810 = arith.mulf %805, %809 : vector<2x32xf32>
    %811 = vector.extract_strided_slice %785 {offsets = [0, 0], sizes = [2, 32], strides = [1, 1]} : vector<2x128xf32> to vector<2x32xf32>
    %812 = arith.negf %811 : vector<2x32xf32>
    %813 = math.exp %812 : vector<2x32xf32>
    %cst_111 = arith.constant 1.000000e+00 : f32
    %814 = vector.broadcast %cst_111 : f32 to vector<2x32xf32>
    %815 = arith.addf %814, %813 : vector<2x32xf32>
    %816 = arith.divf %814, %815 : vector<2x32xf32>
    %817 = vector.extract_strided_slice %785 {offsets = [0, 32], sizes = [2, 32], strides = [1, 1]} : vector<2x128xf32> to vector<2x32xf32>
    %818 = arith.negf %817 : vector<2x32xf32>
    %819 = math.exp %818 : vector<2x32xf32>
    %cst_112 = arith.constant 1.000000e+00 : f32
    %820 = vector.broadcast %cst_112 : f32 to vector<2x32xf32>
    %821 = arith.addf %820, %819 : vector<2x32xf32>
    %822 = arith.divf %820, %821 : vector<2x32xf32>
    %823 = vector.extract_strided_slice %785 {offsets = [0, 64], sizes = [2, 32], strides = [1, 1]} : vector<2x128xf32> to vector<2x32xf32>
    %824 = math.tanh %823 : vector<2x32xf32>
    %825 = vector.extract_strided_slice %785 {offsets = [0, 96], sizes = [2, 32], strides = [1, 1]} : vector<2x128xf32> to vector<2x32xf32>
    %826 = arith.negf %825 : vector<2x32xf32>
    %827 = math.exp %826 : vector<2x32xf32>
    %cst_113 = arith.constant 1.000000e+00 : f32
    %828 = vector.broadcast %cst_113 : f32 to vector<2x32xf32>
    %829 = arith.addf %828, %827 : vector<2x32xf32>
    %830 = arith.divf %828, %829 : vector<2x32xf32>
    %831 = arith.mulf %822, %775 : vector<2x32xf32>
    %832 = arith.mulf %816, %824 : vector<2x32xf32>
    %833 = arith.addf %831, %832 : vector<2x32xf32>
    %834 = math.tanh %833 : vector<2x32xf32>
    %835 = arith.mulf %830, %834 : vector<2x32xf32>
    %836 = tpu.concatenate %810, %835 in 1 : vector<2x32xf32>, vector<2x32xf32> -> vector<2x64xf32>
    %cst_114 = arith.constant dense<0.000000e+00> : vector<2x256xf32>
    %837 = tpu.matmul %836, %486, %cst_114 {dimension_numbers = #tpu.dot_dimension_numbers<[1], [0], [0], [1], [0, 0, 1, 1], [], []>} : vector<2x64xf32>, vector<64x256xf32>, vector<2x256xf32> -> vector<2x256xf32>
    %838 = vector.extract_strided_slice %837 {offsets = [0, 0], sizes = [2, 128], strides = [1, 1]} : vector<2x256xf32> to vector<2x128xf32>
    %839 = vector.extract_strided_slice %485 {offsets = [12, 0], sizes = [2, 128], strides = [1, 1]} : vector<16x256xf32> to vector<2x128xf32>
    %840 = arith.addf %838, %839 : vector<2x128xf32>
    %841 = vector.extract_strided_slice %837 {offsets = [0, 128], sizes = [2, 128], strides = [1, 1]} : vector<2x256xf32> to vector<2x128xf32>
    %842 = vector.extract_strided_slice %485 {offsets = [2, 128], sizes = [2, 128], strides = [1, 1]} : vector<16x256xf32> to vector<2x128xf32>
    %843 = arith.addf %841, %842 : vector<2x128xf32>
    %844 = vector.extract_strided_slice %840 {offsets = [0, 0], sizes = [2, 32], strides = [1, 1]} : vector<2x128xf32> to vector<2x32xf32>
    %845 = arith.negf %844 : vector<2x32xf32>
    %846 = math.exp %845 : vector<2x32xf32>
    %cst_115 = arith.constant 1.000000e+00 : f32
    %847 = vector.broadcast %cst_115 : f32 to vector<2x32xf32>
    %848 = arith.addf %847, %846 : vector<2x32xf32>
    %849 = arith.divf %847, %848 : vector<2x32xf32>
    %850 = vector.extract_strided_slice %840 {offsets = [0, 32], sizes = [2, 32], strides = [1, 1]} : vector<2x128xf32> to vector<2x32xf32>
    %851 = arith.negf %850 : vector<2x32xf32>
    %852 = math.exp %851 : vector<2x32xf32>
    %cst_116 = arith.constant 1.000000e+00 : f32
    %853 = vector.broadcast %cst_116 : f32 to vector<2x32xf32>
    %854 = arith.addf %853, %852 : vector<2x32xf32>
    %855 = arith.divf %853, %854 : vector<2x32xf32>
    %856 = vector.extract_strided_slice %840 {offsets = [0, 64], sizes = [2, 32], strides = [1, 1]} : vector<2x128xf32> to vector<2x32xf32>
    %857 = math.tanh %856 : vector<2x32xf32>
    %858 = vector.extract_strided_slice %840 {offsets = [0, 96], sizes = [2, 32], strides = [1, 1]} : vector<2x128xf32> to vector<2x32xf32>
    %859 = arith.negf %858 : vector<2x32xf32>
    %860 = math.exp %859 : vector<2x32xf32>
    %cst_117 = arith.constant 1.000000e+00 : f32
    %861 = vector.broadcast %cst_117 : f32 to vector<2x32xf32>
    %862 = arith.addf %861, %860 : vector<2x32xf32>
    %863 = arith.divf %861, %862 : vector<2x32xf32>
    %864 = arith.mulf %855, %808 : vector<2x32xf32>
    %865 = arith.mulf %849, %857 : vector<2x32xf32>
    %866 = arith.addf %864, %865 : vector<2x32xf32>
    %867 = math.tanh %866 : vector<2x32xf32>
    %868 = arith.mulf %863, %867 : vector<2x32xf32>
    %869 = vector.extract_strided_slice %843 {offsets = [0, 0], sizes = [2, 32], strides = [1, 1]} : vector<2x128xf32> to vector<2x32xf32>
    %870 = arith.negf %869 : vector<2x32xf32>
    %871 = math.exp %870 : vector<2x32xf32>
    %cst_118 = arith.constant 1.000000e+00 : f32
    %872 = vector.broadcast %cst_118 : f32 to vector<2x32xf32>
    %873 = arith.addf %872, %871 : vector<2x32xf32>
    %874 = arith.divf %872, %873 : vector<2x32xf32>
    %875 = vector.extract_strided_slice %843 {offsets = [0, 32], sizes = [2, 32], strides = [1, 1]} : vector<2x128xf32> to vector<2x32xf32>
    %876 = arith.negf %875 : vector<2x32xf32>
    %877 = math.exp %876 : vector<2x32xf32>
    %cst_119 = arith.constant 1.000000e+00 : f32
    %878 = vector.broadcast %cst_119 : f32 to vector<2x32xf32>
    %879 = arith.addf %878, %877 : vector<2x32xf32>
    %880 = arith.divf %878, %879 : vector<2x32xf32>
    %881 = vector.extract_strided_slice %843 {offsets = [0, 64], sizes = [2, 32], strides = [1, 1]} : vector<2x128xf32> to vector<2x32xf32>
    %882 = math.tanh %881 : vector<2x32xf32>
    %883 = vector.extract_strided_slice %843 {offsets = [0, 96], sizes = [2, 32], strides = [1, 1]} : vector<2x128xf32> to vector<2x32xf32>
    %884 = arith.negf %883 : vector<2x32xf32>
    %885 = math.exp %884 : vector<2x32xf32>
    %cst_120 = arith.constant 1.000000e+00 : f32
    %886 = vector.broadcast %cst_120 : f32 to vector<2x32xf32>
    %887 = arith.addf %886, %885 : vector<2x32xf32>
    %888 = arith.divf %886, %887 : vector<2x32xf32>
    %889 = arith.mulf %880, %833 : vector<2x32xf32>
    %890 = arith.mulf %874, %882 : vector<2x32xf32>
    %891 = arith.addf %889, %890 : vector<2x32xf32>
    %892 = math.tanh %891 : vector<2x32xf32>
    %893 = arith.mulf %888, %892 : vector<2x32xf32>
    %894 = tpu.concatenate %868, %893 in 1 : vector<2x32xf32>, vector<2x32xf32> -> vector<2x64xf32>
    %cst_121 = arith.constant dense<0.000000e+00> : vector<2x256xf32>
    %895 = tpu.matmul %894, %486, %cst_121 {dimension_numbers = #tpu.dot_dimension_numbers<[1], [0], [0], [1], [0, 0, 1, 1], [], []>} : vector<2x64xf32>, vector<64x256xf32>, vector<2x256xf32> -> vector<2x256xf32>
    %896 = vector.extract_strided_slice %895 {offsets = [0, 0], sizes = [2, 128], strides = [1, 1]} : vector<2x256xf32> to vector<2x128xf32>
    %897 = vector.extract_strided_slice %485 {offsets = [14, 0], sizes = [2, 128], strides = [1, 1]} : vector<16x256xf32> to vector<2x128xf32>
    %898 = arith.addf %896, %897 : vector<2x128xf32>
    %899 = vector.extract_strided_slice %898 {offsets = [0, 0], sizes = [2, 32], strides = [1, 1]} : vector<2x128xf32> to vector<2x32xf32>
    %900 = arith.negf %899 : vector<2x32xf32>
    %901 = math.exp %900 : vector<2x32xf32>
    %cst_122 = arith.constant 1.000000e+00 : f32
    %902 = vector.broadcast %cst_122 : f32 to vector<2x32xf32>
    %903 = arith.addf %902, %901 : vector<2x32xf32>
    %904 = arith.divf %902, %903 : vector<2x32xf32>
    %905 = vector.extract_strided_slice %898 {offsets = [0, 32], sizes = [2, 32], strides = [1, 1]} : vector<2x128xf32> to vector<2x32xf32>
    %906 = arith.negf %905 : vector<2x32xf32>
    %907 = math.exp %906 : vector<2x32xf32>
    %cst_123 = arith.constant 1.000000e+00 : f32
    %908 = vector.broadcast %cst_123 : f32 to vector<2x32xf32>
    %909 = arith.addf %908, %907 : vector<2x32xf32>
    %910 = arith.divf %908, %909 : vector<2x32xf32>
    %911 = vector.extract_strided_slice %898 {offsets = [0, 64], sizes = [2, 32], strides = [1, 1]} : vector<2x128xf32> to vector<2x32xf32>
    %912 = math.tanh %911 : vector<2x32xf32>
    %913 = vector.extract_strided_slice %898 {offsets = [0, 96], sizes = [2, 32], strides = [1, 1]} : vector<2x128xf32> to vector<2x32xf32>
    %914 = arith.negf %913 : vector<2x32xf32>
    %915 = math.exp %914 : vector<2x32xf32>
    %cst_124 = arith.constant 1.000000e+00 : f32
    %916 = vector.broadcast %cst_124 : f32 to vector<2x32xf32>
    %917 = arith.addf %916, %915 : vector<2x32xf32>
    %918 = arith.divf %916, %917 : vector<2x32xf32>
    %919 = arith.mulf %910, %866 : vector<2x32xf32>
    %920 = arith.mulf %904, %912 : vector<2x32xf32>
    %921 = arith.addf %919, %920 : vector<2x32xf32>
    %922 = math.tanh %921 : vector<2x32xf32>
    %923 = arith.mulf %918, %922 : vector<2x32xf32>
    %924 = tpu.concatenate %923, %545 in 1 : vector<2x32xf32>, vector<2x32xf32> -> vector<2x64xf32>
    %c0_125 = arith.constant 0 : index
    %c0_126 = arith.constant 0 : index
    %925 = vector.load %arg7[%c0_125, %c0_126] : memref<64x1xf32, #tpu.memory_space<vmem>>, vector<64x1xf32>
    %cst_127 = arith.constant dense<0.000000e+00> : vector<2x1xf32>
    %926 = tpu.matmul %924, %925, %cst_127 {dimension_numbers = #tpu.dot_dimension_numbers<[1], [0], [0], [1], [0, 0, 1, 1], [], []>} : vector<2x64xf32>, vector<64x1xf32>, vector<2x1xf32> -> vector<2x1xf32>
    %c0_128 = arith.constant 0 : index
    %c0_129 = arith.constant 0 : index
    %927 = vector.load %arg8[%c0_128, %c0_129] : memref<1x1xf32, #tpu.memory_space<vmem>>, vector<1x1xf32>
    %928 = vector.broadcast %927 : vector<1x1xf32> to vector<2x1xf32>
    %929 = arith.addf %926, %928 : vector<2x1xf32>
    %c0_130 = arith.constant 0 : index
    %c0_131 = arith.constant 0 : index
    %930 = vector.load %arg9[%c0_130, %c0_131] : memref<2x1xf32, #tpu.memory_space<vmem>>, vector<2x1xf32>
    tpu.vector_store %arg9[%c0_130, %c0_131], %929 {strides = array<i32>} : memref<2x1xf32, #tpu.memory_space<vmem>>, vector<2x1xf32>,
    return
  }
}

</mosaic_0001>

<bundles_post_ra>
// kernel: bilstm_classifier_forward.1
= control target key start
LH: loop header
LB: loop body
LE: loop exit
PB: predicated region body
PF: predicated region fallthrough
CT: control target
= control target key end

     0   :  { %s3851_s0 = inlined_call_operand.vmem [shape: f32[16,16], index: 0, kind: input, shape index: {}]   ;;  %s3852_s1 = inlined_call_operand.vmem [shape: f32[16,256], index: 1, kind: input, shape index: {}]   ;;  %s3853_s2 = inlined_call_operand.hbm [shape: f32[64,256], index: 2, kind: input, shape index: {}]   ;;  %s3854_s3 = inlined_call_operand.vmem [shape: f32[1,256], index: 3, kind: input, shape index: {}]   ;;  %s3855_s4 = inlined_call_operand.hbm [shape: f32[64,256], index: 4, kind: input, shape index: {}]   ;;  %s3856_s5 = inlined_call_operand.hbm [shape: f32[64,256], index: 5, kind: input, shape index: {}]   ;;  %s3857_s6 = inlined_call_operand.vmem [shape: f32[1,256], index: 6, kind: input, shape index: {}]   ;;  %s3858_s7 = inlined_call_operand.vmem [shape: f32[64,1], index: 7, kind: input, shape index: {}]   ;;  %s3859_s8 = inlined_call_operand.<no memory space> [shape: f32[1,1], index: 8, kind: input, shape index: {}]   ;;  %s3860_s9 = inlined_call_operand.vmem [shape: f32[2,1], index: 9, kind: output, shape index: {}]  }
   0x1   :  { %v14_v0 = vstv %s3859_s8 }
   0x2   :  { %15 = vst [vmem:[#allocation2] sm:$0x1] %v14_v0 }
   0x3   :  { %16 = vsyncpa [#allocation4], 0 }
   0x4   :  { %17 = vsyncpa [#allocation6], 0  ;;  %s3003_s11 = smov [#allocation5]   ;;  %s3004_s13 = smov [#allocation3]  }
   0x5   :  { %s41_s12 = sshll.u32 %s3003_s11, 4  ;;  %s27_s14 = sshll.u32 %s3004_s13, 4  ;;  %s42_s12 = int_to_ptr.vmem [resolvable:$true] %s41_s12  ;;  %s28_s14 = int_to_ptr.vmem [resolvable:$true] %s27_s14 }
   0x6   :  { %s2947_s15 = scalar_lea.vmem %s42_s12, 2048  ;;  %p2952_p1 = scmp.lt.s32.totalorder %s42_s12, %s42_s12 }
   0x7   :  { %p2948_p0 = scmp.ne.s32.totalorder %s42_s12, %s2947_s15  ;;  %p2953_p2 = scmp.lt.s32.totalorder %s2947_s15, %s2947_s15 }
   0x9   :  { %p2954_p3 = por %p2953_p2, %p2952_p1 }
   0xb   :  { %p2955_p4 = pnand %p2954_p3, %p2948_p0 }
   0xd   :  { %2958 = shalt.err (!%p2955_p4)
}
   0xe   :  { %s3005_s16 = smov 256   ;;  %s3006_s17 = smov 16  }
   0xf   :  { %47 = dma.hbm_to_vmem [thread:$0]  %s3855_s4, 2048, %s42_s12, [#allocation6], %s3005_s16, %s3005_s16, %s3006_s17  }
  0x10   :  { %s2967_s19 = scalar_lea.vmem %s28_s14, 2048  ;;  %p2972_p6 = scmp.lt.s32.totalorder %s28_s14, %s28_s14 }
  0x11   :  { %p2968_p5 = scmp.ne.s32.totalorder %s28_s14, %s2967_s19  ;;  %p2973_p7 = scmp.lt.s32.totalorder %s2967_s19, %s2967_s19 }
  0x13   :  { %p2974_p8 = por %p2973_p7, %p2972_p6 }
  0x15   :  { %p2975_p9 = pnand %p2974_p8, %p2968_p5 }
  0x17   :  { %2978 = shalt.err (!%p2975_p9)
}
  0x18   :  { %33 = dma.hbm_to_vmem [thread:$0]  %s3853_s2, 2048, %s28_s14, [#allocation4], %s3005_s16, %s3005_s16, %s3006_s17  }
  0x19   :  { %s3007_s22 = smov [#allocation7]  }
  0x1a   :  { %s53_s23 = sshll.u32 %s3007_s22, 4  ;;  %s54_s23 = int_to_ptr.vmem [resolvable:$true] %s53_s23 }
  0x1b   :  { %s2987_s24 = scalar_lea.vmem %s54_s23, 2048  ;;  %p2992_p11 = scmp.lt.s32.totalorder %s54_s23, %s54_s23 }
  0x1c   :  { %p2988_p10 = scmp.ne.s32.totalorder %s54_s23, %s2987_s24  ;;  %p2993_p12 = scmp.lt.s32.totalorder %s2987_s24, %s2987_s24 }
  0x1e   :  { %p2994_p13 = por %p2993_p12, %p2992_p11 }
  0x20   :  { %p2995_p0 = pnand %p2994_p13, %p2988_p10 }
  0x22   :  { %2998 = shalt.err (!%p2995_p0)
}
  0x23   :  { %59 = dma.hbm_to_vmem [thread:$0]  %s3856_s5, 2048, %s54_s23, [#allocation6], %s3005_s16, %s3005_s16, %s3006_s17  }
  0x24   :  { %2999 = dma.done.wait [#allocation4], 2048  }
  0x25   :  { %3000 = vsyncadd [#allocation4], 4294965248 }
  0x26   :  { %3001 = dma.done.wait [#allocation6], 4096  }
  0x27   :  { %3002 = vsyncadd [#allocation6], 4294963200  ;;  %v3008_v1 = vmov 0.0   ;;  %v3076_v2 = vld [vmem:[#allocation3 + $0x78] sm:$0xff]  ;;  %v3078_v3 = vld [vmem:[#allocation3 + $0x70] sm:$0xff]  ;;  %vm93_vm0 = vcmask 130048   ;;  %v83_v24 = vlaneseq }
  0x28   :  { %164 = vmatprep.mubr.f32.mxu0 %v3008_v1  ;;  %261 = vmatprep.mubr.f32.mxu1 %v3008_v1  ;;  %v3080_v4 = vld [vmem:[#allocation3 + $0x68] sm:$0xff]  ;;  %v3083_v5 = vld [vmem:[#allocation3 + $0x60] sm:$0xff]  ;;  %v80_v6 = vld [vmem:[%s3852_s1 + $0x18] sm:$0xff]  ;;  %s3010_s15 = smov 32   ;;  %vm329_vm1 = vcmask 261120   ;;  %vm193_vm2 = vcmask 523264  }
  0x29   :  { %213 = vmatprep.subr.mxu1 %v3076_v2  ;;  %128 = vmatprep.subr.mxu0 %v80_v6  ;;  %v3089_v7 = vld [vmem:[#allocation3 + $0x58] sm:$0xff]  ;;  %v79_v8 = vld [vmem:[%s3852_s1 + $0x10] sm:$0xff]  ;;  %v78_v9 = vld [vmem:[%s3852_s1 + $0x8] sm:$0xff]  ;;  %v3182_v25 = vshrl.u32 %v83_v24, 7  ;;  %vm1312_vm3 = vcmask 1041408   ;;  %vm1314_vm4 = vcmask 1043456  }
  0x2a   :  { %214 = vmatpush1.msra.mxu1 %v3078_v3  ;;  %129 = vmatpush1.msra.mxu0 %v79_v8  ;;  %v3098_v10 = vld [vmem:[#allocation3 + $0x50] sm:$0xff]  ;;  %v77_v11 = vld [vmem:[%s3852_s1] sm:$0xff]  ;;  %v3104_v12 = vld [vmem:[#allocation3 + $0x48] sm:$0xff]  ;;  %vm1316_vm5 = vcmask 1045504   ;;  %vm3011_vm6 = vmmov 0   ;;  %vm2595_vm7 = vcmask 1024  }
  0x2b   :  { %215 = vmatprep.subr.mxu1 %v3080_v4  ;;  %130 = vmatprep.subr.mxu0 %v78_v9  ;;  %v75_v13 = vld [vmem:[%s3851_s0] sm:$0xff]  ;;  %v3117_v16 = vld [vmem:[#allocation3 + $0x30] sm:$0xff]  ;;  %v76_v17 = vld [vmem:[%s3851_s0 + $0x8] sm:$0xff]  ;;  %v89_v26 = vsub.s32 1, %v3182_v25  ;;  %v85_v28 = vsub.s32 0, %v3182_v25 }
  0x2c   :  { %216 = vmatpush1.msra.mxu1 %v3083_v5  ;;  %131 = vmatpush1.msra.mxu0 %v77_v11  ;;  %v3110_v14 = vld [vmem:[#allocation3 + $0x40] sm:$0xff]  ;;  %v3114_v15 = vld [vmem:[#allocation3 + $0x38] sm:$0xff]  ;;  %v3124_v18 = vld [vmem:[#allocation3 + $0x28] sm:$0xff] }
  0x2d   :  { %217 = vmatprep.subr.mxu1 %v3089_v7  ;;  %2603 = vmatmul.mubr.msk.f32.vlgmr.msra.gmra.mxu0 %vm93_vm0, %v75_v13  ;;  %v3128_v19 = vld [vmem:[#allocation3 + $0x20] sm:$0xff]  ;;  %v3133_v20 = vld [vmem:[#allocation3 + $0x18] sm:$0xff]  ;;  %v3136_v21 = vld [vmem:[#allocation3 + $0x10] sm:$0xff] }
  0x2e   :  { %218 = vmatpush1.msra.mxu1 %v3098_v10  ;;  %170 = vmatprep.mubr.f32.mxu0 %v3008_v1  ;;  %v3140_v22 = vld [vmem:[#allocation3 + $0x8] sm:$0xff]  ;;  %v3144_v23 = vld [vmem:[#allocation3] sm:$0xff] }
  0x2f   :  { %219 = vmatprep.subr.mxu1 %v3104_v12  ;;  %350 = vmatprep.subr.mxu0 %v3076_v2  ;;  %v81_v27 = vld [vmem:[%s3854_s3] sm:$0x3]  ;;  %s3009_s3 = smov 64  }
  0x30   :  { %220 = vmatpush1.msra.mxu1 %v3110_v14  ;;  %351 = vmatpush1.msra.mxu0 %v3078_v3  ;;  %v90_v29 = vrot.slane %v81_v27, %v89_v26  ;;  %v86_v32 = vrot.slane %v81_v27, %v85_v28 }
  0x31   :  { %221 = vmatprep.subr.mxu1 %v3114_v15  ;;  %2604 = vmatmul.mubr.msk.f32.gmra.mxu0 %vm93_vm0, %v76_v17 }
  0x32   :  { %222 = vmatpush1.msra.mxu1 %v3117_v16  ;;  %352 = vmatprep.subr.mxu0 %v3080_v4 }
  0x33   :  { %223 = vmatprep.subr.mxu1 %v3124_v18  ;;  %353 = vmatpush1.msra.mxu0 %v3083_v5 }
  0x34   :  { %224 = vmatpush1.msra.mxu1 %v3128_v19  ;;  %354 = vmatprep.subr.mxu0 %v3089_v7 }
  0x35   :  { %225 = vmatprep.subr.mxu1 %v3133_v20  ;;  %355 = vmatpush1.msra.mxu0 %v3098_v10 }
  0x36   :  { %226 = vmatpush1.msra.mxu1 %v3136_v21  ;;  %356 = vmatprep.subr.mxu0 %v3104_v12 }
  0x37   :  { %227 = vmatprep.subr.mxu1 %v3140_v22  ;;  %357 = vmatpush1.msra.mxu0 %v3110_v14 }
  0x38   :  { %228 = vmatpush1.msra.mxu1 %v3144_v23  ;;  %358 = vmatprep.subr.mxu0 %v3114_v15 }
  0x39   :  { %262 = vmatmul.mubr.f32.vlgmr.msra.gmra.mxu1 %v3008_v1  ;;  %359 = vmatpush1.msra.mxu0 %v3117_v16 }
  0x3a   :  { %398 = vmatprep.mubr.f32.mxu0 %v3008_v1  ;;  %360 = vmatprep.subr.mxu0 %v3124_v18 }
  0x3b   :  { %488 = vmatprep.subr.mxu1 %v3076_v2  ;;  %361 = vmatpush1.msra.mxu0 %v3128_v19 }
  0x3c   :  { %489 = vmatpush1.msra.mxu1 %v3078_v3  ;;  %362 = vmatprep.subr.mxu0 %v3133_v20 }
  0x3d   :  { %490 = vmatprep.subr.mxu1 %v3080_v4  ;;  %363 = vmatpush1.msra.mxu0 %v3136_v21 }
  0x3e   :  { %491 = vmatpush1.msra.mxu1 %v3083_v5  ;;  %364 = vmatprep.subr.mxu0 %v3140_v22 }
  0x3f   :  { %492 = vmatprep.subr.mxu1 %v3089_v7  ;;  %365 = vmatpush1.msra.mxu0 %v3144_v23 }
  0x40   :  { %493 = vmatpush1.msra.mxu1 %v3098_v10  ;;  %536 = vmatprep.mubr.f32.mxu1 %v3008_v1 }
  0x41   :  { %494 = vmatprep.subr.mxu1 %v3104_v12  ;;  %625 = vmatprep.subr.mxu0 %v3076_v2 }
  0x42   :  { %495 = vmatpush1.msra.mxu1 %v3110_v14 }
  0x43   :  { %496 = vmatprep.subr.mxu1 %v3114_v15 }
  0x44   :  { %497 = vmatpush1.msra.mxu1 %v3117_v16 }
  0x45   :  { %498 = vmatprep.subr.mxu1 %v3124_v18 }
  0x46   :  { %499 = vmatpush1.msra.mxu1 %v3128_v19 }
  0x47   :  { %500 = vmatprep.subr.mxu1 %v3133_v20 }
  0x48   :  { %501 = vmatpush1.msra.mxu1 %v3136_v21 }
  0x49   :  { %502 = vmatprep.subr.mxu1 %v3140_v22 }
  0x4a   :  { %503 = vmatpush1.msra.mxu1 %v3144_v23 }
  0x4b   :  { %760 = vmatprep.subr.mxu1 %v3076_v2 }
  0xed   :  { %v166_v30 = vpop.f32.mrf.mxu0 }
  0xee   :  { %v3199_v38 = vadd.f32 %v166_v30, %v86_v32 }
  0xef   :  { %v168_v31 = vpop.f32.mrf.mxu0 }
  0xf0   :  { %v3193_v33 = vadd.f32 %v168_v31, %v90_v29 }
  0xf1   :  { %v172_v34 = vpop.f32.mrf.mxu0 }
  0xf2   :  { %v3195_v35 = vadd.f32 %v172_v34, %v86_v32 }
  0xf3   :  { %v174_v36 = vpop.f32.mrf.mxu0 }
  0xf4   :  { %v3197_v37 = vadd.f32 %v174_v36, %v90_v29  ;;  %v406_v29 = vrot.slane %v3199_v38, 2 }
  0xf6   :  { %v270_v39 = vrot.slane %v3197_v37, 6  ;;  %v409_v32 = vrot.slane %v3197_v37, 4 }
  0xf9   :  { %v263_v40 = vpop.f32.mrf.mxu1 }
  0xfa   :  { %v268_v41 = vadd.f32 %v263_v40, %v3199_v38 }
  0xfb   :  { %v265_v42 = vpop.f32.mrf.mxu1 }
  0xfc   :  { %2691 = vtanh.f32 %v268_v41  ;;  %v272_v43 = vadd.f32 %v270_v39, %v265_v42  ;;  %v2605_v46 = vmul.f32 -1.442695, %v268_v41 }
  0xfe   :  { %2693 = vtanh.f32 %v272_v43  ;;  %v2606_v47 = vmul.f32 -1.442695, %v272_v43 }
  0xff   :  { %2695 = vpow2.f32 %v2605_v46 }
 0x100   :  { %2697 = vpow2.f32 %v2606_v47 }
 0x109   :  { %v2692_v44 = vpop.eup %2691 }
 0x10a   :  { %282 = vrot.lane.b32.xlu0 %v2692_v44, %s3009_s3 }
 0x10b   :  { %v2694_v45 = vpop.eup %2693 }
 0x10c   :  { %v2696_v48 = vpop.eup %2695 }
 0x10d   :  { %v276_v49 = vadd.f32 1.0, %v2696_v48  ;;  %v2698_v50 = vpop.eup %2697 }
 0x10e   :  { %306 = vrot.lane.b32.xlu0 %v2694_v45, %s3009_s3  ;;  %v300_v51 = vadd.f32 1.0, %v2698_v50 }
 0x10f   :  { %2699 = vrcp.f32 %v276_v49 }
 0x110   :  { %2701 = vrcp.f32 %v300_v51 }
 0x11c   :  { %v2700_v52 = vpop.eup %2699 }
 0x11d   :  { %v2702_v55 = vpop.eup %2701  ;;  %v280_v58 = vmul.f32 0.0, %v2700_v52 }
 0x11e   :  { %v304_v61 = vmul.f32 0.0, %v2702_v55 }
 0x17c   :  { %v283_v53 = vpop.permute.xlu0 %282 }
 0x17d   :  { %v285_v54 = vmul.f32 %v2700_v52, %v283_v53 }
 0x17f   :  { %287 = vrot.lane.b32.xlu1 %v285_v54, %s3010_s15 }
 0x180   :  { %v307_v56 = vpop.permute.xlu0 %306 }
 0x181   :  { %v309_v57 = vmul.f32 %v2702_v55, %v307_v56 }
 0x183   :  { %311 = vrot.lane.b32.xlu1 %v309_v57, %s3010_s15 }
 0x1f1   :  { %v288_v59 = vpop.permute.xlu1 %287 }
 0x1f2   :  { %v3207_v60 = vadd.f32 %v288_v59, %v280_v58 }
 0x1f4   :  { %2703 = vtanh.f32 %v3207_v60 }
 0x1f5   :  { %v312_v62 = vpop.permute.xlu1 %311 }
 0x1f6   :  { %v3210_v63 = vadd.f32 %v312_v62, %v304_v61 }
 0x1f8   :  { %2705 = vtanh.f32 %v3210_v63 }
 0x201   :  { %v2704_v0 = vpop.eup %2703 }
 0x202   :  { %293 = vrot.lane.b32.xlu0 %v2704_v0, %s3009_s3 }
 0x205   :  { %v2706_v6 = vpop.eup %2705 }
 0x206   :  { %317 = vrot.lane.b32.xlu1 %v2706_v6, %s3009_s3 }
 0x274   :  { %v294_v8 = vpop.permute.xlu0 %293 }
 0x275   :  { %v296_v9 = vmul.f32 %v2700_v52, %v294_v8 }
 0x277   :  { %322 = vrot.lane.b32.xlu0 %v296_v9, %s3010_s15 }
 0x278   :  { %v318_v11 = vpop.permute.xlu1 %317 }
 0x279   :  { %v320_v13 = vmul.f32 %v2702_v55, %v318_v11  ;;  %v543_v11 = vrot.slane %v3199_v38, 4 }
 0x27b   :  { %326 = vrot.lane.b32.xlu1 %v320_v13, %s3009_s3 }
 0x2e9   :  { %v3217_v17 = vpop.permute.xlu0 %322 }
 0x2ed   :  { %v3219_v24 = vpop.permute.xlu1 %326 }
 0x2ee   :  { %v330_v27 = vsel %vm329_vm1, %v3217_v17, %v3219_v24 }
 0x2ef   :  { %2607 = vmatmul.mubr.msk.f32.vlgmr.msra.gmra.mxu0 %vm193_vm2, %v330_v27 }
 0x2f0   :  { %626 = vmatpush1.msra.mxu0 %v3078_v3  ;;  %673 = vmatprep.mubr.f32.mxu0 %v3008_v1 }
 0x2f1   :  { %627 = vmatprep.subr.mxu0 %v3080_v4 }
 0x2f2   :  { %628 = vmatpush1.msra.mxu0 %v3083_v5 }
 0x2f3   :  { %629 = vmatprep.subr.mxu0 %v3089_v7 }
 0x2f4   :  { %630 = vmatpush1.msra.mxu0 %v3098_v10 }
 0x2f5   :  { %631 = vmatprep.subr.mxu0 %v3104_v12 }
 0x2f6   :  { %632 = vmatpush1.msra.mxu0 %v3110_v14 }
 0x2f7   :  { %633 = vmatprep.subr.mxu0 %v3114_v15 }
 0x2f8   :  { %634 = vmatpush1.msra.mxu0 %v3117_v16 }
 0x2f9   :  { %635 = vmatprep.subr.mxu0 %v3124_v18 }
 0x2fa   :  { %636 = vmatpush1.msra.mxu0 %v3128_v19 }
 0x2fb   :  { %637 = vmatprep.subr.mxu0 %v3133_v20 }
 0x2fc   :  { %638 = vmatpush1.msra.mxu0 %v3136_v21 }
 0x2fd   :  { %639 = vmatprep.subr.mxu0 %v3140_v22 }
 0x2fe   :  { %640 = vmatpush1.msra.mxu0 %v3144_v23 }
 0x2ff   :  { %896 = vmatprep.subr.mxu0 %v3076_v2 }
 0x3af   :  { %v400_v30 = vpop.f32.mrf.mxu0 }
 0x3b0   :  { %v408_v31 = vadd.f32 %v406_v29, %v400_v30  ;;  %v546_v29 = vrot.slane %v3197_v37, 2 }
 0x3b1   :  { %v402_v34 = vpop.f32.mrf.mxu0 }
 0x3b2   :  { %2707 = vtanh.f32 %v408_v31  ;;  %v411_v36 = vadd.f32 %v409_v32, %v402_v34  ;;  %v2608_v41 = vmul.f32 -1.442695, %v408_v31 }
 0x3b4   :  { %2709 = vtanh.f32 %v411_v36  ;;  %v2609_v42 = vmul.f32 -1.442695, %v411_v36 }
 0x3b5   :  { %2711 = vpow2.f32 %v2608_v41 }
 0x3b6   :  { %2713 = vpow2.f32 %v2609_v42 }
 0x3bf   :  { %v2708_v39 = vpop.eup %2707 }
 0x3c0   :  { %421 = vrot.lane.b32.xlu0 %v2708_v39, %s3009_s3 }
 0x3c1   :  { %v2710_v40 = vpop.eup %2709 }
 0x3c2   :  { %445 = vrot.lane.b32.xlu1 %v2710_v40, %s3009_s3  ;;  %v2712_v43 = vpop.eup %2711 }
 0x3c3   :  { %v2714_v44 = vpop.eup %2713  ;;  %v415_v45 = vadd.f32 1.0, %v2712_v43 }
 0x3c4   :  { %v439_v46 = vadd.f32 1.0, %v2714_v44 }
 0x3c5   :  { %2715 = vrcp.f32 %v415_v45 }
 0x3c6   :  { %2717 = vrcp.f32 %v439_v46 }
 0x3d2   :  { %v2716_v47 = vpop.eup %2715 }
 0x3d3   :  { %v2718_v50 = vpop.eup %2717  ;;  %v419_v53 = vmul.f32 %v2716_v47, %v3207_v60 }
 0x3d4   :  { %v443_v56 = vmul.f32 %v2718_v50, %v3210_v63 }
 0x432   :  { %v422_v48 = vpop.permute.xlu0 %421 }
 0x433   :  { %v424_v49 = vmul.f32 %v2716_v47, %v422_v48 }
 0x434   :  { %v446_v51 = vpop.permute.xlu1 %445 }
 0x435   :  { %426 = vrot.lane.b32.xlu0 %v424_v49, %s3010_s15  ;;  %v448_v52 = vmul.f32 %v2718_v50, %v446_v51 }
 0x437   :  { %450 = vrot.lane.b32.xlu1 %v448_v52, %s3010_s15 }
 0x4a7   :  { %v427_v54 = vpop.permute.xlu0 %426 }
 0x4a8   :  { %v3249_v55 = vadd.f32 %v427_v54, %v419_v53 }
 0x4a9   :  { %v451_v57 = vpop.permute.xlu1 %450 }
 0x4aa   :  { %2719 = vtanh.f32 %v3249_v55  ;;  %v3253_v58 = vadd.f32 %v451_v57, %v443_v56 }
 0x4ac   :  { %2721 = vtanh.f32 %v3253_v58 }
 0x4b7   :  { %v2720_v59 = vpop.eup %2719 }
 0x4b8   :  { %432 = vrot.lane.b32.xlu0 %v2720_v59, %s3009_s3 }
 0x4b9   :  { %v2722_v61 = vpop.eup %2721 }
 0x4ba   :  { %456 = vrot.lane.b32.xlu1 %v2722_v61, %s3009_s3 }
 0x52a   :  { %v433_v62 = vpop.permute.xlu0 %432 }
 0x52b   :  { %v435_v60 = vmul.f32 %v2716_v47, %v433_v62 }
 0x52c   :  { %v457_v0 = vpop.permute.xlu1 %456 }
 0x52d   :  { %461 = vrot.lane.b32.xlu0 %v435_v60, %s3010_s15  ;;  %v459_v6 = vmul.f32 %v2718_v50, %v457_v0 }
 0x52f   :  { %465 = vrot.lane.b32.xlu1 %v459_v6, %s3009_s3 }
 0x59f   :  { %v3260_v63 = vpop.permute.xlu0 %461 }
 0x5a1   :  { %v3262_v8 = vpop.permute.xlu1 %465 }
 0x5a2   :  { %v468_v9 = vsel %vm329_vm1, %v3260_v63, %v3262_v8 }
 0x5a3   :  { %2610 = vmatmul.mubr.msk.f32.vlgmr.msra.gmra.mxu1 %vm193_vm2, %v468_v9  ;;  %v680_v9 = vrot.slane %v3199_v38, 6 }
 0x5a4   :  { %761 = vmatpush1.msra.mxu1 %v3078_v3  ;;  %808 = vmatprep.mubr.f32.mxu1 %v3008_v1 }
 0x5a5   :  { %762 = vmatprep.subr.mxu1 %v3080_v4 }
 0x5a6   :  { %763 = vmatpush1.msra.mxu1 %v3083_v5 }
 0x5a7   :  { %764 = vmatprep.subr.mxu1 %v3089_v7 }
 0x5a8   :  { %765 = vmatpush1.msra.mxu1 %v3098_v10 }
 0x5a9   :  { %766 = vmatprep.subr.mxu1 %v3104_v12 }
 0x5aa   :  { %767 = vmatpush1.msra.mxu1 %v3110_v14 }
 0x5ab   :  { %768 = vmatprep.subr.mxu1 %v3114_v15 }
 0x5ac   :  { %769 = vmatpush1.msra.mxu1 %v3117_v16 }
 0x5ad   :  { %770 = vmatprep.subr.mxu1 %v3124_v18 }
 0x5ae   :  { %771 = vmatpush1.msra.mxu1 %v3128_v19 }
 0x5af   :  { %772 = vmatprep.subr.mxu1 %v3133_v20 }
 0x5b0   :  { %773 = vmatpush1.msra.mxu1 %v3136_v21 }
 0x5b1   :  { %774 = vmatprep.subr.mxu1 %v3140_v22 }
 0x5b2   :  { %775 = vmatpush1.msra.mxu1 %v3144_v23 }
 0x5b3   :  { %1034 = vmatprep.subr.mxu1 %v3076_v2 }
 0x663   :  { %v538_v13 = vpop.f32.mrf.mxu1 }
 0x664   :  { %v545_v27 = vadd.f32 %v543_v11, %v538_v13 }
 0x665   :  { %v540_v30 = vpop.f32.mrf.mxu1 }
 0x666   :  { %2723 = vtanh.f32 %v545_v27  ;;  %v548_v31 = vadd.f32 %v546_v29, %v540_v30  ;;  %v2611_v36 = vmul.f32 -1.442695, %v545_v27 }
 0x668   :  { %2725 = vtanh.f32 %v548_v31  ;;  %v2612_v39 = vmul.f32 -1.442695, %v548_v31 }
 0x669   :  { %2727 = vpow2.f32 %v2611_v36 }
 0x66a   :  { %2729 = vpow2.f32 %v2612_v39 }
 0x673   :  { %v2724_v32 = vpop.eup %2723 }
 0x674   :  { %558 = vrot.lane.b32.xlu0 %v2724_v32, %s3009_s3 }
 0x675   :  { %v2726_v34 = vpop.eup %2725 }
 0x676   :  { %582 = vrot.lane.b32.xlu1 %v2726_v34, %s3009_s3  ;;  %v2728_v40 = vpop.eup %2727 }
 0x677   :  { %v2730_v41 = vpop.eup %2729  ;;  %v552_v42 = vadd.f32 1.0, %v2728_v40 }
 0x678   :  { %v576_v43 = vadd.f32 1.0, %v2730_v41 }
 0x679   :  { %2731 = vrcp.f32 %v552_v42 }
 0x67a   :  { %2733 = vrcp.f32 %v576_v43 }
 0x686   :  { %v2732_v44 = vpop.eup %2731 }
 0x687   :  { %v2734_v47 = vpop.eup %2733  ;;  %v556_v50 = vmul.f32 %v2732_v44, %v3249_v55 }
 0x688   :  { %v580_v53 = vmul.f32 %v2734_v47, %v3253_v58 }
 0x6e6   :  { %v559_v45 = vpop.permute.xlu0 %558 }
 0x6e7   :  { %v561_v46 = vmul.f32 %v2732_v44, %v559_v45 }
 0x6e8   :  { %v583_v48 = vpop.permute.xlu1 %582 }
 0x6e9   :  { %563 = vrot.lane.b32.xlu0 %v561_v46, %s3010_s15  ;;  %v585_v49 = vmul.f32 %v2734_v47, %v583_v48 }
 0x6eb   :  { %587 = vrot.lane.b32.xlu1 %v585_v49, %s3010_s15 }
 0x75b   :  { %v564_v51 = vpop.permute.xlu0 %563 }
 0x75c   :  { %v3292_v52 = vadd.f32 %v564_v51, %v556_v50 }
 0x75d   :  { %v588_v54 = vpop.permute.xlu1 %587 }
 0x75e   :  { %2735 = vtanh.f32 %v3292_v52  ;;  %v3296_v56 = vadd.f32 %v588_v54, %v580_v53 }
 0x760   :  { %2737 = vtanh.f32 %v3296_v56 }
 0x76b   :  { %v2736_v57 = vpop.eup %2735 }
 0x76c   :  { %569 = vrot.lane.b32.xlu0 %v2736_v57, %s3009_s3 }
 0x76d   :  { %v2738_v59 = vpop.eup %2737 }
 0x76e   :  { %593 = vrot.lane.b32.xlu1 %v2738_v59, %s3009_s3 }
 0x7de   :  { %v570_v61 = vpop.permute.xlu0 %569 }
 0x7df   :  { %v572_v55 = vmul.f32 %v2732_v44, %v570_v61 }
 0x7e0   :  { %v594_v62 = vpop.permute.xlu1 %593 }
 0x7e1   :  { %598 = vrot.lane.b32.xlu0 %v572_v55, %s3010_s15  ;;  %v596_v60 = vmul.f32 %v2734_v47, %v594_v62 }
 0x7e3   :  { %602 = vrot.lane.b32.xlu1 %v596_v60, %s3009_s3 }
 0x853   :  { %v3303_v58 = vpop.permute.xlu0 %598 }
 0x855   :  { %v3305_v0 = vpop.permute.xlu1 %602 }
 0x856   :  { %v605_v6 = vsel %vm329_vm1, %v3303_v58, %v3305_v0 }
 0x857   :  { %2613 = vmatmul.mubr.msk.f32.vlgmr.msra.gmra.mxu0 %vm193_vm2, %v605_v6  ;;  %v817_v6 = vrot.slane %v3193_v33, 6 }
 0x858   :  { %897 = vmatpush1.msra.mxu0 %v3078_v3  ;;  %944 = vmatprep.mubr.f32.mxu0 %v3008_v1 }
 0x859   :  { %898 = vmatprep.subr.mxu0 %v3080_v4 }
 0x85a   :  { %899 = vmatpush1.msra.mxu0 %v3083_v5 }
 0x85b   :  { %900 = vmatprep.subr.mxu0 %v3089_v7 }
 0x85c   :  { %901 = vmatpush1.msra.mxu0 %v3098_v10 }
 0x85d   :  { %902 = vmatprep.subr.mxu0 %v3104_v12 }
 0x85e   :  { %903 = vmatpush1.msra.mxu0 %v3110_v14 }
 0x85f   :  { %904 = vmatprep.subr.mxu0 %v3114_v15 }
 0x860   :  { %905 = vmatpush1.msra.mxu0 %v3117_v16 }
 0x861   :  { %906 = vmatprep.subr.mxu0 %v3124_v18 }
 0x862   :  { %907 = vmatpush1.msra.mxu0 %v3128_v19 }
 0x863   :  { %908 = vmatprep.subr.mxu0 %v3133_v20 }
 0x864   :  { %909 = vmatpush1.msra.mxu0 %v3136_v21 }
 0x865   :  { %910 = vmatprep.subr.mxu0 %v3140_v22 }
 0x866   :  { %911 = vmatpush1.msra.mxu0 %v3144_v23 }
 0x867   :  { %1171 = vmatprep.subr.mxu0 %v3076_v2 }
 0x917   :  { %v675_v11 = vpop.f32.mrf.mxu0 }
 0x918   :  { %v682_v13 = vadd.f32 %v680_v9, %v675_v11 }
 0x919   :  { %v677_v27 = vpop.f32.mrf.mxu0 }
 0x91a   :  { %2739 = vtanh.f32 %v682_v13  ;;  %v683_v29 = vadd.f32 %v677_v27, %v3197_v37  ;;  %v2614_v32 = vmul.f32 -1.442695, %v682_v13 }
 0x91c   :  { %2741 = vtanh.f32 %v683_v29  ;;  %v2615_v34 = vmul.f32 -1.442695, %v683_v29 }
 0x91d   :  { %2743 = vpow2.f32 %v2614_v32 }
 0x91e   :  { %2745 = vpow2.f32 %v2615_v34 }
 0x927   :  { %v2740_v30 = vpop.eup %2739 }
 0x928   :  { %693 = vrot.lane.b32.xlu0 %v2740_v30, %s3009_s3 }
 0x929   :  { %v2742_v31 = vpop.eup %2741 }
 0x92a   :  { %717 = vrot.lane.b32.xlu1 %v2742_v31, %s3009_s3  ;;  %v2744_v2 = vpop.eup %2743 }
 0x92b   :  { %v2746_v36 = vpop.eup %2745  ;;  %v687_v38 = vadd.f32 1.0, %v2744_v2 }
 0x92c   :  { %v711_v39 = vadd.f32 1.0, %v2746_v36 }
 0x92d   :  { %2747 = vrcp.f32 %v687_v38 }
 0x92e   :  { %2749 = vrcp.f32 %v711_v39 }
 0x93a   :  { %v2748_v40 = vpop.eup %2747 }
 0x93b   :  { %v2750_v42 = vpop.eup %2749  ;;  %v691_v45 = vmul.f32 %v2748_v40, %v3292_v52 }
 0x93c   :  { %v715_v48 = vmul.f32 %v2750_v42, %v3296_v56 }
 0x99a   :  { %v694_v41 = vpop.permute.xlu0 %693 }
 0x99b   :  { %v696_v37 = vmul.f32 %v2748_v40, %v694_v41 }
 0x99c   :  { %v718_v43 = vpop.permute.xlu1 %717 }
 0x99d   :  { %698 = vrot.lane.b32.xlu0 %v696_v37, %s3010_s15  ;;  %v720_v44 = vmul.f32 %v2750_v42, %v718_v43 }
 0x99f   :  { %722 = vrot.lane.b32.xlu1 %v720_v44, %s3010_s15 }
 0xa0f   :  { %v699_v46 = vpop.permute.xlu0 %698 }
 0xa10   :  { %v3335_v47 = vadd.f32 %v699_v46, %v691_v45 }
 0xa11   :  { %v723_v49 = vpop.permute.xlu1 %722 }
 0xa12   :  { %2751 = vtanh.f32 %v3335_v47  ;;  %v3339_v50 = vadd.f32 %v723_v49, %v715_v48 }
 0xa14   :  { %2753 = vtanh.f32 %v3339_v50 }
 0xa1f   :  { %v2752_v51 = vpop.eup %2751 }
 0xa20   :  { %704 = vrot.lane.b32.xlu0 %v2752_v51, %s3009_s3 }
 0xa21   :  { %v2754_v53 = vpop.eup %2753 }
 0xa22   :  { %728 = vrot.lane.b32.xlu1 %v2754_v53, %s3009_s3 }
 0xa92   :  { %v705_v54 = vpop.permute.xlu0 %704 }
 0xa93   :  { %v707_v52 = vmul.f32 %v2748_v40, %v705_v54 }
 0xa94   :  { %v729_v57 = vpop.permute.xlu1 %728 }
 0xa95   :  { %733 = vrot.lane.b32.xlu0 %v707_v52, %s3010_s15  ;;  %v731_v59 = vmul.f32 %v2750_v42, %v729_v57 }
 0xa97   :  { %737 = vrot.lane.b32.xlu1 %v731_v59, %s3009_s3 }
 0xb07   :  { %v3346_v56 = vpop.permute.xlu0 %733 }
 0xb09   :  { %v3348_v61 = vpop.permute.xlu1 %737 }
 0xb0a   :  { %v740_v55 = vsel %vm329_vm1, %v3346_v56, %v3348_v61 }
 0xb0b   :  { %2616 = vmatmul.mubr.msk.f32.vlgmr.msra.gmra.mxu1 %vm193_vm2, %v740_v55 }
 0xb0c   :  { %1035 = vmatpush1.msra.mxu1 %v3078_v3  ;;  %1082 = vmatprep.mubr.f32.mxu1 %v3008_v1 }
 0xb0d   :  { %1036 = vmatprep.subr.mxu1 %v3080_v4 }
 0xb0e   :  { %1037 = vmatpush1.msra.mxu1 %v3083_v5 }
 0xb0f   :  { %1038 = vmatprep.subr.mxu1 %v3089_v7 }
 0xb10   :  { %1039 = vmatpush1.msra.mxu1 %v3098_v10 }
 0xb11   :  { %1040 = vmatprep.subr.mxu1 %v3104_v12 }
 0xb12   :  { %1041 = vmatpush1.msra.mxu1 %v3110_v14 }
 0xb13   :  { %1042 = vmatprep.subr.mxu1 %v3114_v15 }
 0xb14   :  { %1043 = vmatpush1.msra.mxu1 %v3117_v16 }
 0xb15   :  { %1044 = vmatprep.subr.mxu1 %v3124_v18 }
 0xb16   :  { %1045 = vmatpush1.msra.mxu1 %v3128_v19 }
 0xb17   :  { %1046 = vmatprep.subr.mxu1 %v3133_v20 }
 0xb18   :  { %1047 = vmatpush1.msra.mxu1 %v3136_v21 }
 0xb19   :  { %1048 = vmatprep.subr.mxu1 %v3140_v22 }
 0xb1a   :  { %1049 = vmatpush1.msra.mxu1 %v3144_v23 }
 0xbcb   :  { %v810_v62 = vpop.f32.mrf.mxu1 }
 0xbcc   :  { %v815_v60 = vadd.f32 %v810_v62, %v3195_v35 }
 0xbcd   :  { %v812_v9 = vpop.f32.mrf.mxu1 }
 0xbce   :  { %2755 = vtanh.f32 %v815_v60  ;;  %v819_v11 = vadd.f32 %v817_v6, %v812_v9  ;;  %v2617_v29 = vmul.f32 -1.442695, %v815_v60 }
 0xbd0   :  { %2757 = vtanh.f32 %v819_v11  ;;  %v2618_v30 = vmul.f32 -1.442695, %v819_v11 }
 0xbd1   :  { %2759 = vpow2.f32 %v2617_v29 }
 0xbd2   :  { %2761 = vpow2.f32 %v2618_v30 }
 0xbdb   :  { %v2756_v13 = vpop.eup %2755 }
 0xbdc   :  { %829 = vrot.lane.b32.xlu0 %v2756_v13, %s3009_s3 }
 0xbdd   :  { %v2758_v27 = vpop.eup %2757 }
 0xbde   :  { %853 = vrot.lane.b32.xlu1 %v2758_v27, %s3009_s3  ;;  %v2760_v31 = vpop.eup %2759 }
 0xbdf   :  { %v2762_v32 = vpop.eup %2761  ;;  %v823_v34 = vadd.f32 1.0, %v2760_v31 }
 0xbe0   :  { %v847_v2 = vadd.f32 1.0, %v2762_v32 }
 0xbe1   :  { %2763 = vrcp.f32 %v823_v34 }
 0xbe2   :  { %2765 = vrcp.f32 %v847_v2 }
 0xbee   :  { %v2764_v36 = vpop.eup %2763 }
 0xbef   :  { %v2766_v40 = vpop.eup %2765  ;;  %v827_v42 = vmul.f32 %v2764_v36, %v3335_v47 }
 0xbf0   :  { %v851_v45 = vmul.f32 %v2766_v40, %v3339_v50 }
 0xc4e   :  { %v830_v38 = vpop.permute.xlu0 %829 }
 0xc4f   :  { %v832_v39 = vmul.f32 %v2764_v36, %v830_v38 }
 0xc50   :  { %v854_v41 = vpop.permute.xlu1 %853 }
 0xc51   :  { %834 = vrot.lane.b32.xlu0 %v832_v39, %s3010_s15  ;;  %v856_v37 = vmul.f32 %v2766_v40, %v854_v41 }
 0xc53   :  { %858 = vrot.lane.b32.xlu1 %v856_v37, %s3010_s15 }
 0xcc3   :  { %v835_v43 = vpop.permute.xlu0 %834 }
 0xcc4   :  { %v3377_v44 = vadd.f32 %v835_v43, %v827_v42  ;;  %v1089_v42 = vrot.slane %v3195_v35, 4 }
 0xcc5   :  { %v859_v46 = vpop.permute.xlu1 %858 }
 0xcc6   :  { %2767 = vtanh.f32 %v3377_v44  ;;  %v3381_v48 = vadd.f32 %v859_v46, %v851_v45  ;;  %v1092_v45 = vrot.slane %v3193_v33, 2 }
 0xcc8   :  { %2769 = vtanh.f32 %v3381_v48 }
 0xcd3   :  { %v2768_v49 = vpop.eup %2767 }
 0xcd4   :  { %840 = vrot.lane.b32.xlu0 %v2768_v49, %s3009_s3 }
 0xcd5   :  { %v2770_v51 = vpop.eup %2769 }
 0xcd6   :  { %864 = vrot.lane.b32.xlu1 %v2770_v51, %s3009_s3 }
 0xd46   :  { %v841_v53 = vpop.permute.xlu0 %840 }
 0xd47   :  { %v843_v47 = vmul.f32 %v2764_v36, %v841_v53 }
 0xd48   :  { %v865_v54 = vpop.permute.xlu1 %864 }
 0xd49   :  { %869 = vrot.lane.b32.xlu0 %v843_v47, %s3010_s15  ;;  %v867_v52 = vmul.f32 %v2766_v40, %v865_v54 }
 0xd4b   :  { %873 = vrot.lane.b32.xlu1 %v867_v52, %s3009_s3 }
 0xdbb   :  { %v3388_v50 = vpop.permute.xlu0 %869 }
 0xdbd   :  { %v3390_v57 = vpop.permute.xlu1 %873 }
 0xdbe   :  { %v876_v59 = vsel %vm329_vm1, %v3388_v50, %v3390_v57 }
 0xdbf   :  { %2619 = vmatmul.mubr.msk.f32.vlgmr.msra.gmra.mxu0 %vm193_vm2, %v876_v59 }
 0xdc0   :  { %1172 = vmatpush1.msra.mxu0 %v3078_v3  ;;  %1219 = vmatprep.mubr.f32.mxu0 %v3008_v1  ;;  %v952_v3 = vrot.slane %v3195_v35, 2 }
 0xdc1   :  { %1173 = vmatprep.subr.mxu0 %v3080_v4 }
 0xdc2   :  { %1174 = vmatpush1.msra.mxu0 %v3083_v5 }
 0xdc3   :  { %1175 = vmatprep.subr.mxu0 %v3089_v7  ;;  %v955_v7 = vrot.slane %v3193_v33, 4 }
 0xdc4   :  { %1176 = vmatpush1.msra.mxu0 %v3098_v10 }
 0xdc5   :  { %1177 = vmatprep.subr.mxu0 %v3104_v12 }
 0xdc6   :  { %1178 = vmatpush1.msra.mxu0 %v3110_v14 }
 0xdc7   :  { %1179 = vmatprep.subr.mxu0 %v3114_v15 }
 0xdc8   :  { %1180 = vmatpush1.msra.mxu0 %v3117_v16 }
 0xdc9   :  { %1181 = vmatprep.subr.mxu0 %v3124_v18 }
 0xdca   :  { %1182 = vmatpush1.msra.mxu0 %v3128_v19 }
 0xdcb   :  { %1183 = vmatprep.subr.mxu0 %v3133_v20 }
 0xdcc   :  { %1184 = vmatpush1.msra.mxu0 %v3136_v21 }
 0xdcd   :  { %1185 = vmatprep.subr.mxu0 %v3140_v22 }
 0xdce   :  { %1186 = vmatpush1.msra.mxu0 %v3144_v23 }
 0xe7f   :  { %v946_v4 = vpop.f32.mrf.mxu0 }
 0xe80   :  { %v954_v5 = vadd.f32 %v952_v3, %v946_v4 }
 0xe81   :  { %v948_v10 = vpop.f32.mrf.mxu0 }
 0xe82   :  { %2771 = vtanh.f32 %v954_v5  ;;  %v957_v12 = vadd.f32 %v955_v7, %v948_v10  ;;  %v2620_v16 = vmul.f32 -1.442695, %v954_v5 }
 0xe84   :  { %2773 = vtanh.f32 %v957_v12  ;;  %v2621_v18 = vmul.f32 -1.442695, %v957_v12 }
 0xe85   :  { %2775 = vpow2.f32 %v2620_v16 }
 0xe86   :  { %2777 = vpow2.f32 %v2621_v18 }
 0xe8f   :  { %v2772_v14 = vpop.eup %2771 }
 0xe90   :  { %967 = vrot.lane.b32.xlu0 %v2772_v14, %s3009_s3 }
 0xe91   :  { %v2774_v15 = vpop.eup %2773 }
 0xe92   :  { %991 = vrot.lane.b32.xlu1 %v2774_v15, %s3009_s3  ;;  %v2776_v19 = vpop.eup %2775 }
 0xe93   :  { %v2778_v20 = vpop.eup %2777  ;;  %v961_v21 = vadd.f32 1.0, %v2776_v19 }
 0xe94   :  { %v985_v22 = vadd.f32 1.0, %v2778_v20 }
 0xe95   :  { %2779 = vrcp.f32 %v961_v21 }
 0xe96   :  { %2781 = vrcp.f32 %v985_v22 }
 0xea2   :  { %v2780_v23 = vpop.eup %2779 }
 0xea3   :  { %v2782_v60 = vpop.eup %2781  ;;  %v965_v11 = vmul.f32 %v2780_v23, %v3377_v44 }
 0xea4   :  { %v989_v29 = vmul.f32 %v2782_v60, %v3381_v48 }
 0xf02   :  { %v968_v55 = vpop.permute.xlu0 %967 }
 0xf03   :  { %v970_v62 = vmul.f32 %v2780_v23, %v968_v55 }
 0xf04   :  { %v992_v6 = vpop.permute.xlu1 %991 }
 0xf05   :  { %972 = vrot.lane.b32.xlu0 %v970_v62, %s3010_s15  ;;  %v994_v9 = vmul.f32 %v2782_v60, %v992_v6 }
 0xf07   :  { %996 = vrot.lane.b32.xlu1 %v994_v9, %s3010_s15 }
 0xf77   :  { %v973_v13 = vpop.permute.xlu0 %972 }
 0xf78   :  { %v975_v27 = vadd.f32 %v973_v13, %v965_v11 }
 0xf79   :  { %v997_v30 = vpop.permute.xlu1 %996 }
 0xf7a   :  { %2783 = vtanh.f32 %v975_v27  ;;  %v999_v31 = vadd.f32 %v997_v30, %v989_v29 }
 0xf7c   :  { %2785 = vtanh.f32 %v999_v31 }
 0xf87   :  { %v2784_v32 = vpop.eup %2783 }
 0xf88   :  { %978 = vrot.lane.b32.xlu0 %v2784_v32, %s3009_s3 }
 0xf89   :  { %v2786_v34 = vpop.eup %2785 }
 0xf8a   :  { %1002 = vrot.lane.b32.xlu1 %v2786_v34, %s3009_s3 }
 0xffa   :  { %v979_v2 = vpop.permute.xlu0 %978 }
 0xffb   :  { %v981_v36 = vmul.f32 %v2780_v23, %v979_v2 }
 0xffc   :  { %v1003_v38 = vpop.permute.xlu1 %1002 }
 0xffd   :  { %1007 = vrot.lane.b32.xlu0 %v981_v36, %s3010_s15  ;;  %v1005_v39 = vmul.f32 %v2782_v60, %v1003_v38 }
 0xfff   :  { %1011 = vrot.lane.b32.xlu1 %v1005_v39, %s3009_s3 }
0x106f   :  { %v3424_v40 = vpop.permute.xlu0 %1007 }
0x1071   :  { %v3426_v41 = vpop.permute.xlu1 %1011 }
0x1072   :  { %v1014_v37 = vsel %vm329_vm1, %v3424_v40, %v3426_v41 }
0x1073   :  { %2622 = vmatmul.mubr.msk.f32.vlgmr.msra.gmra.mxu1 %vm193_vm2, %v1014_v37 }
0x1074   :  { %1419 = vmatprep.mubr.f32.mxu1 %v3008_v1 }
0x1133   :  { %v1084_v43 = vpop.f32.mrf.mxu1 }
0x1134   :  { %v1091_v44 = vadd.f32 %v1089_v42, %v1084_v43 }
0x1135   :  { %v1086_v46 = vpop.f32.mrf.mxu1 }
0x1136   :  { %2787 = vtanh.f32 %v1091_v44  ;;  %v1094_v48 = vadd.f32 %v1092_v45, %v1086_v46  ;;  %v2623_v53 = vmul.f32 -1.442695, %v1091_v44 }
0x1138   :  { %2789 = vtanh.f32 %v1094_v48  ;;  %v2624_v47 = vmul.f32 -1.442695, %v1094_v48 }
0x1139   :  { %2791 = vpow2.f32 %v2623_v53 }
0x113a   :  { %2793 = vpow2.f32 %v2624_v47 }
0x1143   :  { %v2788_v49 = vpop.eup %2787 }
0x1144   :  { %1104 = vrot.lane.b32.xlu0 %v2788_v49, %s3009_s3 }
0x1145   :  { %v2790_v51 = vpop.eup %2789 }
0x1146   :  { %1128 = vrot.lane.b32.xlu1 %v2790_v51, %s3009_s3  ;;  %v2792_v54 = vpop.eup %2791 }
0x1147   :  { %v2794_v52 = vpop.eup %2793  ;;  %v1098_v59 = vadd.f32 1.0, %v2792_v54 }
0x1148   :  { %v1122_v3 = vadd.f32 1.0, %v2794_v52 }
0x1149   :  { %2795 = vrcp.f32 %v1098_v59  ;;  %v1336_v59 = vld [vmem:[#allocation5 + $0x78] sm:$0xff] }
0x114a   :  { %2797 = vrcp.f32 %v1122_v3  ;;  %v1335_v3 = vld [vmem:[#allocation5 + $0x70] sm:$0xff]  ;;  %1371 = vmatprep.subr.mxu1 %v1336_v59 }
0x114b   :  { %1372 = vmatpush1.msra.mxu1 %v1335_v3 }
0x1156   :  { %v2796_v4 = vpop.eup %2795 }
0x1157   :  { %v2798_v10 = vpop.eup %2797  ;;  %v1102_v15 = vmul.f32 %v2796_v4, %v975_v27  ;;  %v1226_v27 = vrot.slane %v3195_v35, 6 }
0x1158   :  { %v1126_v19 = vmul.f32 %v2798_v10, %v999_v31 }
0x11b6   :  { %v1105_v5 = vpop.permute.xlu0 %1104 }
0x11b7   :  { %v1107_v7 = vmul.f32 %v2796_v4, %v1105_v5  ;;  %v3466_v5 = vld [vmem:[#allocation7 + $0x78] sm:$0xff] }
0x11b8   :  { %v1129_v12 = vpop.permute.xlu1 %1128  ;;  %1464 = vmatprep.subr.mxu0 %v3466_v5 }
0x11b9   :  { %1109 = vrot.lane.b32.xlu0 %v1107_v7, %s3010_s15  ;;  %v1131_v14 = vmul.f32 %v2798_v10, %v1129_v12  ;;  %v1333_v7 = vld [vmem:[#allocation5 + $0x60] sm:$0xff]  ;;  %v1332_v12 = vld [vmem:[#allocation5 + $0x58] sm:$0xff] }
0x11bb   :  { %1133 = vrot.lane.b32.xlu1 %v1131_v14, %s3010_s15  ;;  %v3471_v14 = vld [vmem:[#allocation7 + $0x68] sm:$0xff] }
0x122b   :  { %v1110_v16 = vpop.permute.xlu0 %1109 }
0x122c   :  { %v1112_v18 = vadd.f32 %v1110_v16, %v1102_v15  ;;  %v1331_v15 = vld [vmem:[#allocation5 + $0x50] sm:$0xff]  ;;  %v3474_v16 = vld [vmem:[#allocation7 + $0x60] sm:$0xff] }
0x122d   :  { %v1134_v20 = vpop.permute.xlu1 %1133 }
0x122e   :  { %2799 = vtanh.f32 %v1112_v18  ;;  %v1136_v21 = vadd.f32 %v1134_v20, %v1126_v19  ;;  %v1330_v19 = vld [vmem:[#allocation5 + $0x48] sm:$0xff]  ;;  %v3479_v20 = vld [vmem:[#allocation7 + $0x50] sm:$0xff] }
0x1230   :  { %2801 = vtanh.f32 %v1136_v21 }
0x123b   :  { %v2800_v22 = vpop.eup %2799 }
0x123c   :  { %1115 = vrot.lane.b32.xlu0 %v2800_v22, %s3009_s3  ;;  %v1328_v22 = vld [vmem:[#allocation5 + $0x38] sm:$0xff] }
0x123d   :  { %v2802_v23 = vpop.eup %2801 }
0x123e   :  { %1139 = vrot.lane.b32.xlu1 %v2802_v23, %s3009_s3  ;;  %v3483_v23 = vld [vmem:[#allocation7 + $0x48] sm:$0xff] }
0x12ae   :  { %v1116_v55 = vpop.permute.xlu0 %1115 }
0x12af   :  { %v1118_v62 = vmul.f32 %v2796_v4, %v1116_v55  ;;  %v1334_v4 = vld [vmem:[#allocation5 + $0x68] sm:$0xff] }
0x12b0   :  { %v1140_v60 = vpop.permute.xlu1 %1139  ;;  %1373 = vmatprep.subr.mxu1 %v1334_v4 }
0x12b1   :  { %1144 = vrot.lane.b32.xlu0 %v1118_v62, %s3010_s15  ;;  %v1142_v6 = vmul.f32 %v2798_v10, %v1140_v60  ;;  %v3468_v10 = vld [vmem:[#allocation7 + $0x70] sm:$0xff]  ;;  %1374 = vmatpush1.msra.mxu1 %v1333_v7  ;;  %v3486_v60 = vld [vmem:[#allocation7 + $0x40] sm:$0xff] }
0x12b2   :  { %1375 = vmatprep.subr.mxu1 %v1332_v12  ;;  %v1327_v62 = vld [vmem:[#allocation5 + $0x30] sm:$0xff] }
0x12b3   :  { %1148 = vrot.lane.b32.xlu1 %v1142_v6, %s3009_s3  ;;  %1376 = vmatpush1.msra.mxu1 %v1331_v15 }
0x12b4   :  { %1377 = vmatprep.subr.mxu1 %v1330_v19 }
0x1323   :  { %v3443_v9 = vpop.permute.xlu0 %1144 }
0x1325   :  { %v3445_v11 = vpop.permute.xlu1 %1148 }
0x1326   :  { %v1151_v13 = vsel %vm329_vm1, %v3443_v9, %v3445_v11 }
0x1327   :  { %2625 = vmatmul.mubr.msk.f32.vlgmr.msra.gmra.mxu0 %vm193_vm2, %v1151_v13  ;;  %v1326_v13 = vld [vmem:[#allocation5 + $0x28] sm:$0xff] }
0x1328   :  { %1512 = vmatprep.mubr.f32.mxu0 %v3008_v1  ;;  %1465 = vmatpush1.msra.mxu0 %v3468_v10 }
0x1329   :  { %1466 = vmatprep.subr.mxu0 %v3471_v14 }
0x132a   :  { %1467 = vmatpush1.msra.mxu0 %v3474_v16 }
0x13e7   :  { %v1221_v29 = vpop.f32.mrf.mxu0 }
0x13e8   :  { %v1228_v30 = vadd.f32 %v1226_v27, %v1221_v29  ;;  %v3492_v27 = vld [vmem:[#allocation7 + $0x38] sm:$0xff]  ;;  %v1325_v29 = vld [vmem:[#allocation5 + $0x20] sm:$0xff] }
0x13e9   :  { %v1223_v31 = vpop.f32.mrf.mxu0 }
0x13ea   :  { %2803 = vtanh.f32 %v1228_v30  ;;  %v1229_v32 = vadd.f32 %v1223_v31, %v3193_v33  ;;  %v2626_v36 = vmul.f32 -1.442695, %v1228_v30  ;;  %v3495_v30 = vld [vmem:[#allocation7 + $0x30] sm:$0xff]  ;;  %v1324_v31 = vld [vmem:[#allocation5 + $0x18] sm:$0xff] }
0x13ec   :  { %2805 = vtanh.f32 %v1229_v32  ;;  %v2627_v38 = vmul.f32 -1.442695, %v1229_v32  ;;  %v3498_v32 = vld [vmem:[#allocation7 + $0x28] sm:$0xff] }
0x13ed   :  { %2807 = vpow2.f32 %v2626_v36  ;;  %v1322_v36 = vld [vmem:[#allocation5 + $0x8] sm:$0xff] }
0x13ee   :  { %2809 = vpow2.f32 %v2627_v38  ;;  %v3504_v38 = vld [vmem:[#allocation7 + $0x18] sm:$0xff] }
0x13f7   :  { %v2804_v34 = vpop.eup %2803 }
0x13f8   :  { %1239 = vrot.lane.b32.xlu1 %v2804_v34, %s3009_s3  ;;  %v1323_v34 = vld [vmem:[#allocation5 + $0x10] sm:$0xff] }
0x13f9   :  { %v2806_v2 = vpop.eup %2805 }
0x13fa   :  { %1263 = vrot.lane.b32.xlu0 %v2806_v2, %s3009_s3  ;;  %v2808_v39 = vpop.eup %2807  ;;  %v3501_v2 = vld [vmem:[#allocation7 + $0x20] sm:$0xff] }
0x13fb   :  { %v2810_v37 = vpop.eup %2809  ;;  %v1233_v35 = vadd.f32 1.0, %v2808_v39  ;;  %v1321_v39 = vld [vmem:[#allocation5] sm:$0xff] }
0x13fc   :  { %v1257_v42 = vadd.f32 1.0, %v2810_v37  ;;  %v3507_v37 = vld [vmem:[#allocation7 + $0x10] sm:$0xff] }
0x13fd   :  { %2811 = vrcp.f32 %v1233_v35  ;;  %v3510_v35 = vld [vmem:[#allocation7 + $0x8] sm:$0xff] }
0x13fe   :  { %2813 = vrcp.f32 %v1257_v42  ;;  %v3513_v42 = vld [vmem:[#allocation7] sm:$0xff] }
0x140a   :  { %v3456_v43 = vpop.eup %2811 }
0x140b   :  { %v3459_v45 = vpop.eup %2813  ;;  %v1237_v49 = vmul.f32 %v3456_v43, %v1112_v18  ;;  %v3476_v18 = vld [vmem:[#allocation7 + $0x58] sm:$0xff] }
0x140c   :  { %v1261_v47 = vmul.f32 %v3459_v45, %v1136_v21  ;;  %v1329_v21 = vld [vmem:[#allocation5 + $0x40] sm:$0xff]  ;;  %1468 = vmatprep.subr.mxu0 %v3476_v18 }
0x140d   :  { %1469 = vmatpush1.msra.mxu0 %v3479_v20  ;;  %1378 = vmatpush1.msra.mxu1 %v1329_v21 }
0x140e   :  { %1379 = vmatprep.subr.mxu1 %v1328_v22  ;;  %1470 = vmatprep.subr.mxu0 %v3483_v23 }
0x140f   :  { %1380 = vmatpush1.msra.mxu1 %v1327_v62  ;;  %1471 = vmatpush1.msra.mxu0 %v3486_v60 }
0x1410   :  { %1381 = vmatprep.subr.mxu1 %v1326_v13  ;;  %1472 = vmatprep.subr.mxu0 %v3492_v27 }
0x1411   :  { %1382 = vmatpush1.msra.mxu1 %v1325_v29  ;;  %1473 = vmatpush1.msra.mxu0 %v3495_v30 }
0x1412   :  { %1383 = vmatprep.subr.mxu1 %v1324_v31  ;;  %1474 = vmatprep.subr.mxu0 %v3498_v32 }
0x1413   :  { %1384 = vmatpush1.msra.mxu1 %v1323_v34  ;;  %1475 = vmatpush1.msra.mxu0 %v3501_v2 }
0x1414   :  { %1385 = vmatprep.subr.mxu1 %v1322_v36  ;;  %1476 = vmatprep.subr.mxu0 %v3504_v38 }
0x1415   :  { %1386 = vmatpush1.msra.mxu1 %v1321_v39  ;;  %1477 = vmatpush1.msra.mxu0 %v3507_v37 }
0x1416   :  { %1478 = vmatprep.subr.mxu0 %v3510_v35  ;;  %1600 = vmatprep.subr.mxu1 %v3466_v5 }
0x1417   :  { %1479 = vmatpush1.msra.mxu0 %v3513_v42 }
0x1418   :  { %1513 = vmatmul.mubr.f32.vlgmr.msra.gmra.mxu0 %v3008_v1  ;;  %1738 = vmatprep.subr.mxu0 %v3466_v5 }
0x1419   :  { %1739 = vmatpush1.msra.mxu0 %v3468_v10  ;;  %1786 = vmatprep.mubr.f32.mxu0 %v3008_v1 }
0x141a   :  { %1740 = vmatprep.subr.mxu0 %v3471_v14 }
0x141b   :  { %1741 = vmatpush1.msra.mxu0 %v3474_v16 }
0x141c   :  { %1742 = vmatprep.subr.mxu0 %v3476_v18 }
0x141d   :  { %1743 = vmatpush1.msra.mxu0 %v3479_v20 }
0x141e   :  { %1744 = vmatprep.subr.mxu0 %v3483_v23 }
0x141f   :  { %1745 = vmatpush1.msra.mxu0 %v3486_v60 }
0x1420   :  { %1746 = vmatprep.subr.mxu0 %v3492_v27 }
0x1421   :  { %1747 = vmatpush1.msra.mxu0 %v3495_v30 }
0x1422   :  { %1748 = vmatprep.subr.mxu0 %v3498_v32 }
0x1423   :  { %1749 = vmatpush1.msra.mxu0 %v3501_v2 }
0x1424   :  { %1750 = vmatprep.subr.mxu0 %v3504_v38 }
0x1425   :  { %1751 = vmatpush1.msra.mxu0 %v3507_v37 }
0x1426   :  { %1752 = vmatprep.subr.mxu0 %v3510_v35 }
0x1427   :  { %1753 = vmatpush1.msra.mxu0 %v3513_v42 }
0x1428   :  { %2010 = vmatprep.subr.mxu0 %v3466_v5 }
0x146a   :  { %v1240_v33 = vpop.permute.xlu1 %1239 }
0x146b   :  { %v1242_v44 = vmul.f32 %v3456_v43, %v1240_v33 }
0x146c   :  { %v1264_v46 = vpop.permute.xlu0 %1263 }
0x146d   :  { %1244 = vrot.lane.b32.xlu1 %v1242_v44, %s3010_s15  ;;  %v1266_v48 = vmul.f32 %v3459_v45, %v1264_v46 }
0x146f   :  { %1268 = vrot.lane.b32.xlu0 %v1266_v48, %s3010_s15 }
0x14d8   :  { %v1514_v12 = vpop.f32.mrf.mxu0 }
0x14da   :  { %v1516_v25 = vpop.f32.mrf.mxu0 }
0x14df   :  { %v1245_v51 = vpop.permute.xlu1 %1244 }
0x14e0   :  { %v1247_v53 = vadd.f32 %v1245_v51, %v1237_v49  ;;  %v1285_v51 = vsel %vm329_vm1, %v3346_v56, %v3390_v57 }
0x14e1   :  { %v1269_v54 = vpop.permute.xlu0 %1268 }
0x14e2   :  { %2815 = vtanh.f32 %v1247_v53  ;;  %v1271_v52 = vadd.f32 %v1269_v54, %v1261_v47  ;;  %v1287_v53 = vsel %vm329_vm1, %v3424_v40, %v3305_v0  ;;  %v1288_v47 = vsel %vm329_vm1, %v3443_v9, %v3262_v8 }
0x14e3   :  { %v1304_v56 = vrot.slane %v1287_v53, 6  ;;  %v1307_v59 = vrot.slane %v1288_v47, 4  ;;  %v1286_v8 = vsel %vm329_vm1, %v3388_v50, %v3348_v61  ;;  %v1337_v61 = vld [vmem:[%s3857_s6] sm:$0x3] }
0x14e4   :  { %2817 = vtanh.f32 %v1271_v52  ;;  %v1342_v50 = vrot.slane %v1337_v61, %v85_v28  ;;  %v1346_v4 = vrot.slane %v1337_v61, %v89_v26 }
0x14ef   :  { %v2816_v55 = vpop.eup %2815 }
0x14f0   :  { %1250 = vrot.lane.b32.xlu1 %v2816_v55, %s3009_s3 }
0x14f1   :  { %v2818_v6 = vpop.eup %2817 }
0x14f2   :  { %1274 = vrot.lane.b32.xlu0 %v2818_v6, %s3009_s3 }
0x1562   :  { %v1251_v33 = vpop.permute.xlu1 %1250 }
0x1563   :  { %v1253_v44 = vmul.f32 %v3456_v43, %v1251_v33  ;;  %v1283_v43 = vsel %vm329_vm1, %v3260_v63, %v3445_v11 }
0x1564   :  { %v1275_v46 = vpop.permute.xlu0 %1274  ;;  %v1295_v54 = vrot.slane %v1283_v43, 6 }
0x1565   :  { %1290 = vrot.lane.b32.xlu1 %v1253_v44, %s3010_s15  ;;  %v1277_v48 = vmul.f32 %v3459_v45, %v1275_v46  ;;  %v1284_v45 = vsel %vm329_vm1, %v3303_v58, %v3426_v41  ;;  %v1301_v41 = vrot.slane %v1285_v51, 2 }
0x1566   :  { %v1298_v63 = vrot.slane %v1284_v45, 4 }
0x1567   :  { %1279 = vrot.lane.b32.xlu0 %v1277_v48, %s3009_s3 }
0x15d7   :  { %v1291_v49 = vpop.permute.xlu1 %1290 }
0x15d8   :  { %v1293_v11 = vsel %vm329_vm1, %v1291_v49, %v3219_v24  ;;  %v1318_v24 = vsel %vm1312_vm3, %v1286_v8, %v1304_v56 }
0x15d9   :  { %v1280_v52 = vpop.permute.xlu0 %1279  ;;  %v1310_v40 = vrot.slane %v1293_v11, 2 }
0x15da   :  { %v1282_v58 = vsel %vm329_vm1, %v3217_v17, %v1280_v52  ;;  %v1319_v17 = vsel %vm1314_vm4, %v1318_v24, %v1307_v59 }
0x15db   :  { %v1313_v57 = vsel %vm1312_vm3, %v1282_v58, %v1295_v54  ;;  %v1320_v9 = vsel %vm1316_vm5, %v1319_v17, %v1310_v40 }
0x15dc   :  { %v1315_v0 = vsel %vm1314_vm4, %v1313_v57, %v1298_v63 }
0x15dd   :  { %v1317_v3 = vsel %vm1316_vm5, %v1315_v0, %v1301_v41 }
0x15de   :  { %2628 = vmatmul.mubr.msk.f32.vlgmr.msra.gmra.mxu1 %vm193_vm2, %v1317_v3 }
0x15df   :  { %1425 = vmatprep.mubr.f32.mxu1 %v3008_v1  ;;  %1601 = vmatpush1.msra.mxu1 %v3468_v10 }
0x15e0   :  { %1602 = vmatprep.subr.mxu1 %v3471_v14 }
0x15e1   :  { %1603 = vmatpush1.msra.mxu1 %v3474_v16 }
0x15e2   :  { %2629 = vmatmul.mubr.msk.f32.gmra.mxu1 %vm193_vm2, %v1320_v9  ;;  %1604 = vmatprep.subr.mxu1 %v3476_v18 }
0x15e3   :  { %1605 = vmatpush1.msra.mxu1 %v3479_v20  ;;  %1648 = vmatprep.mubr.f32.mxu1 %v3008_v1 }
0x15e4   :  { %1606 = vmatprep.subr.mxu1 %v3483_v23 }
0x15e5   :  { %1607 = vmatpush1.msra.mxu1 %v3486_v60 }
0x15e6   :  { %1608 = vmatprep.subr.mxu1 %v3492_v27 }
0x15e7   :  { %1609 = vmatpush1.msra.mxu1 %v3495_v30 }
0x15e8   :  { %1610 = vmatprep.subr.mxu1 %v3498_v32 }
0x15e9   :  { %1611 = vmatpush1.msra.mxu1 %v3501_v2 }
0x15ea   :  { %1612 = vmatprep.subr.mxu1 %v3504_v38 }
0x15eb   :  { %1613 = vmatpush1.msra.mxu1 %v3507_v37 }
0x15ec   :  { %1614 = vmatprep.subr.mxu1 %v3510_v35 }
0x15ed   :  { %1615 = vmatpush1.msra.mxu1 %v3513_v42 }
0x15ee   :  { %1875 = vmatprep.subr.mxu1 %v3466_v5 }
0x169e   :  { %v1421_v7 = vpop.f32.mrf.mxu1 }
0x169f   :  { %v3589_v15 = vadd.f32 %v1421_v7, %v1342_v50 }
0x16a0   :  { %v1423_v19 = vpop.f32.mrf.mxu1 }
0x16a1   :  { %v3591_v21 = vadd.f32 %v1423_v19, %v1346_v4  ;;  %v1519_v22 = vadd.f32 %v1514_v12, %v3589_v15  ;;  %v1656_v17 = vrot.slane %v3589_v15, 2 }
0x16a2   :  { %v1427_v55 = vpop.f32.mrf.mxu1 }
0x16a3   :  { %2819 = vtanh.f32 %v1519_v22  ;;  %v3594_v62 = vadd.f32 %v1427_v55, %v1342_v50  ;;  %v2630_v34 = vmul.f32 -1.442695, %v1519_v22 }
0x16a4   :  { %v1429_v6 = vpop.f32.mrf.mxu1 }
0x16a5   :  { %v3596_v13 = vadd.f32 %v1429_v6, %v1346_v4 }
0x16a7   :  { %v1521_v28 = vrot.slane %v3596_v13, 6  ;;  %v1659_v50 = vrot.slane %v3596_v13, 4 }
0x16a9   :  { %v1523_v26 = vadd.f32 %v1521_v28, %v1516_v25 }
0x16ab   :  { %2821 = vtanh.f32 %v1523_v26  ;;  %v2631_v36 = vmul.f32 -1.442695, %v1523_v26 }
0x16ac   :  { %2823 = vpow2.f32 %v2630_v34 }
0x16ad   :  { %2825 = vpow2.f32 %v2631_v36 }
0x16b0   :  { %v2820_v29 = vpop.eup %2819 }
0x16b1   :  { %1533 = vrot.lane.b32.xlu0 %v2820_v29, %s3009_s3 }
0x16b8   :  { %v2822_v31 = vpop.eup %2821 }
0x16b9   :  { %1557 = vrot.lane.b32.xlu1 %v2822_v31, %s3009_s3  ;;  %v2824_v39 = vpop.eup %2823 }
0x16ba   :  { %v1527_v33 = vadd.f32 1.0, %v2824_v39  ;;  %v2826_v44 = vpop.eup %2825 }
0x16bb   :  { %v1551_v46 = vadd.f32 1.0, %v2826_v44 }
0x16bc   :  { %2827 = vrcp.f32 %v1527_v33 }
0x16bd   :  { %2829 = vrcp.f32 %v1551_v46 }
0x16c9   :  { %v2828_v48 = vpop.eup %2827 }
0x16ca   :  { %v2830_v49 = vpop.eup %2829  ;;  %v1531_v47 = vmul.f32 0.0, %v2828_v48 }
0x16cb   :  { %v1555_v63 = vmul.f32 0.0, %v2830_v49 }
0x1723   :  { %v1534_v43 = vpop.permute.xlu0 %1533 }
0x1724   :  { %v1536_v45 = vmul.f32 %v2828_v48, %v1534_v43 }
0x1726   :  { %1538 = vrot.lane.b32.xlu0 %v1536_v45, %s3010_s15 }
0x172b   :  { %v1558_v51 = vpop.permute.xlu1 %1557 }
0x172c   :  { %v1560_v53 = vmul.f32 %v2830_v49, %v1558_v51 }
0x172e   :  { %1562 = vrot.lane.b32.xlu1 %v1560_v53, %s3010_s15 }
0x1798   :  { %v1539_v54 = vpop.permute.xlu0 %1538 }
0x1799   :  { %v3603_v52 = vadd.f32 %v1539_v54, %v1531_v47 }
0x179b   :  { %2831 = vtanh.f32 %v3603_v52 }
0x17a0   :  { %v1563_v11 = vpop.permute.xlu1 %1562 }
0x17a1   :  { %v3606_v58 = vadd.f32 %v1563_v11, %v1555_v63 }
0x17a3   :  { %2833 = vtanh.f32 %v3606_v58 }
0x17a8   :  { %v2832_v41 = vpop.eup %2831 }
0x17a9   :  { %1544 = vrot.lane.b32.xlu0 %v2832_v41, %s3009_s3 }
0x17b0   :  { %v2834_v56 = vpop.eup %2833 }
0x17b1   :  { %1568 = vrot.lane.b32.xlu1 %v2834_v56, %s3009_s3  ;;  %v1793_v56 = vrot.slane %v3589_v15, 4 }
0x181b   :  { %v1545_v57 = vpop.permute.xlu0 %1544 }
0x181c   :  { %v1547_v59 = vmul.f32 %v2828_v48, %v1545_v57 }
0x181e   :  { %1573 = vrot.lane.b32.xlu0 %v1547_v59, %s3010_s15 }
0x1823   :  { %v1569_v0 = vpop.permute.xlu1 %1568 }
0x1824   :  { %v1571_v40 = vmul.f32 %v2830_v49, %v1569_v0  ;;  %v1796_v0 = vrot.slane %v3596_v13, 2 }
0x1826   :  { %1577 = vrot.lane.b32.xlu1 %v1571_v40, %s3009_s3 }
0x1890   :  { %v1574_v3 = vpop.permute.xlu0 %1573 }
0x1898   :  { %v3613_v8 = vpop.permute.xlu1 %1577 }
0x1899   :  { %v1580_v24 = vsel %vm329_vm1, %v1574_v3, %v3613_v8 }
0x189a   :  { %2632 = vmatmul.mubr.msk.f32.vlgmr.msra.gmra.mxu1 %vm193_vm2, %v1580_v24 }
0x189b   :  { %1876 = vmatpush1.msra.mxu1 %v3468_v10  ;;  %1923 = vmatprep.mubr.f32.mxu1 %v3008_v1 }
0x189c   :  { %1877 = vmatprep.subr.mxu1 %v3471_v14 }
0x189d   :  { %1878 = vmatpush1.msra.mxu1 %v3474_v16 }
0x189e   :  { %1879 = vmatprep.subr.mxu1 %v3476_v18 }
0x189f   :  { %1880 = vmatpush1.msra.mxu1 %v3479_v20 }
0x18a0   :  { %1881 = vmatprep.subr.mxu1 %v3483_v23 }
0x18a1   :  { %1882 = vmatpush1.msra.mxu1 %v3486_v60 }
0x18a2   :  { %1883 = vmatprep.subr.mxu1 %v3492_v27 }
0x18a3   :  { %1884 = vmatpush1.msra.mxu1 %v3495_v30 }
0x18a4   :  { %1885 = vmatprep.subr.mxu1 %v3498_v32 }
0x18a5   :  { %1886 = vmatpush1.msra.mxu1 %v3501_v2 }
0x18a6   :  { %1887 = vmatprep.subr.mxu1 %v3504_v38 }
0x18a7   :  { %1888 = vmatpush1.msra.mxu1 %v3507_v37 }
0x18a8   :  { %1889 = vmatprep.subr.mxu1 %v3510_v35 }
0x18a9   :  { %1890 = vmatpush1.msra.mxu1 %v3513_v42 }
0x18aa   :  { %2146 = vmatprep.subr.mxu1 %v3466_v5 }
0x195a   :  { %v1650_v9 = vpop.f32.mrf.mxu1 }
0x195b   :  { %v1658_v61 = vadd.f32 %v1656_v17, %v1650_v9 }
0x195c   :  { %v1652_v4 = vpop.f32.mrf.mxu1 }
0x195d   :  { %2835 = vtanh.f32 %v1658_v61  ;;  %v1661_v7 = vadd.f32 %v1659_v50, %v1652_v4  ;;  %v2633_v22 = vmul.f32 -1.442695, %v1658_v61 }
0x195f   :  { %2837 = vtanh.f32 %v1661_v7  ;;  %v2634_v55 = vmul.f32 -1.442695, %v1661_v7 }
0x1960   :  { %2839 = vpow2.f32 %v2633_v22 }
0x1961   :  { %2841 = vpow2.f32 %v2634_v55 }
0x196a   :  { %v2836_v12 = vpop.eup %2835 }
0x196b   :  { %1671 = vrot.lane.b32.xlu0 %v2836_v12, %s3009_s3 }
0x196c   :  { %v2838_v19 = vpop.eup %2837 }
0x196d   :  { %1695 = vrot.lane.b32.xlu1 %v2838_v19, %s3009_s3  ;;  %v2840_v6 = vpop.eup %2839 }
0x196e   :  { %v2842_v28 = vpop.eup %2841  ;;  %v1665_v25 = vadd.f32 1.0, %v2840_v6 }
0x196f   :  { %v1689_v26 = vadd.f32 1.0, %v2842_v28 }
0x1970   :  { %2843 = vrcp.f32 %v1665_v25 }
0x1971   :  { %2845 = vrcp.f32 %v1689_v26 }
0x197d   :  { %v2844_v29 = vpop.eup %2843 }
0x197e   :  { %v2846_v36 = vpop.eup %2845  ;;  %v1669_v44 = vmul.f32 %v2844_v29, %v3603_v52 }
0x197f   :  { %v1693_v43 = vmul.f32 %v2846_v36, %v3606_v58 }
0x19dd   :  { %v1672_v31 = vpop.permute.xlu0 %1671 }
0x19de   :  { %v1674_v34 = vmul.f32 %v2844_v29, %v1672_v31 }
0x19df   :  { %v1696_v39 = vpop.permute.xlu1 %1695 }
0x19e0   :  { %1676 = vrot.lane.b32.xlu0 %v1674_v34, %s3010_s15  ;;  %v1698_v33 = vmul.f32 %v2846_v36, %v1696_v39 }
0x19e2   :  { %1700 = vrot.lane.b32.xlu1 %v1698_v33, %s3010_s15 }
0x1a52   :  { %v1677_v46 = vpop.permute.xlu0 %1676 }
0x1a53   :  { %v3642_v48 = vadd.f32 %v1677_v46, %v1669_v44 }
0x1a54   :  { %v1701_v45 = vpop.permute.xlu1 %1700 }
0x1a55   :  { %2847 = vtanh.f32 %v3642_v48  ;;  %v3646_v49 = vadd.f32 %v1701_v45, %v1693_v43 }
0x1a57   :  { %2849 = vtanh.f32 %v3646_v49 }
0x1a62   :  { %v2848_v51 = vpop.eup %2847 }
0x1a63   :  { %1682 = vrot.lane.b32.xlu0 %v2848_v51, %s3009_s3 }
0x1a64   :  { %v2850_v53 = vpop.eup %2849 }
0x1a65   :  { %1706 = vrot.lane.b32.xlu1 %v2850_v53, %s3009_s3 }
0x1ad5   :  { %v1683_v47 = vpop.permute.xlu0 %1682 }
0x1ad6   :  { %v1685_v54 = vmul.f32 %v2844_v29, %v1683_v47  ;;  %v1930_v47 = vrot.slane %v3589_v15, 6 }
0x1ad7   :  { %v1707_v52 = vpop.permute.xlu1 %1706 }
0x1ad8   :  { %1711 = vrot.lane.b32.xlu0 %v1685_v54, %s3010_s15  ;;  %v1709_v63 = vmul.f32 %v2846_v36, %v1707_v52 }
0x1ada   :  { %1715 = vrot.lane.b32.xlu1 %v1709_v63, %s3009_s3 }
0x1b4a   :  { %v1712_v11 = vpop.permute.xlu0 %1711 }
0x1b4c   :  { %v1716_v58 = vpop.permute.xlu1 %1715 }
0x1b4d   :  { %v1718_v41 = vsel %vm329_vm1, %v1712_v11, %v1716_v58 }
0x1b4e   :  { %2635 = vmatmul.mubr.msk.f32.vlgmr.msra.gmra.mxu0 %vm193_vm2, %v1718_v41 }
0x1b4f   :  { %2011 = vmatpush1.msra.mxu0 %v3468_v10  ;;  %2058 = vmatprep.mubr.f32.mxu0 %v3008_v1 }
0x1b50   :  { %2012 = vmatprep.subr.mxu0 %v3471_v14 }
0x1b51   :  { %2013 = vmatpush1.msra.mxu0 %v3474_v16 }
0x1b52   :  { %2014 = vmatprep.subr.mxu0 %v3476_v18 }
0x1b53   :  { %2015 = vmatpush1.msra.mxu0 %v3479_v20 }
0x1b54   :  { %2016 = vmatprep.subr.mxu0 %v3483_v23 }
0x1b55   :  { %2017 = vmatpush1.msra.mxu0 %v3486_v60 }
0x1b56   :  { %2018 = vmatprep.subr.mxu0 %v3492_v27 }
0x1b57   :  { %2019 = vmatpush1.msra.mxu0 %v3495_v30 }
0x1b58   :  { %2020 = vmatprep.subr.mxu0 %v3498_v32 }
0x1b59   :  { %2021 = vmatpush1.msra.mxu0 %v3501_v2 }
0x1b5a   :  { %2022 = vmatprep.subr.mxu0 %v3504_v38 }
0x1b5b   :  { %2023 = vmatpush1.msra.mxu0 %v3507_v37 }
0x1b5c   :  { %2024 = vmatprep.subr.mxu0 %v3510_v35 }
0x1b5d   :  { %2025 = vmatpush1.msra.mxu0 %v3513_v42 }
0x1b5e   :  { %2284 = vmatprep.subr.mxu0 %v3466_v5 }
0x1c0e   :  { %v1788_v57 = vpop.f32.mrf.mxu0 }
0x1c0f   :  { %v1795_v59 = vadd.f32 %v1793_v56, %v1788_v57 }
0x1c10   :  { %v1790_v40 = vpop.f32.mrf.mxu0 }
0x1c11   :  { %2851 = vtanh.f32 %v1795_v59  ;;  %v1798_v3 = vadd.f32 %v1796_v0, %v1790_v40  ;;  %v2636_v9 = vmul.f32 -1.442695, %v1795_v59 }
0x1c13   :  { %2853 = vtanh.f32 %v1798_v3  ;;  %v2637_v61 = vmul.f32 -1.442695, %v1798_v3 }
0x1c14   :  { %2855 = vpow2.f32 %v2636_v9 }
0x1c15   :  { %2857 = vpow2.f32 %v2637_v61 }
0x1c1e   :  { %v2852_v24 = vpop.eup %2851 }
0x1c1f   :  { %1808 = vrot.lane.b32.xlu0 %v2852_v24, %s3009_s3 }
0x1c20   :  { %v2854_v17 = vpop.eup %2853 }
0x1c21   :  { %1832 = vrot.lane.b32.xlu1 %v2854_v17, %s3009_s3  ;;  %v2856_v50 = vpop.eup %2855 }
0x1c22   :  { %v2858_v4 = vpop.eup %2857  ;;  %v1802_v7 = vadd.f32 1.0, %v2856_v50 }
0x1c23   :  { %v1826_v12 = vadd.f32 1.0, %v2858_v4 }
0x1c24   :  { %2859 = vrcp.f32 %v1802_v7 }
0x1c25   :  { %2861 = vrcp.f32 %v1826_v12 }
0x1c31   :  { %v2860_v19 = vpop.eup %2859 }
0x1c32   :  { %v2862_v6 = vpop.eup %2861  ;;  %v1806_v26 = vmul.f32 %v2860_v19, %v3642_v48 }
0x1c33   :  { %v1830_v34 = vmul.f32 %v2862_v6, %v3646_v49 }
0x1c91   :  { %v1809_v22 = vpop.permute.xlu0 %1808 }
0x1c92   :  { %v1811_v55 = vmul.f32 %v2860_v19, %v1809_v22 }
0x1c93   :  { %v1833_v28 = vpop.permute.xlu1 %1832 }
0x1c94   :  { %1813 = vrot.lane.b32.xlu0 %v1811_v55, %s3010_s15  ;;  %v1835_v25 = vmul.f32 %v2862_v6, %v1833_v28 }
0x1c96   :  { %1837 = vrot.lane.b32.xlu1 %v1835_v25, %s3010_s15 }
0x1d06   :  { %v1814_v29 = vpop.permute.xlu0 %1813 }
0x1d07   :  { %v3679_v31 = vadd.f32 %v1814_v29, %v1806_v26 }
0x1d08   :  { %v1838_v36 = vpop.permute.xlu1 %1837 }
0x1d09   :  { %2863 = vtanh.f32 %v3679_v31  ;;  %v3683_v39 = vadd.f32 %v1838_v36, %v1830_v34 }
0x1d0b   :  { %2865 = vtanh.f32 %v3683_v39 }
0x1d16   :  { %v2864_v33 = vpop.eup %2863 }
0x1d17   :  { %1819 = vrot.lane.b32.xlu0 %v2864_v33, %s3009_s3  ;;  %v2067_v33 = vrot.slane %v3591_v21, 6 }
0x1d18   :  { %v2866_v44 = vpop.eup %2865 }
0x1d19   :  { %1843 = vrot.lane.b32.xlu1 %v2866_v44, %s3009_s3 }
0x1d89   :  { %v1820_v46 = vpop.permute.xlu0 %1819 }
0x1d8a   :  { %v1822_v48 = vmul.f32 %v2860_v19, %v1820_v46 }
0x1d8b   :  { %v1844_v43 = vpop.permute.xlu1 %1843 }
0x1d8c   :  { %1848 = vrot.lane.b32.xlu0 %v1822_v48, %s3010_s15  ;;  %v1846_v45 = vmul.f32 %v2862_v6, %v1844_v43 }
0x1d8e   :  { %1852 = vrot.lane.b32.xlu1 %v1846_v45, %s3009_s3 }
0x1dfe   :  { %v1849_v49 = vpop.permute.xlu0 %1848 }
0x1e00   :  { %v1853_v51 = vpop.permute.xlu1 %1852 }
0x1e01   :  { %v1855_v53 = vsel %vm329_vm1, %v1849_v49, %v1853_v51 }
0x1e02   :  { %2638 = vmatmul.mubr.msk.f32.vlgmr.msra.gmra.mxu1 %vm193_vm2, %v1855_v53 }
0x1e03   :  { %2147 = vmatpush1.msra.mxu1 %v3468_v10  ;;  %2194 = vmatprep.mubr.f32.mxu1 %v3008_v1 }
0x1e04   :  { %2148 = vmatprep.subr.mxu1 %v3471_v14 }
0x1e05   :  { %2149 = vmatpush1.msra.mxu1 %v3474_v16 }
0x1e06   :  { %2150 = vmatprep.subr.mxu1 %v3476_v18 }
0x1e07   :  { %2151 = vmatpush1.msra.mxu1 %v3479_v20 }
0x1e08   :  { %2152 = vmatprep.subr.mxu1 %v3483_v23 }
0x1e09   :  { %2153 = vmatpush1.msra.mxu1 %v3486_v60 }
0x1e0a   :  { %2154 = vmatprep.subr.mxu1 %v3492_v27 }
0x1e0b   :  { %2155 = vmatpush1.msra.mxu1 %v3495_v30 }
0x1e0c   :  { %2156 = vmatprep.subr.mxu1 %v3498_v32 }
0x1e0d   :  { %2157 = vmatpush1.msra.mxu1 %v3501_v2 }
0x1e0e   :  { %2158 = vmatprep.subr.mxu1 %v3504_v38 }
0x1e0f   :  { %2159 = vmatpush1.msra.mxu1 %v3507_v37 }
0x1e10   :  { %2160 = vmatprep.subr.mxu1 %v3510_v35 }
0x1e11   :  { %2161 = vmatpush1.msra.mxu1 %v3513_v42 }
0x1e12   :  { %2421 = vmatprep.subr.mxu1 %v3466_v5 }
0x1ec2   :  { %v1925_v54 = vpop.f32.mrf.mxu1 }
0x1ec3   :  { %v1932_v52 = vadd.f32 %v1930_v47, %v1925_v54 }
0x1ec4   :  { %v1927_v63 = vpop.f32.mrf.mxu1 }
0x1ec5   :  { %2867 = vtanh.f32 %v1932_v52  ;;  %v1933_v11 = vadd.f32 %v1927_v63, %v3596_v13  ;;  %v2639_v56 = vmul.f32 -1.442695, %v1932_v52 }
0x1ec7   :  { %2869 = vtanh.f32 %v1933_v11  ;;  %v2640_v57 = vmul.f32 -1.442695, %v1933_v11 }
0x1ec8   :  { %2871 = vpow2.f32 %v2639_v56 }
0x1ec9   :  { %2873 = vpow2.f32 %v2640_v57 }
0x1ed2   :  { %v2868_v58 = vpop.eup %2867 }
0x1ed3   :  { %1943 = vrot.lane.b32.xlu0 %v2868_v58, %s3009_s3 }
0x1ed4   :  { %v2870_v41 = vpop.eup %2869 }
0x1ed5   :  { %1967 = vrot.lane.b32.xlu1 %v2870_v41, %s3009_s3  ;;  %v2872_v5 = vpop.eup %2871 }
0x1ed6   :  { %v2874_v59 = vpop.eup %2873  ;;  %v1937_v15 = vadd.f32 1.0, %v2872_v5 }
0x1ed7   :  { %v1961_v0 = vadd.f32 1.0, %v2874_v59 }
0x1ed8   :  { %2875 = vrcp.f32 %v1937_v15 }
0x1ed9   :  { %2877 = vrcp.f32 %v1961_v0 }
0x1ee5   :  { %v2876_v40 = vpop.eup %2875 }
0x1ee6   :  { %v2878_v24 = vpop.eup %2877  ;;  %v1941_v61 = vmul.f32 %v2876_v40, %v3679_v31 }
0x1ee7   :  { %v1965_v7 = vmul.f32 %v2878_v24, %v3683_v39 }
0x1f45   :  { %v1944_v3 = vpop.permute.xlu0 %1943 }
0x1f46   :  { %v1946_v13 = vmul.f32 %v2876_v40, %v1944_v3 }
0x1f47   :  { %v1968_v17 = vpop.permute.xlu1 %1967 }
0x1f48   :  { %1948 = vrot.lane.b32.xlu0 %v1946_v13, %s3010_s15  ;;  %v1970_v9 = vmul.f32 %v2878_v24, %v1968_v17 }
0x1f4a   :  { %1972 = vrot.lane.b32.xlu1 %v1970_v9, %s3010_s15 }
0x1fba   :  { %v1949_v50 = vpop.permute.xlu0 %1948 }
0x1fbb   :  { %v3716_v4 = vadd.f32 %v1949_v50, %v1941_v61 }
0x1fbc   :  { %v1973_v12 = vpop.permute.xlu1 %1972 }
0x1fbd   :  { %2879 = vtanh.f32 %v3716_v4  ;;  %v3720_v19 = vadd.f32 %v1973_v12, %v1965_v7 }
0x1fbf   :  { %2881 = vtanh.f32 %v3720_v19 }
0x1fca   :  { %v2880_v22 = vpop.eup %2879 }
0x1fcb   :  { %1954 = vrot.lane.b32.xlu0 %v2880_v22, %s3009_s3 }
0x1fcc   :  { %v2882_v55 = vpop.eup %2881 }
0x1fcd   :  { %1978 = vrot.lane.b32.xlu1 %v2882_v55, %s3009_s3 }
0x203d   :  { %v1955_v6 = vpop.permute.xlu0 %1954 }
0x203e   :  { %v1957_v28 = vmul.f32 %v2876_v40, %v1955_v6 }
0x203f   :  { %v1979_v25 = vpop.permute.xlu1 %1978 }
0x2040   :  { %1983 = vrot.lane.b32.xlu0 %v1957_v28, %s3010_s15  ;;  %v1981_v26 = vmul.f32 %v2878_v24, %v1979_v25 }
0x2042   :  { %1987 = vrot.lane.b32.xlu1 %v1981_v26, %s3009_s3 }
0x20b2   :  { %v1984_v29 = vpop.permute.xlu0 %1983 }
0x20b4   :  { %v1988_v31 = vpop.permute.xlu1 %1987 }
0x20b5   :  { %v1990_v34 = vsel %vm329_vm1, %v1984_v29, %v1988_v31 }
0x20b6   :  { %2641 = vmatmul.mubr.msk.f32.vlgmr.msra.gmra.mxu0 %vm193_vm2, %v1990_v34 }
0x20b7   :  { %2285 = vmatpush1.msra.mxu0 %v3468_v10  ;;  %2332 = vmatprep.mubr.f32.mxu0 %v3008_v1 }
0x20b8   :  { %2286 = vmatprep.subr.mxu0 %v3471_v14 }
0x20b9   :  { %2287 = vmatpush1.msra.mxu0 %v3474_v16 }
0x20ba   :  { %2288 = vmatprep.subr.mxu0 %v3476_v18 }
0x20bb   :  { %2289 = vmatpush1.msra.mxu0 %v3479_v20 }
0x20bc   :  { %2290 = vmatprep.subr.mxu0 %v3483_v23 }
0x20bd   :  { %2291 = vmatpush1.msra.mxu0 %v3486_v60 }
0x20be   :  { %2292 = vmatprep.subr.mxu0 %v3492_v27 }
0x20bf   :  { %2293 = vmatpush1.msra.mxu0 %v3495_v30 }
0x20c0   :  { %2294 = vmatprep.subr.mxu0 %v3498_v32 }
0x20c1   :  { %2295 = vmatpush1.msra.mxu0 %v3501_v2 }
0x20c2   :  { %2296 = vmatprep.subr.mxu0 %v3504_v38 }
0x20c3   :  { %2297 = vmatpush1.msra.mxu0 %v3507_v37 }
0x20c4   :  { %2298 = vmatprep.subr.mxu0 %v3510_v35 }
0x20c5   :  { %2299 = vmatpush1.msra.mxu0 %v3513_v42 }
0x20c6   :  { %2663 = vmatprep.subr.mxu0 %v3008_v1 }
0x2176   :  { %v2060_v36 = vpop.f32.mrf.mxu0 }
0x2177   :  { %v2065_v39 = vadd.f32 %v2060_v36, %v3594_v62 }
0x2178   :  { %v2062_v44 = vpop.f32.mrf.mxu0 }
0x2179   :  { %2883 = vtanh.f32 %v2065_v39  ;;  %v2069_v46 = vadd.f32 %v2067_v33, %v2062_v44  ;;  %v2642_v45 = vmul.f32 -1.442695, %v2065_v39 }
0x217b   :  { %2885 = vtanh.f32 %v2069_v46  ;;  %v2643_v49 = vmul.f32 -1.442695, %v2069_v46 }
0x217c   :  { %2887 = vpow2.f32 %v2642_v45 }
0x217d   :  { %2889 = vpow2.f32 %v2643_v49 }
0x2186   :  { %v2884_v48 = vpop.eup %2883 }
0x2187   :  { %2079 = vrot.lane.b32.xlu0 %v2884_v48, %s3009_s3 }
0x2188   :  { %v2886_v43 = vpop.eup %2885 }
0x2189   :  { %2103 = vrot.lane.b32.xlu1 %v2886_v43, %s3009_s3  ;;  %v2888_v51 = vpop.eup %2887 }
0x218a   :  { %v2890_v53 = vpop.eup %2889  ;;  %v2073_v47 = vadd.f32 1.0, %v2888_v51  ;;  %v2339_v51 = vrot.slane %v3594_v62, 4 }
0x218b   :  { %v2097_v54 = vadd.f32 1.0, %v2890_v53 }
0x218c   :  { %2891 = vrcp.f32 %v2073_v47 }
0x218d   :  { %2893 = vrcp.f32 %v2097_v54  ;;  %v2342_v54 = vrot.slane %v3591_v21, 2 }
0x2199   :  { %v2892_v52 = vpop.eup %2891 }
0x219a   :  { %v2894_v58 = vpop.eup %2893  ;;  %v2077_v57 = vmul.f32 %v2892_v52, %v3716_v4 }
0x219b   :  { %v2101_v15 = vmul.f32 %v2894_v58, %v3720_v19 }
0x21f9   :  { %v2080_v63 = vpop.permute.xlu0 %2079 }
0x21fa   :  { %v2082_v11 = vmul.f32 %v2892_v52, %v2080_v63 }
0x21fb   :  { %v2104_v41 = vpop.permute.xlu1 %2103 }
0x21fc   :  { %2084 = vrot.lane.b32.xlu0 %v2082_v11, %s3010_s15  ;;  %v2106_v56 = vmul.f32 %v2894_v58, %v2104_v41 }
0x21fe   :  { %2108 = vrot.lane.b32.xlu1 %v2106_v56, %s3010_s15 }
0x226e   :  { %v2085_v5 = vpop.permute.xlu0 %2084 }
0x226f   :  { %v3753_v59 = vadd.f32 %v2085_v5, %v2077_v57 }
0x2270   :  { %v2109_v0 = vpop.permute.xlu1 %2108 }
0x2271   :  { %2895 = vtanh.f32 %v3753_v59  ;;  %v3757_v40 = vadd.f32 %v2109_v0, %v2101_v15 }
0x2273   :  { %2897 = vtanh.f32 %v3757_v40 }
0x227e   :  { %v2896_v3 = vpop.eup %2895 }
0x227f   :  { %2090 = vrot.lane.b32.xlu0 %v2896_v3, %s3009_s3 }
0x2280   :  { %v2898_v13 = vpop.eup %2897 }
0x2281   :  { %2114 = vrot.lane.b32.xlu1 %v2898_v13, %s3009_s3 }
0x22f1   :  { %v2091_v24 = vpop.permute.xlu0 %2090 }
0x22f2   :  { %v2093_v17 = vmul.f32 %v2892_v52, %v2091_v24 }
0x22f3   :  { %v2115_v9 = vpop.permute.xlu1 %2114 }
0x22f4   :  { %2119 = vrot.lane.b32.xlu0 %v2093_v17, %s3010_s15  ;;  %v2117_v61 = vmul.f32 %v2894_v58, %v2115_v9 }
0x22f6   :  { %2123 = vrot.lane.b32.xlu1 %v2117_v61, %s3009_s3 }
0x2366   :  { %v2120_v50 = vpop.permute.xlu0 %2119 }
0x2368   :  { %v2124_v4 = vpop.permute.xlu1 %2123 }
0x2369   :  { %v2126_v7 = vsel %vm329_vm1, %v2120_v50, %v2124_v4 }
0x236a   :  { %2644 = vmatmul.mubr.msk.f32.vlgmr.msra.gmra.mxu1 %vm193_vm2, %v2126_v7 }
0x236b   :  { %2422 = vmatpush1.msra.mxu1 %v3468_v10  ;;  %2469 = vmatprep.mubr.f32.mxu1 %v3008_v1  ;;  %v2202_v10 = vrot.slane %v3594_v62, 2 }
0x236c   :  { %2423 = vmatprep.subr.mxu1 %v3471_v14 }
0x236d   :  { %2424 = vmatpush1.msra.mxu1 %v3474_v16 }
0x236e   :  { %2425 = vmatprep.subr.mxu1 %v3476_v18  ;;  %v2205_v18 = vrot.slane %v3591_v21, 4 }
0x236f   :  { %2426 = vmatpush1.msra.mxu1 %v3479_v20 }
0x2370   :  { %2427 = vmatprep.subr.mxu1 %v3483_v23 }
0x2371   :  { %2428 = vmatpush1.msra.mxu1 %v3486_v60 }
0x2372   :  { %2429 = vmatprep.subr.mxu1 %v3492_v27 }
0x2373   :  { %2430 = vmatpush1.msra.mxu1 %v3495_v30 }
0x2374   :  { %2431 = vmatprep.subr.mxu1 %v3498_v32 }
0x2375   :  { %2432 = vmatpush1.msra.mxu1 %v3501_v2 }
0x2376   :  { %2433 = vmatprep.subr.mxu1 %v3504_v38 }
0x2377   :  { %2434 = vmatpush1.msra.mxu1 %v3507_v37 }
0x2378   :  { %2435 = vmatprep.subr.mxu1 %v3510_v35 }
0x2379   :  { %2436 = vmatpush1.msra.mxu1 %v3513_v42 }
0x242a   :  { %v2196_v14 = vpop.f32.mrf.mxu1 }
0x242b   :  { %v2204_v16 = vadd.f32 %v2202_v10, %v2196_v14 }
0x242c   :  { %v2198_v20 = vpop.f32.mrf.mxu1 }
0x242d   :  { %2899 = vtanh.f32 %v2204_v16  ;;  %v2207_v23 = vadd.f32 %v2205_v18, %v2198_v20  ;;  %v2645_v30 = vmul.f32 -1.442695, %v2204_v16 }
0x242f   :  { %2901 = vtanh.f32 %v2207_v23  ;;  %v2646_v32 = vmul.f32 -1.442695, %v2207_v23 }
0x2430   :  { %2903 = vpow2.f32 %v2645_v30 }
0x2431   :  { %2905 = vpow2.f32 %v2646_v32  ;;  %v2475_v32 = vrot.slane %v3594_v62, 6 }
0x243a   :  { %v2900_v60 = vpop.eup %2899 }
0x243b   :  { %2217 = vrot.lane.b32.xlu0 %v2900_v60, %s3009_s3 }
0x243c   :  { %v2902_v27 = vpop.eup %2901 }
0x243d   :  { %2241 = vrot.lane.b32.xlu1 %v2902_v27, %s3009_s3  ;;  %v2904_v2 = vpop.eup %2903 }
0x243e   :  { %v2906_v38 = vpop.eup %2905  ;;  %v2211_v37 = vadd.f32 1.0, %v2904_v2 }
0x243f   :  { %v2235_v35 = vadd.f32 1.0, %v2906_v38 }
0x2440   :  { %2907 = vrcp.f32 %v2211_v37 }
0x2441   :  { %2909 = vrcp.f32 %v2235_v35 }
0x244d   :  { %v2908_v42 = vpop.eup %2907 }
0x244e   :  { %v2910_v22 = vpop.eup %2909  ;;  %v2215_v28 = vmul.f32 %v2908_v42, %v3753_v59 }
0x244f   :  { %v2239_v29 = vmul.f32 %v2910_v22, %v3757_v40 }
0x24ad   :  { %v2218_v12 = vpop.permute.xlu0 %2217 }
0x24ae   :  { %v2220_v19 = vmul.f32 %v2908_v42, %v2218_v12 }
0x24af   :  { %v2242_v55 = vpop.permute.xlu1 %2241 }
0x24b0   :  { %2222 = vrot.lane.b32.xlu0 %v2220_v19, %s3010_s15  ;;  %v2244_v6 = vmul.f32 %v2910_v22, %v2242_v55 }
0x24b2   :  { %2246 = vrot.lane.b32.xlu1 %v2244_v6, %s3010_s15 }
0x2522   :  { %v2223_v25 = vpop.permute.xlu0 %2222 }
0x2523   :  { %v2225_v26 = vadd.f32 %v2223_v25, %v2215_v28 }
0x2524   :  { %v2247_v31 = vpop.permute.xlu1 %2246 }
0x2525   :  { %2911 = vtanh.f32 %v2225_v26  ;;  %v2249_v34 = vadd.f32 %v2247_v31, %v2239_v29  ;;  %v2513_v29 = vld [vmem:[%s3858_s7 + $0x30] sm:$0xff]  ;;  %v2512_v31 = vld [vmem:[%s3858_s7 + $0x28] sm:$0xff] }
0x2527   :  { %2913 = vtanh.f32 %v2249_v34 }
0x2532   :  { %v2912_v36 = vpop.eup %2911 }
0x2533   :  { %2228 = vrot.lane.b32.xlu0 %v2912_v36, %s3009_s3  ;;  %v2510_v36 = vld [vmem:[%s3858_s7 + $0x18] sm:$0xff] }
0x2534   :  { %v2914_v39 = vpop.eup %2913 }
0x2535   :  { %2252 = vrot.lane.b32.xlu1 %v2914_v39, %s3009_s3  ;;  %v2509_v39 = vld [vmem:[%s3858_s7 + $0x10] sm:$0xff] }
0x25a5   :  { %v2229_v33 = vpop.permute.xlu0 %2228 }
0x25a6   :  { %v2231_v44 = vmul.f32 %v2908_v42, %v2229_v33 }
0x25a7   :  { %v2253_v46 = vpop.permute.xlu1 %2252 }
0x25a8   :  { %2257 = vrot.lane.b32.xlu0 %v2231_v44, %s3010_s15  ;;  %v2255_v48 = vmul.f32 %v2910_v22, %v2253_v46  ;;  %v2508_v44 = vld [vmem:[%s3858_s7 + $0x8] sm:$0xff]  ;;  %v2507_v46 = vld [vmem:[%s3858_s7] sm:$0xff] }
0x25aa   :  { %2261 = vrot.lane.b32.xlu1 %v2255_v48, %s3009_s3 }
0x261a   :  { %v2258_v43 = vpop.permute.xlu0 %2257 }
0x261c   :  { %v2262_v45 = vpop.permute.xlu1 %2261 }
0x261d   :  { %v2264_v49 = vsel %vm329_vm1, %v2258_v43, %v2262_v45 }
0x261e   :  { %2647 = vmatmul.mubr.msk.f32.vlgmr.msra.gmra.mxu0 %vm193_vm2, %v2264_v49 }
0x261f   :  { %2679 = vmatprep.mubr.msk.f32.mxu0 %vm3011_vm6, %v3008_v1 }
0x26de   :  { %v2334_v53 = vpop.f32.mrf.mxu0 }
0x26df   :  { %v2341_v47 = vadd.f32 %v2339_v51, %v2334_v53  ;;  %v2652_v51 = vld [vmem:[#allocation2] ss:$0 sm:$0xff] }
0x26e0   :  { %v2336_v52 = vpop.f32.mrf.mxu0 }
0x26e1   :  { %2915 = vtanh.f32 %v2341_v47  ;;  %v2344_v63 = vadd.f32 %v2342_v54, %v2336_v52  ;;  %v2648_v41 = vmul.f32 -1.442695, %v2341_v47 }
0x26e3   :  { %2917 = vtanh.f32 %v2344_v63  ;;  %v2649_v56 = vmul.f32 -1.442695, %v2344_v63 }
0x26e4   :  { %2919 = vpow2.f32 %v2648_v41 }
0x26e5   :  { %2921 = vpow2.f32 %v2649_v56 }
0x26ee   :  { %v2916_v11 = vpop.eup %2915 }
0x26ef   :  { %2354 = vrot.lane.b32.xlu0 %v2916_v11, %s3009_s3 }
0x26f0   :  { %v2918_v58 = vpop.eup %2917 }
0x26f1   :  { %2378 = vrot.lane.b32.xlu1 %v2918_v58, %s3009_s3  ;;  %v2920_v57 = vpop.eup %2919 }
0x26f2   :  { %v2922_v5 = vpop.eup %2921  ;;  %v2348_v59 = vadd.f32 1.0, %v2920_v57 }
0x26f3   :  { %v2372_v15 = vadd.f32 1.0, %v2922_v5 }
0x26f4   :  { %2923 = vrcp.f32 %v2348_v59 }
0x26f5   :  { %2925 = vrcp.f32 %v2372_v15 }
0x2701   :  { %v2924_v21 = vpop.eup %2923 }
0x2702   :  { %v2926_v3 = vpop.eup %2925  ;;  %v2352_v17 = vmul.f32 %v2924_v21, %v2225_v26  ;;  %v2514_v26 = vld [vmem:[%s3858_s7 + $0x38] sm:$0xff] }
0x2703   :  { %v2376_v50 = vmul.f32 %v2926_v3, %v2249_v34  ;;  %2664 = vmatpush3.msra.mxu0 %v2514_v26  ;;  %v2511_v34 = vld [vmem:[%s3858_s7 + $0x20] sm:$0xff] }
0x2704   :  { %2665 = vmatprep.subr.mxu0 %v3008_v1 }
0x2705   :  { %2666 = vmatpush3.msra.mxu0 %v2513_v29 }
0x2706   :  { %2667 = vmatprep.subr.mxu0 %v3008_v1 }
0x2707   :  { %2668 = vmatpush3.msra.mxu0 %v2512_v31 }
0x2708   :  { %2669 = vmatprep.subr.mxu0 %v3008_v1 }
0x2709   :  { %2670 = vmatpush3.msra.mxu0 %v2511_v34 }
0x270a   :  { %2671 = vmatprep.subr.mxu0 %v3008_v1 }
0x270b   :  { %2672 = vmatpush3.msra.mxu0 %v2510_v36 }
0x270c   :  { %2673 = vmatprep.subr.mxu0 %v3008_v1 }
0x270d   :  { %2674 = vmatpush3.msra.mxu0 %v2509_v39 }
0x270e   :  { %2675 = vmatprep.subr.mxu0 %v3008_v1 }
0x270f   :  { %2676 = vmatpush3.msra.mxu0 %v2508_v44 }
0x2710   :  { %2677 = vmatprep.subr.mxu0 %v3008_v1 }
0x2711   :  { %2678 = vmatpush3.msra.mxu0 %v2507_v46 }
0x2761   :  { %v2355_v0 = vpop.permute.xlu0 %2354 }
0x2762   :  { %v2357_v40 = vmul.f32 %v2924_v21, %v2355_v0 }
0x2763   :  { %v2379_v13 = vpop.permute.xlu1 %2378 }
0x2764   :  { %2359 = vrot.lane.b32.xlu0 %v2357_v40, %s3010_s15  ;;  %v2381_v24 = vmul.f32 %v2926_v3, %v2379_v13 }
0x2766   :  { %2383 = vrot.lane.b32.xlu1 %v2381_v24, %s3010_s15 }
0x27d6   :  { %v2360_v9 = vpop.permute.xlu0 %2359 }
0x27d7   :  { %v2362_v61 = vadd.f32 %v2360_v9, %v2352_v17 }
0x27d8   :  { %v2384_v4 = vpop.permute.xlu1 %2383 }
0x27d9   :  { %2927 = vtanh.f32 %v2362_v61  ;;  %v2386_v7 = vadd.f32 %v2384_v4, %v2376_v50 }
0x27db   :  { %2929 = vtanh.f32 %v2386_v7 }
0x27e6   :  { %v2928_v10 = vpop.eup %2927 }
0x27e7   :  { %2365 = vrot.lane.b32.xlu0 %v2928_v10, %s3009_s3 }
0x27e8   :  { %v2930_v14 = vpop.eup %2929 }
0x27e9   :  { %2389 = vrot.lane.b32.xlu1 %v2930_v14, %s3009_s3 }
0x2859   :  { %v2366_v16 = vpop.permute.xlu0 %2365 }
0x285a   :  { %v2368_v18 = vmul.f32 %v2924_v21, %v2366_v16 }
0x285b   :  { %v2390_v20 = vpop.permute.xlu1 %2389 }
0x285c   :  { %2394 = vrot.lane.b32.xlu0 %v2368_v18, %s3010_s15  ;;  %v2392_v23 = vmul.f32 %v2926_v3, %v2390_v20 }
0x285e   :  { %2398 = vrot.lane.b32.xlu1 %v2392_v23, %s3009_s3 }
0x28ce   :  { %v2395_v60 = vpop.permute.xlu0 %2394 }
0x28d0   :  { %v2399_v27 = vpop.permute.xlu1 %2398 }
0x28d1   :  { %v2401_v30 = vsel %vm329_vm1, %v2395_v60, %v2399_v27 }
0x28d2   :  { %2650 = vmatmul.mubr.msk.f32.vlgmr.msra.gmra.mxu1 %vm193_vm2, %v2401_v30 }
0x2992   :  { %v2471_v2 = vpop.f32.mrf.mxu1 }
0x2993   :  { %v2477_v38 = vadd.f32 %v2475_v32, %v2471_v2 }
0x2994   :  { %v2473_v37 = vpop.f32.mrf.mxu1 }
0x2995   :  { %2931 = vtanh.f32 %v2477_v38  ;;  %v2651_v42 = vmul.f32 -1.442695, %v2477_v38 }
0x2997   :  { %2933 = vpow2.f32 %v2651_v42 }
0x29a2   :  { %v2932_v35 = vpop.eup %2931 }
0x29a3   :  { %2487 = vrot.lane.b32.xlu0 %v2932_v35, %s3009_s3 }
0x29a4   :  { %v2934_v12 = vpop.eup %2933 }
0x29a5   :  { %v2481_v19 = vadd.f32 1.0, %v2934_v12 }
0x29a7   :  { %2935 = vrcp.f32 %v2481_v19 }
0x29b4   :  { %v2936_v22 = vpop.eup %2935 }
0x29b5   :  { %v2485_v28 = vmul.f32 %v2936_v22, %v2362_v61 }
0x2a15   :  { %v2488_v55 = vpop.permute.xlu0 %2487 }
0x2a16   :  { %v2490_v6 = vmul.f32 %v2936_v22, %v2488_v55 }
0x2a18   :  { %2492 = vrot.lane.b32.xlu1 %v2490_v6, %s3010_s15 }
0x2a8a   :  { %v2493_v25 = vpop.permute.xlu1 %2492 }
0x2a8b   :  { %v2495_v62 = vadd.f32 %v2493_v25, %v2485_v28 }
0x2a8d   :  { %2937 = vtanh.f32 %v2495_v62 }
0x2a9a   :  { %v2938_v33 = vpop.eup %2937 }
0x2a9b   :  { %2498 = vrot.lane.b32.xlu0 %v2938_v33, %s3009_s3 }
0x2b0d   :  { %v2499_v48 = vpop.permute.xlu0 %2498 }
0x2b0e   :  { %v2501_v43 = vmul.f32 %v2936_v22, %v2499_v48 }
0x2b10   :  { %2503 = vrot.lane.b32.xlu1 %v2501_v43, %s3010_s15 }
0x2b82   :  { %v2504_v45 = vpop.permute.xlu1 %2503 }
0x2b83   :  { %v2506_v49 = vsel %vm329_vm1, %v2504_v45, %v3613_v8 }
0x2b84   :  { %2680 = vmatmul.mubr.msk.f32.vlgmr.msra.gmra.mxu0 %vm193_vm2, %v2506_v49 }
0x2c44   :  { %v2591_v53 = vpop.f32.mrf.mxu0 }
0x2c45   :  { %v2592_v47 = vadd.f32 %v2652_v51, %v2591_v53 }
0x2c46   :  { %v2681_v54 = vpop.f32.mrf.mxu0 }
0x2c47   :  { %2596 = vst.msk [vmem:[%s3860_s9] sm:$0x3] %vm2595_vm7, %v2592_v47 }
0x2c48   :  { %2601 = vsyncpa [#allocation4], 1 }
0x2c49   :  { %2602 = vsyncpa [#allocation6], 1 }

</bundles_post_ra>
